<compile_context>
chip_gen: v7x
topology: tpu7x:2x2x1
jax: 0.10.0
libtpu: 0.0.40
codegen_flags: <defaults>
</compile_context>

<pallas_src>
import numpy as np
import jax
import jax.numpy as jnp
from jax import lax
from jax.experimental import pallas as pl
from jax.experimental.pallas import tpu as pltpu


# ------------------------------ static geometry ------------------------------
H1, W1 = 28, 28              # conv1 spatial
HP1, WP1 = H1 + 3, W1 + 2    # padded: 1 top, 2 bottom rows; 1 left, 1 right col
S1_IN = HP1 * WP1            # 930  flat padded conv1 input length
WIDE1 = H1 * WP1             # 840  flat "wide" conv1 output length
LP1 = (H1 - 1) * WP1 - 1     # 809  length of the 4-way shifted max

H2, W2 = 14, 14              # conv2 spatial (after pool1)
HP2, WP2 = H2 + 3, W2 + 2    # 17, 16
S2_IN = HP2 * WP2            # 272
WIDE2 = H2 * WP2             # 224
LP2 = (H2 - 1) * WP2 - 1     # 207

C1, C2 = 9, 16               # conv output channels
HO2, WO2 = 7, 7              # final pooled spatial
FC1_IN = C2 * HO2 * WO2      # 784
FC1_OUT, FC2_OUT, FC3_OUT = 392, 98, 10


# -------------------------------- the kernel ---------------------------------

def _dig_rec_kernel(x_ref, w1t_ref, b1_ref, s1_ref,
                    w2t_ref, b2_ref, s2_ref,
                    wf1_ref, bf1_ref, wf2_ref, bf2_ref, wf3_ref, bf3_ref,
                    out_ref):
    f32 = jnp.float32

    # --------------- conv1 (Cin=1): wide shift-and-accumulate ----------------
    x = x_ref[0]                                        # (1, 930)
    wide1 = jnp.zeros((C1, WIDE1), f32)
    for t in range(9):
        off = (t // 3) * WP1 + (t % 3)
        # (9, 1) tap column * (1, 840) shifted input -> (9, 840)   (VPU MAC)
        wide1 = wide1 + w1t_ref[t] * x[:, off:off + WIDE1]

    # fused 2x2/2 maxpool: 4-way shifted max over the wide layout, then bias
    p1 = jnp.maximum(
        jnp.maximum(wide1[:, 0:LP1], wide1[:, 1:1 + LP1]),
        jnp.maximum(wide1[:, WP1:WP1 + LP1], wide1[:, WP1 + 1:WP1 + 1 + LP1]))
    p1 = p1 + b1_ref[...]                               # (9, 809) + (9, 1)
    # selection matmul: picks pooled positions and embeds them into conv2's
    # zero-padded flat layout; relu(0) = 0 keeps the padding exact.
    x2 = jnp.maximum(
        jnp.dot(p1, s1_ref[...], preferred_element_type=f32), 0.0)   # (9, 272)

    # --------------- conv2 (Cin=9): taps are real MXU matmuls ----------------
    wide2 = jnp.zeros((C2, WIDE2), f32)
    for t in range(9):
        off = (t // 3) * WP2 + (t % 3)
        wide2 = wide2 + jnp.dot(w2t_ref[t], x2[:, off:off + WIDE2],
                                preferred_element_type=f32)  # (16,9)@(9,224)

    p2 = jnp.maximum(
        jnp.maximum(wide2[:, 0:LP2], wide2[:, 1:1 + LP2]),
        jnp.maximum(wide2[:, WP2:WP2 + LP2], wide2[:, WP2 + 1:WP2 + 1 + LP2]))
    p2 = p2 + b2_ref[...]                               # (16, 207) + (16, 1)
    h0 = jnp.maximum(
        jnp.dot(p2, s2_ref[...], preferred_element_type=f32), 0.0)   # (16, 49)

    # --------------- fc1 / fc2 / fc3 (weights VMEM-resident) -----------------
    # torch NCHW flatten == sum over per-channel 49-column chunks.
    acc = jnp.zeros((1, FC1_OUT), f32)
    for c in range(C2):
        acc = acc + jnp.dot(h0[c:c + 1, :], wf1_ref[c],
                            preferred_element_type=f32)      # (1,49)@(49,392)
    h1 = jnp.maximum(acc + bf1_ref[...], 0.0)                 # (1, 392)
    h2 = jnp.maximum(
        jnp.dot(h1, wf2_ref[...], preferred_element_type=f32) + bf2_ref[...],
        0.0)                                                  # (1, 98)
    out_ref[0] = (jnp.dot(h2, wf3_ref[...], preferred_element_type=f32)
                  + bf3_ref[...])                             # (1, 10)


# ------------------------- one-time parameter prep ---------------------------

def _selection_matrices():
    # S1: pooled conv1 (14x14) -> conv2's zero-padded flat layout (17x16)
    s1 = np.zeros((LP1, S2_IN), np.float32)
    for yo in range(H2):
        for xo in range(W2):
            s1[2 * yo * WP1 + 2 * xo, (yo + 1) * WP2 + (xo + 1)] = 1.0
    # S2: pooled conv2 (7x7) -> torch NCHW flatten column order (49)
    s2 = np.zeros((LP2, HO2 * WO2), np.float32)
    for yo in range(HO2):
        for xo in range(WO2):
            s2[2 * yo * WP2 + 2 * xo, yo * WO2 + xo] = 1.0
    return jnp.asarray(s1), jnp.asarray(s2)


def prepare_params(params):
    """One-time rearrangement of the PyTorch-layout parameters (no per-forward .T)."""
    s1, s2 = _selection_matrices()
    f32 = jnp.float32
    w1t = jnp.transpose(params["conv1_w"].reshape(C1, 1, 9), (2, 0, 1))    # (9, 9, 1)
    w2t = jnp.transpose(params["conv2_w"].reshape(C2, C1, 9), (2, 0, 1))   # (9, 16, 9)
    return dict(
        w1t=w1t.astype(f32),
        b1=params["conv1_b"].reshape(C1, 1).astype(f32),
        s1=s1,
        w2t=w2t.astype(f32),
        b2=params["conv2_b"].reshape(C2, 1).astype(f32),
        s2=s2,
        wf1=params["fc1_w"].T.reshape(C2, HO2 * WO2, FC1_OUT).astype(f32),  # (16,49,392)
        bf1=params["fc1_b"].reshape(1, FC1_OUT).astype(f32),
        wf2=params["fc2_w"].T.astype(f32),                                  # (392, 98)
        bf2=params["fc2_b"].reshape(1, FC2_OUT).astype(f32),
        wf3=params["fc3_w"].T.astype(f32),                                  # (98, 10)
        bf3=params["fc3_b"].reshape(1, FC3_OUT).astype(f32),
    )


# ------------------------------- forward pass --------------------------------

_PREP_ORDER = ("w1t", "b1", "s1", "w2t", "b2", "s2",
               "wf1", "bf1", "wf2", "bf2", "wf3", "bf3")


def dig_rec_forward(x_nchw, prep):
    x = x_nchw.astype(jnp.float32)                       # x.float()
    B = x.shape[0]
    # zero-pad for the 3x3/pad-1 conv + flat "wide" trick, then a free reshape.
    xflat = jnp.pad(x, ((0, 0), (0, 0), (1, 2), (1, 1))).reshape(B, 1, S1_IN)

    def _resident(shape):
        n = len(shape)
        return pl.BlockSpec(shape, lambda b, _n=n: (0,) * _n)

    weights = [prep[k] for k in _PREP_ORDER]

    out = pl.pallas_call(
        _dig_rec_kernel,
        out_shape=jax.ShapeDtypeStruct((B, 1, FC3_OUT), jnp.float32),
        grid=(B,),
        in_specs=[pl.BlockSpec((1, 1, S1_IN), lambda b: (b, 0, 0))]
                 + [_resident(w.shape) for w in weights],
        out_specs=pl.BlockSpec((1, 1, FC3_OUT), lambda b: (b, 0, 0)),
        compiler_params=pltpu.CompilerParams(
            dimension_semantics=("parallel",)),
    )(xflat, *weights)
    return out.reshape(B, FC3_OUT)


# --------------------- pure-JAX reference (for checking) ---------------------

def dig_rec_reference(x_nchw, params):
    x = x_nchw.astype(jnp.float32)

    def conv(x, w, b):
        y = lax.conv_general_dilated(x, w, (1, 1), ((1, 1), (1, 1)),
                                     dimension_numbers=("NCHW", "OIHW", "NCHW"))
        return jax.nn.relu(y + b[None, :, None, None])

    def pool(x):
        y = lax.reduce_window(x, -jnp.inf, lax.max, (1, 1, 2, 2), (1, 1, 2, 2), "VALID")
        return jax.nn.relu(y)

    x = conv(x, params["conv1_w"], params["conv1_b"])
    x = pool(x)
    x = conv(x, params["conv2_w"], params["conv2_b"])
    x = pool(x)
    x = x.reshape(x.shape[0], -1)
    x = jax.nn.relu(x @ params["fc1_w"].T + params["fc1_b"])
    x = jax.nn.relu(x @ params["fc2_w"].T + params["fc2_b"])
    return x @ params["fc3_w"].T + params["fc3_b"]


# ------------------------------- params / main --------------------------------

def init_params(key):
    ks = jax.random.split(key, 10)

    def w(k, shape, fan_in):
        return jax.random.normal(k, shape, jnp.float32) / jnp.sqrt(float(fan_in))

    return {
        "conv1_w": w(ks[0], (9, 1, 3, 3), 9),
        "conv1_b": w(ks[1], (9,), 9),
        "conv2_w": w(ks[2], (16, 9, 3, 3), 81),
        "conv2_b": w(ks[3], (16,), 81),
        "fc1_w": w(ks[4], (392, 16 * 7 * 7), 16 * 7 * 7),
        "fc1_b": w(ks[5], (392,), 16 * 7 * 7),
        "fc2_w": w(ks[6], (98, 392), 392),
        "fc2_b": w(ks[7], (98,), 392),
        "fc3_w": w(ks[8], (10, 98), 98),
        "fc3_b": w(ks[9], (10,), 98),
    }


if __name__ == "__main__":
    key = jax.random.PRNGKey(0)
    k_param, k_x = jax.random.split(key)
    params = init_params(k_param)
    prep = prepare_params(params)              # one-time weight rearrangement
    # fc1 = Linear(16*7*7, ...) implies 28x28 spatial input (MNIST); batch = 2.
    x = jax.random.normal(k_x, (2, 1, 28, 28), jnp.float32)

    fwd = jax.jit(dig_rec_forward)
    out = jax.block_until_ready(fwd(x, prep))
    ref = jax.block_until_ready(dig_rec_reference(x, params))

    assert out.shape == (2, 10), out.shape
    assert jnp.allclose(out, ref, rtol=1e-3, atol=1e-3), (out, ref)
    print("KERNEL_OK")
</pallas_src>

<mosaic_0001>
module attributes {stable_mosaic.version = 11 : i64} {
  func.func @_dig_rec_kernel(%arg0: i32, %arg1: memref<1x1x930xf32, #tpu.memory_space<vmem>>, %arg2: memref<9x9x1xf32, #tpu.memory_space<vmem>>, %arg3: memref<9x1xf32, #tpu.memory_space<vmem>>, %arg4: memref<809x272xf32, #tpu.memory_space<vmem>>, %arg5: memref<9x16x9xf32, #tpu.memory_space<vmem>>, %arg6: memref<16x1xf32, #tpu.memory_space<vmem>>, %arg7: memref<207x49xf32, #tpu.memory_space<vmem>>, %arg8: memref<16x49x392xf32, #tpu.memory_space<vmem>>, %arg9: memref<1x392xf32, #tpu.memory_space<vmem>>, %arg10: memref<392x98xf32, #tpu.memory_space<vmem>>, %arg11: memref<1x98xf32, #tpu.memory_space<vmem>>, %arg12: memref<98x10xf32, #tpu.memory_space<vmem>>, %arg13: memref<1x10xf32, #tpu.memory_space<vmem>>, %arg14: memref<1x1x10xf32, #tpu.memory_space<vmem>>) attributes {dimension_semantics = [#tpu.dimension_semantics<parallel>], iteration_bounds = array<i64: 2>, scalar_prefetch = 0 : i64, scratch_operands = 0 : i64, tpu.core_type = #tpu.core_type<tc>, window_params = [{transform_indices = @transform_0, window_bounds = array<i64: 1, 1, 930>}, {pipeline_mode = #tpu.pipeline_mode<synchronous>, transform_indices = @transform_1, window_bounds = array<i64: 9, 9, 1>}, {pipeline_mode = #tpu.pipeline_mode<synchronous>, transform_indices = @transform_2, window_bounds = array<i64: 9, 1>}, {pipeline_mode = #tpu.pipeline_mode<synchronous>, transform_indices = @transform_3, window_bounds = array<i64: 809, 272>}, {pipeline_mode = #tpu.pipeline_mode<synchronous>, transform_indices = @transform_4, window_bounds = array<i64: 9, 16, 9>}, {pipeline_mode = #tpu.pipeline_mode<synchronous>, transform_indices = @transform_5, window_bounds = array<i64: 16, 1>}, {pipeline_mode = #tpu.pipeline_mode<synchronous>, transform_indices = @transform_6, window_bounds = array<i64: 207, 49>}, {pipeline_mode = #tpu.pipeline_mode<synchronous>, transform_indices = @transform_7, window_bounds = array<i64: 16, 49, 392>}, {pipeline_mode = #tpu.pipeline_mode<synchronous>, transform_indices = @transform_8, window_bounds = array<i64: 1, 392>}, {pipeline_mode = #tpu.pipeline_mode<synchronous>, transform_indices = @transform_9, window_bounds = array<i64: 392, 98>}, {pipeline_mode = #tpu.pipeline_mode<synchronous>, transform_indices = @transform_10, window_bounds = array<i64: 1, 98>}, {pipeline_mode = #tpu.pipeline_mode<synchronous>, transform_indices = @transform_11, window_bounds = array<i64: 98, 10>}, {pipeline_mode = #tpu.pipeline_mode<synchronous>, transform_indices = @transform_12, window_bounds = array<i64: 1, 10>}, {transform_indices = @transform_13, window_bounds = array<i64: 1, 1, 10>}]} {
    %c0 = arith.constant 0 : index
    %c0_0 = arith.constant 0 : index
    %c0_1 = arith.constant 0 : index
    %0 = vector.load %arg1[%c0, %c0_0, %c0_1] : memref<1x1x930xf32, #tpu.memory_space<vmem>>, vector<1x1x930xf32>
    %1 = vector.shape_cast %0 : vector<1x1x930xf32> to vector<1x930xf32>
    %cst = arith.constant 0.000000e+00 : f32
    %2 = vector.broadcast %cst : f32 to vector<9x840xf32>
    %c0_2 = arith.constant 0 : index
    %c0_3 = arith.constant 0 : index
    %c0_4 = arith.constant 0 : index
    %3 = vector.load %arg2[%c0_2, %c0_3, %c0_4] : memref<9x9x1xf32, #tpu.memory_space<vmem>>, vector<1x9x1xf32>
    %4 = vector.shape_cast %3 : vector<1x9x1xf32> to vector<9x1xf32>
    %5 = vector.extract_strided_slice %1 {offsets = [0, 0], sizes = [1, 840], strides = [1, 1]} : vector<1x930xf32> to vector<1x840xf32>
    %6 = vector.broadcast %4 : vector<9x1xf32> to vector<9x840xf32>
    %7 = vector.broadcast %5 : vector<1x840xf32> to vector<9x840xf32>
    %8 = arith.mulf %6, %7 : vector<9x840xf32>
    %9 = arith.addf %2, %8 : vector<9x840xf32>
    %c1 = arith.constant 1 : index
    %c0_5 = arith.constant 0 : index
    %c0_6 = arith.constant 0 : index
    %10 = vector.load %arg2[%c1, %c0_5, %c0_6] : memref<9x9x1xf32, #tpu.memory_space<vmem>>, vector<1x9x1xf32>
    %11 = vector.shape_cast %10 : vector<1x9x1xf32> to vector<9x1xf32>
    %12 = vector.extract_strided_slice %1 {offsets = [0, 1], sizes = [1, 840], strides = [1, 1]} : vector<1x930xf32> to vector<1x840xf32>
    %13 = vector.broadcast %11 : vector<9x1xf32> to vector<9x840xf32>
    %14 = vector.broadcast %12 : vector<1x840xf32> to vector<9x840xf32>
    %15 = arith.mulf %13, %14 : vector<9x840xf32>
    %16 = arith.addf %9, %15 : vector<9x840xf32>
    %c2 = arith.constant 2 : index
    %c0_7 = arith.constant 0 : index
    %c0_8 = arith.constant 0 : index
    %17 = vector.load %arg2[%c2, %c0_7, %c0_8] : memref<9x9x1xf32, #tpu.memory_space<vmem>>, vector<1x9x1xf32>
    %18 = vector.shape_cast %17 : vector<1x9x1xf32> to vector<9x1xf32>
    %19 = vector.extract_strided_slice %1 {offsets = [0, 2], sizes = [1, 840], strides = [1, 1]} : vector<1x930xf32> to vector<1x840xf32>
    %20 = vector.broadcast %18 : vector<9x1xf32> to vector<9x840xf32>
    %21 = vector.broadcast %19 : vector<1x840xf32> to vector<9x840xf32>
    %22 = arith.mulf %20, %21 : vector<9x840xf32>
    %23 = arith.addf %16, %22 : vector<9x840xf32>
    %c3 = arith.constant 3 : index
    %c0_9 = arith.constant 0 : index
    %c0_10 = arith.constant 0 : index
    %24 = vector.load %arg2[%c3, %c0_9, %c0_10] : memref<9x9x1xf32, #tpu.memory_space<vmem>>, vector<1x9x1xf32>
    %25 = vector.shape_cast %24 : vector<1x9x1xf32> to vector<9x1xf32>
    %26 = vector.extract_strided_slice %1 {offsets = [0, 30], sizes = [1, 840], strides = [1, 1]} : vector<1x930xf32> to vector<1x840xf32>
    %27 = vector.broadcast %25 : vector<9x1xf32> to vector<9x840xf32>
    %28 = vector.broadcast %26 : vector<1x840xf32> to vector<9x840xf32>
    %29 = arith.mulf %27, %28 : vector<9x840xf32>
    %30 = arith.addf %23, %29 : vector<9x840xf32>
    %c4 = arith.constant 4 : index
    %c0_11 = arith.constant 0 : index
    %c0_12 = arith.constant 0 : index
    %31 = vector.load %arg2[%c4, %c0_11, %c0_12] : memref<9x9x1xf32, #tpu.memory_space<vmem>>, vector<1x9x1xf32>
    %32 = vector.shape_cast %31 : vector<1x9x1xf32> to vector<9x1xf32>
    %33 = vector.extract_strided_slice %1 {offsets = [0, 31], sizes = [1, 840], strides = [1, 1]} : vector<1x930xf32> to vector<1x840xf32>
    %34 = vector.broadcast %32 : vector<9x1xf32> to vector<9x840xf32>
    %35 = vector.broadcast %33 : vector<1x840xf32> to vector<9x840xf32>
    %36 = arith.mulf %34, %35 : vector<9x840xf32>
    %37 = arith.addf %30, %36 : vector<9x840xf32>
    %c5 = arith.constant 5 : index
    %c0_13 = arith.constant 0 : index
    %c0_14 = arith.constant 0 : index
    %38 = vector.load %arg2[%c5, %c0_13, %c0_14] : memref<9x9x1xf32, #tpu.memory_space<vmem>>, vector<1x9x1xf32>
    %39 = vector.shape_cast %38 : vector<1x9x1xf32> to vector<9x1xf32>
    %40 = vector.extract_strided_slice %1 {offsets = [0, 32], sizes = [1, 840], strides = [1, 1]} : vector<1x930xf32> to vector<1x840xf32>
    %41 = vector.broadcast %39 : vector<9x1xf32> to vector<9x840xf32>
    %42 = vector.broadcast %40 : vector<1x840xf32> to vector<9x840xf32>
    %43 = arith.mulf %41, %42 : vector<9x840xf32>
    %44 = arith.addf %37, %43 : vector<9x840xf32>
    %c6 = arith.constant 6 : index
    %c0_15 = arith.constant 0 : index
    %c0_16 = arith.constant 0 : index
    %45 = vector.load %arg2[%c6, %c0_15, %c0_16] : memref<9x9x1xf32, #tpu.memory_space<vmem>>, vector<1x9x1xf32>
    %46 = vector.shape_cast %45 : vector<1x9x1xf32> to vector<9x1xf32>
    %47 = vector.extract_strided_slice %1 {offsets = [0, 60], sizes = [1, 840], strides = [1, 1]} : vector<1x930xf32> to vector<1x840xf32>
    %48 = vector.broadcast %46 : vector<9x1xf32> to vector<9x840xf32>
    %49 = vector.broadcast %47 : vector<1x840xf32> to vector<9x840xf32>
    %50 = arith.mulf %48, %49 : vector<9x840xf32>
    %51 = arith.addf %44, %50 : vector<9x840xf32>
    %c7 = arith.constant 7 : index
    %c0_17 = arith.constant 0 : index
    %c0_18 = arith.constant 0 : index
    %52 = vector.load %arg2[%c7, %c0_17, %c0_18] : memref<9x9x1xf32, #tpu.memory_space<vmem>>, vector<1x9x1xf32>
    %53 = vector.shape_cast %52 : vector<1x9x1xf32> to vector<9x1xf32>
    %54 = vector.extract_strided_slice %1 {offsets = [0, 61], sizes = [1, 840], strides = [1, 1]} : vector<1x930xf32> to vector<1x840xf32>
    %55 = vector.broadcast %53 : vector<9x1xf32> to vector<9x840xf32>
    %56 = vector.broadcast %54 : vector<1x840xf32> to vector<9x840xf32>
    %57 = arith.mulf %55, %56 : vector<9x840xf32>
    %58 = arith.addf %51, %57 : vector<9x840xf32>
    %c8 = arith.constant 8 : index
    %c0_19 = arith.constant 0 : index
    %c0_20 = arith.constant 0 : index
    %59 = vector.load %arg2[%c8, %c0_19, %c0_20] : memref<9x9x1xf32, #tpu.memory_space<vmem>>, vector<1x9x1xf32>
    %60 = vector.shape_cast %59 : vector<1x9x1xf32> to vector<9x1xf32>
    %61 = vector.extract_strided_slice %1 {offsets = [0, 62], sizes = [1, 840], strides = [1, 1]} : vector<1x930xf32> to vector<1x840xf32>
    %62 = vector.broadcast %60 : vector<9x1xf32> to vector<9x840xf32>
    %63 = vector.broadcast %61 : vector<1x840xf32> to vector<9x840xf32>
    %64 = arith.mulf %62, %63 : vector<9x840xf32>
    %65 = arith.addf %58, %64 : vector<9x840xf32>
    %66 = vector.extract_strided_slice %65 {offsets = [0, 0], sizes = [9, 809], strides = [1, 1]} : vector<9x840xf32> to vector<9x809xf32>
    %67 = vector.extract_strided_slice %65 {offsets = [0, 1], sizes = [9, 809], strides = [1, 1]} : vector<9x840xf32> to vector<9x809xf32>
    %68 = arith.maximumf %66, %67 : vector<9x809xf32>
    %69 = vector.extract_strided_slice %65 {offsets = [0, 30], sizes = [9, 809], strides = [1, 1]} : vector<9x840xf32> to vector<9x809xf32>
    %70 = vector.extract_strided_slice %65 {offsets = [0, 31], sizes = [9, 809], strides = [1, 1]} : vector<9x840xf32> to vector<9x809xf32>
    %71 = arith.maximumf %69, %70 : vector<9x809xf32>
    %72 = arith.maximumf %68, %71 : vector<9x809xf32>
    %c0_21 = arith.constant 0 : index
    %c0_22 = arith.constant 0 : index
    %73 = vector.load %arg3[%c0_21, %c0_22] : memref<9x1xf32, #tpu.memory_space<vmem>>, vector<9x1xf32>
    %74 = vector.broadcast %73 : vector<9x1xf32> to vector<9x809xf32>
    %75 = arith.addf %72, %74 : vector<9x809xf32>
    %c0_23 = arith.constant 0 : index
    %c0_24 = arith.constant 0 : index
    %76 = vector.load %arg4[%c0_23, %c0_24] : memref<809x272xf32, #tpu.memory_space<vmem>>, vector<809x272xf32>
    %cst_25 = arith.constant dense<0.000000e+00> : vector<9x272xf32>
    %77 = tpu.matmul %75, %76, %cst_25 {dimension_numbers = #tpu.dot_dimension_numbers<[1], [0], [0], [1], [0, 0, 1, 1], [], []>} : vector<9x809xf32>, vector<809x272xf32>, vector<9x272xf32> -> vector<9x272xf32>
    %cst_26 = arith.constant 0.000000e+00 : f32
    %78 = vector.broadcast %cst_26 : f32 to vector<9x272xf32>
    %79 = arith.maximumf %77, %78 : vector<9x272xf32>
    %cst_27 = arith.constant 0.000000e+00 : f32
    %80 = vector.broadcast %cst_27 : f32 to vector<16x224xf32>
    %c0_28 = arith.constant 0 : index
    %c0_29 = arith.constant 0 : index
    %c0_30 = arith.constant 0 : index
    %81 = vector.load %arg5[%c0_28, %c0_29, %c0_30] : memref<9x16x9xf32, #tpu.memory_space<vmem>>, vector<1x16x9xf32>
    %82 = vector.shape_cast %81 : vector<1x16x9xf32> to vector<16x9xf32>
    %83 = vector.extract_strided_slice %79 {offsets = [0, 0], sizes = [9, 224], strides = [1, 1]} : vector<9x272xf32> to vector<9x224xf32>
    %cst_31 = arith.constant dense<0.000000e+00> : vector<16x224xf32>
    %84 = tpu.matmul %82, %83, %cst_31 {dimension_numbers = #tpu.dot_dimension_numbers<[1], [0], [0], [1], [0, 0, 1, 1], [], []>} : vector<16x9xf32>, vector<9x224xf32>, vector<16x224xf32> -> vector<16x224xf32>
    %85 = arith.addf %80, %84 : vector<16x224xf32>
    %c1_32 = arith.constant 1 : index
    %c0_33 = arith.constant 0 : index
    %c0_34 = arith.constant 0 : index
    %86 = vector.load %arg5[%c1_32, %c0_33, %c0_34] : memref<9x16x9xf32, #tpu.memory_space<vmem>>, vector<1x16x9xf32>
    %87 = vector.shape_cast %86 : vector<1x16x9xf32> to vector<16x9xf32>
    %88 = vector.extract_strided_slice %79 {offsets = [0, 1], sizes = [9, 224], strides = [1, 1]} : vector<9x272xf32> to vector<9x224xf32>
    %cst_35 = arith.constant dense<0.000000e+00> : vector<16x224xf32>
    %89 = tpu.matmul %87, %88, %cst_35 {dimension_numbers = #tpu.dot_dimension_numbers<[1], [0], [0], [1], [0, 0, 1, 1], [], []>} : vector<16x9xf32>, vector<9x224xf32>, vector<16x224xf32> -> vector<16x224xf32>
    %90 = arith.addf %85, %89 : vector<16x224xf32>
    %c2_36 = arith.constant 2 : index
    %c0_37 = arith.constant 0 : index
    %c0_38 = arith.constant 0 : index
    %91 = vector.load %arg5[%c2_36, %c0_37, %c0_38] : memref<9x16x9xf32, #tpu.memory_space<vmem>>, vector<1x16x9xf32>
    %92 = vector.shape_cast %91 : vector<1x16x9xf32> to vector<16x9xf32>
    %93 = vector.extract_strided_slice %79 {offsets = [0, 2], sizes = [9, 224], strides = [1, 1]} : vector<9x272xf32> to vector<9x224xf32>
    %cst_39 = arith.constant dense<0.000000e+00> : vector<16x224xf32>
    %94 = tpu.matmul %92, %93, %cst_39 {dimension_numbers = #tpu.dot_dimension_numbers<[1], [0], [0], [1], [0, 0, 1, 1], [], []>} : vector<16x9xf32>, vector<9x224xf32>, vector<16x224xf32> -> vector<16x224xf32>
    %95 = arith.addf %90, %94 : vector<16x224xf32>
    %c3_40 = arith.constant 3 : index
    %c0_41 = arith.constant 0 : index
    %c0_42 = arith.constant 0 : index
    %96 = vector.load %arg5[%c3_40, %c0_41, %c0_42] : memref<9x16x9xf32, #tpu.memory_space<vmem>>, vector<1x16x9xf32>
    %97 = vector.shape_cast %96 : vector<1x16x9xf32> to vector<16x9xf32>
    %98 = vector.extract_strided_slice %79 {offsets = [0, 16], sizes = [9, 224], strides = [1, 1]} : vector<9x272xf32> to vector<9x224xf32>
    %cst_43 = arith.constant dense<0.000000e+00> : vector<16x224xf32>
    %99 = tpu.matmul %97, %98, %cst_43 {dimension_numbers = #tpu.dot_dimension_numbers<[1], [0], [0], [1], [0, 0, 1, 1], [], []>} : vector<16x9xf32>, vector<9x224xf32>, vector<16x224xf32> -> vector<16x224xf32>
    %100 = arith.addf %95, %99 : vector<16x224xf32>
    %c4_44 = arith.constant 4 : index
    %c0_45 = arith.constant 0 : index
    %c0_46 = arith.constant 0 : index
    %101 = vector.load %arg5[%c4_44, %c0_45, %c0_46] : memref<9x16x9xf32, #tpu.memory_space<vmem>>, vector<1x16x9xf32>
    %102 = vector.shape_cast %101 : vector<1x16x9xf32> to vector<16x9xf32>
    %103 = vector.extract_strided_slice %79 {offsets = [0, 17], sizes = [9, 224], strides = [1, 1]} : vector<9x272xf32> to vector<9x224xf32>
    %cst_47 = arith.constant dense<0.000000e+00> : vector<16x224xf32>
    %104 = tpu.matmul %102, %103, %cst_47 {dimension_numbers = #tpu.dot_dimension_numbers<[1], [0], [0], [1], [0, 0, 1, 1], [], []>} : vector<16x9xf32>, vector<9x224xf32>, vector<16x224xf32> -> vector<16x224xf32>
    %105 = arith.addf %100, %104 : vector<16x224xf32>
    %c5_48 = arith.constant 5 : index
    %c0_49 = arith.constant 0 : index
    %c0_50 = arith.constant 0 : index
    %106 = vector.load %arg5[%c5_48, %c0_49, %c0_50] : memref<9x16x9xf32, #tpu.memory_space<vmem>>, vector<1x16x9xf32>
    %107 = vector.shape_cast %106 : vector<1x16x9xf32> to vector<16x9xf32>
    %108 = vector.extract_strided_slice %79 {offsets = [0, 18], sizes = [9, 224], strides = [1, 1]} : vector<9x272xf32> to vector<9x224xf32>
    %cst_51 = arith.constant dense<0.000000e+00> : vector<16x224xf32>
    %109 = tpu.matmul %107, %108, %cst_51 {dimension_numbers = #tpu.dot_dimension_numbers<[1], [0], [0], [1], [0, 0, 1, 1], [], []>} : vector<16x9xf32>, vector<9x224xf32>, vector<16x224xf32> -> vector<16x224xf32>
    %110 = arith.addf %105, %109 : vector<16x224xf32>
    %c6_52 = arith.constant 6 : index
    %c0_53 = arith.constant 0 : index
    %c0_54 = arith.constant 0 : index
    %111 = vector.load %arg5[%c6_52, %c0_53, %c0_54] : memref<9x16x9xf32, #tpu.memory_space<vmem>>, vector<1x16x9xf32>
    %112 = vector.shape_cast %111 : vector<1x16x9xf32> to vector<16x9xf32>
    %113 = vector.extract_strided_slice %79 {offsets = [0, 32], sizes = [9, 224], strides = [1, 1]} : vector<9x272xf32> to vector<9x224xf32>
    %cst_55 = arith.constant dense<0.000000e+00> : vector<16x224xf32>
    %114 = tpu.matmul %112, %113, %cst_55 {dimension_numbers = #tpu.dot_dimension_numbers<[1], [0], [0], [1], [0, 0, 1, 1], [], []>} : vector<16x9xf32>, vector<9x224xf32>, vector<16x224xf32> -> vector<16x224xf32>
    %115 = arith.addf %110, %114 : vector<16x224xf32>
    %c7_56 = arith.constant 7 : index
    %c0_57 = arith.constant 0 : index
    %c0_58 = arith.constant 0 : index
    %116 = vector.load %arg5[%c7_56, %c0_57, %c0_58] : memref<9x16x9xf32, #tpu.memory_space<vmem>>, vector<1x16x9xf32>
    %117 = vector.shape_cast %116 : vector<1x16x9xf32> to vector<16x9xf32>
    %118 = vector.extract_strided_slice %79 {offsets = [0, 33], sizes = [9, 224], strides = [1, 1]} : vector<9x272xf32> to vector<9x224xf32>
    %cst_59 = arith.constant dense<0.000000e+00> : vector<16x224xf32>
    %119 = tpu.matmul %117, %118, %cst_59 {dimension_numbers = #tpu.dot_dimension_numbers<[1], [0], [0], [1], [0, 0, 1, 1], [], []>} : vector<16x9xf32>, vector<9x224xf32>, vector<16x224xf32> -> vector<16x224xf32>
    %120 = arith.addf %115, %119 : vector<16x224xf32>
    %c8_60 = arith.constant 8 : index
    %c0_61 = arith.constant 0 : index
    %c0_62 = arith.constant 0 : index
    %121 = vector.load %arg5[%c8_60, %c0_61, %c0_62] : memref<9x16x9xf32, #tpu.memory_space<vmem>>, vector<1x16x9xf32>
    %122 = vector.shape_cast %121 : vector<1x16x9xf32> to vector<16x9xf32>
    %123 = vector.extract_strided_slice %79 {offsets = [0, 34], sizes = [9, 224], strides = [1, 1]} : vector<9x272xf32> to vector<9x224xf32>
    %cst_63 = arith.constant dense<0.000000e+00> : vector<16x224xf32>
    %124 = tpu.matmul %122, %123, %cst_63 {dimension_numbers = #tpu.dot_dimension_numbers<[1], [0], [0], [1], [0, 0, 1, 1], [], []>} : vector<16x9xf32>, vector<9x224xf32>, vector<16x224xf32> -> vector<16x224xf32>
    %125 = arith.addf %120, %124 : vector<16x224xf32>
    %126 = vector.extract_strided_slice %125 {offsets = [0, 0], sizes = [16, 207], strides = [1, 1]} : vector<16x224xf32> to vector<16x207xf32>
    %127 = vector.extract_strided_slice %125 {offsets = [0, 1], sizes = [16, 207], strides = [1, 1]} : vector<16x224xf32> to vector<16x207xf32>
    %128 = arith.maximumf %126, %127 : vector<16x207xf32>
    %129 = vector.extract_strided_slice %125 {offsets = [0, 16], sizes = [16, 207], strides = [1, 1]} : vector<16x224xf32> to vector<16x207xf32>
    %130 = vector.extract_strided_slice %125 {offsets = [0, 17], sizes = [16, 207], strides = [1, 1]} : vector<16x224xf32> to vector<16x207xf32>
    %131 = arith.maximumf %129, %130 : vector<16x207xf32>
    %132 = arith.maximumf %128, %131 : vector<16x207xf32>
    %c0_64 = arith.constant 0 : index
    %c0_65 = arith.constant 0 : index
    %133 = vector.load %arg6[%c0_64, %c0_65] : memref<16x1xf32, #tpu.memory_space<vmem>>, vector<16x1xf32>
    %134 = vector.broadcast %133 : vector<16x1xf32> to vector<16x207xf32>
    %135 = arith.addf %132, %134 : vector<16x207xf32>
    %c0_66 = arith.constant 0 : index
    %c0_67 = arith.constant 0 : index
    %136 = vector.load %arg7[%c0_66, %c0_67] : memref<207x49xf32, #tpu.memory_space<vmem>>, vector<207x49xf32>
    %cst_68 = arith.constant dense<0.000000e+00> : vector<16x49xf32>
    %137 = tpu.matmul %135, %136, %cst_68 {dimension_numbers = #tpu.dot_dimension_numbers<[1], [0], [0], [1], [0, 0, 1, 1], [], []>} : vector<16x207xf32>, vector<207x49xf32>, vector<16x49xf32> -> vector<16x49xf32>
    %cst_69 = arith.constant 0.000000e+00 : f32
    %138 = vector.broadcast %cst_69 : f32 to vector<16x49xf32>
    %139 = arith.maximumf %137, %138 : vector<16x49xf32>
    %cst_70 = arith.constant 0.000000e+00 : f32
    %140 = vector.broadcast %cst_70 : f32 to vector<1x392xf32>
    %141 = vector.extract_strided_slice %139 {offsets = [0, 0], sizes = [1, 49], strides = [1, 1]} : vector<16x49xf32> to vector<1x49xf32>
    %c0_71 = arith.constant 0 : index
    %c0_72 = arith.constant 0 : index
    %c0_73 = arith.constant 0 : index
    %142 = vector.load %arg8[%c0_71, %c0_72, %c0_73] : memref<16x49x392xf32, #tpu.memory_space<vmem>>, vector<1x49x392xf32>
    %143 = vector.shape_cast %142 : vector<1x49x392xf32> to vector<49x392xf32>
    %cst_74 = arith.constant dense<0.000000e+00> : vector<1x392xf32>
    %144 = tpu.matmul %141, %143, %cst_74 {dimension_numbers = #tpu.dot_dimension_numbers<[1], [0], [0], [1], [0, 0, 1, 1], [], []>} : vector<1x49xf32>, vector<49x392xf32>, vector<1x392xf32> -> vector<1x392xf32>
    %145 = arith.addf %140, %144 : vector<1x392xf32>
    %146 = vector.extract_strided_slice %139 {offsets = [1, 0], sizes = [1, 49], strides = [1, 1]} : vector<16x49xf32> to vector<1x49xf32>
    %c1_75 = arith.constant 1 : index
    %c0_76 = arith.constant 0 : index
    %c0_77 = arith.constant 0 : index
    %147 = vector.load %arg8[%c1_75, %c0_76, %c0_77] : memref<16x49x392xf32, #tpu.memory_space<vmem>>, vector<1x49x392xf32>
    %148 = vector.shape_cast %147 : vector<1x49x392xf32> to vector<49x392xf32>
    %cst_78 = arith.constant dense<0.000000e+00> : vector<1x392xf32>
    %149 = tpu.matmul %146, %148, %cst_78 {dimension_numbers = #tpu.dot_dimension_numbers<[1], [0], [0], [1], [0, 0, 1, 1], [], []>} : vector<1x49xf32>, vector<49x392xf32>, vector<1x392xf32> -> vector<1x392xf32>
    %150 = arith.addf %145, %149 : vector<1x392xf32>
    %151 = vector.extract_strided_slice %139 {offsets = [2, 0], sizes = [1, 49], strides = [1, 1]} : vector<16x49xf32> to vector<1x49xf32>
    %c2_79 = arith.constant 2 : index
    %c0_80 = arith.constant 0 : index
    %c0_81 = arith.constant 0 : index
    %152 = vector.load %arg8[%c2_79, %c0_80, %c0_81] : memref<16x49x392xf32, #tpu.memory_space<vmem>>, vector<1x49x392xf32>
    %153 = vector.shape_cast %152 : vector<1x49x392xf32> to vector<49x392xf32>
    %cst_82 = arith.constant dense<0.000000e+00> : vector<1x392xf32>
    %154 = tpu.matmul %151, %153, %cst_82 {dimension_numbers = #tpu.dot_dimension_numbers<[1], [0], [0], [1], [0, 0, 1, 1], [], []>} : vector<1x49xf32>, vector<49x392xf32>, vector<1x392xf32> -> vector<1x392xf32>
    %155 = arith.addf %150, %154 : vector<1x392xf32>
    %156 = vector.extract_strided_slice %139 {offsets = [3, 0], sizes = [1, 49], strides = [1, 1]} : vector<16x49xf32> to vector<1x49xf32>
    %c3_83 = arith.constant 3 : index
    %c0_84 = arith.constant 0 : index
    %c0_85 = arith.constant 0 : index
    %157 = vector.load %arg8[%c3_83, %c0_84, %c0_85] : memref<16x49x392xf32, #tpu.memory_space<vmem>>, vector<1x49x392xf32>
    %158 = vector.shape_cast %157 : vector<1x49x392xf32> to vector<49x392xf32>
    %cst_86 = arith.constant dense<0.000000e+00> : vector<1x392xf32>
    %159 = tpu.matmul %156, %158, %cst_86 {dimension_numbers = #tpu.dot_dimension_numbers<[1], [0], [0], [1], [0, 0, 1, 1], [], []>} : vector<1x49xf32>, vector<49x392xf32>, vector<1x392xf32> -> vector<1x392xf32>
    %160 = arith.addf %155, %159 : vector<1x392xf32>
    %161 = vector.extract_strided_slice %139 {offsets = [4, 0], sizes = [1, 49], strides = [1, 1]} : vector<16x49xf32> to vector<1x49xf32>
    %c4_87 = arith.constant 4 : index
    %c0_88 = arith.constant 0 : index
    %c0_89 = arith.constant 0 : index
    %162 = vector.load %arg8[%c4_87, %c0_88, %c0_89] : memref<16x49x392xf32, #tpu.memory_space<vmem>>, vector<1x49x392xf32>
    %163 = vector.shape_cast %162 : vector<1x49x392xf32> to vector<49x392xf32>
    %cst_90 = arith.constant dense<0.000000e+00> : vector<1x392xf32>
    %164 = tpu.matmul %161, %163, %cst_90 {dimension_numbers = #tpu.dot_dimension_numbers<[1], [0], [0], [1], [0, 0, 1, 1], [], []>} : vector<1x49xf32>, vector<49x392xf32>, vector<1x392xf32> -> vector<1x392xf32>
    %165 = arith.addf %160, %164 : vector<1x392xf32>
    %166 = vector.extract_strided_slice %139 {offsets = [5, 0], sizes = [1, 49], strides = [1, 1]} : vector<16x49xf32> to vector<1x49xf32>
    %c5_91 = arith.constant 5 : index
    %c0_92 = arith.constant 0 : index
    %c0_93 = arith.constant 0 : index
    %167 = vector.load %arg8[%c5_91, %c0_92, %c0_93] : memref<16x49x392xf32, #tpu.memory_space<vmem>>, vector<1x49x392xf32>
    %168 = vector.shape_cast %167 : vector<1x49x392xf32> to vector<49x392xf32>
    %cst_94 = arith.constant dense<0.000000e+00> : vector<1x392xf32>
    %169 = tpu.matmul %166, %168, %cst_94 {dimension_numbers = #tpu.dot_dimension_numbers<[1], [0], [0], [1], [0, 0, 1, 1], [], []>} : vector<1x49xf32>, vector<49x392xf32>, vector<1x392xf32> -> vector<1x392xf32>
    %170 = arith.addf %165, %169 : vector<1x392xf32>
    %171 = vector.extract_strided_slice %139 {offsets = [6, 0], sizes = [1, 49], strides = [1, 1]} : vector<16x49xf32> to vector<1x49xf32>
    %c6_95 = arith.constant 6 : index
    %c0_96 = arith.constant 0 : index
    %c0_97 = arith.constant 0 : index
    %172 = vector.load %arg8[%c6_95, %c0_96, %c0_97] : memref<16x49x392xf32, #tpu.memory_space<vmem>>, vector<1x49x392xf32>
    %173 = vector.shape_cast %172 : vector<1x49x392xf32> to vector<49x392xf32>
    %cst_98 = arith.constant dense<0.000000e+00> : vector<1x392xf32>
    %174 = tpu.matmul %171, %173, %cst_98 {dimension_numbers = #tpu.dot_dimension_numbers<[1], [0], [0], [1], [0, 0, 1, 1], [], []>} : vector<1x49xf32>, vector<49x392xf32>, vector<1x392xf32> -> vector<1x392xf32>
    %175 = arith.addf %170, %174 : vector<1x392xf32>
    %176 = vector.extract_strided_slice %139 {offsets = [7, 0], sizes = [1, 49], strides = [1, 1]} : vector<16x49xf32> to vector<1x49xf32>
    %c7_99 = arith.constant 7 : index
    %c0_100 = arith.constant 0 : index
    %c0_101 = arith.constant 0 : index
    %177 = vector.load %arg8[%c7_99, %c0_100, %c0_101] : memref<16x49x392xf32, #tpu.memory_space<vmem>>, vector<1x49x392xf32>
    %178 = vector.shape_cast %177 : vector<1x49x392xf32> to vector<49x392xf32>
    %cst_102 = arith.constant dense<0.000000e+00> : vector<1x392xf32>
    %179 = tpu.matmul %176, %178, %cst_102 {dimension_numbers = #tpu.dot_dimension_numbers<[1], [0], [0], [1], [0, 0, 1, 1], [], []>} : vector<1x49xf32>, vector<49x392xf32>, vector<1x392xf32> -> vector<1x392xf32>
    %180 = arith.addf %175, %179 : vector<1x392xf32>
    %181 = vector.extract_strided_slice %139 {offsets = [8, 0], sizes = [1, 49], strides = [1, 1]} : vector<16x49xf32> to vector<1x49xf32>
    %c8_103 = arith.constant 8 : index
    %c0_104 = arith.constant 0 : index
    %c0_105 = arith.constant 0 : index
    %182 = vector.load %arg8[%c8_103, %c0_104, %c0_105] : memref<16x49x392xf32, #tpu.memory_space<vmem>>, vector<1x49x392xf32>
    %183 = vector.shape_cast %182 : vector<1x49x392xf32> to vector<49x392xf32>
    %cst_106 = arith.constant dense<0.000000e+00> : vector<1x392xf32>
    %184 = tpu.matmul %181, %183, %cst_106 {dimension_numbers = #tpu.dot_dimension_numbers<[1], [0], [0], [1], [0, 0, 1, 1], [], []>} : vector<1x49xf32>, vector<49x392xf32>, vector<1x392xf32> -> vector<1x392xf32>
    %185 = arith.addf %180, %184 : vector<1x392xf32>
    %186 = vector.extract_strided_slice %139 {offsets = [9, 0], sizes = [1, 49], strides = [1, 1]} : vector<16x49xf32> to vector<1x49xf32>
    %c9 = arith.constant 9 : index
    %c0_107 = arith.constant 0 : index
    %c0_108 = arith.constant 0 : index
    %187 = vector.load %arg8[%c9, %c0_107, %c0_108] : memref<16x49x392xf32, #tpu.memory_space<vmem>>, vector<1x49x392xf32>
    %188 = vector.shape_cast %187 : vector<1x49x392xf32> to vector<49x392xf32>
    %cst_109 = arith.constant dense<0.000000e+00> : vector<1x392xf32>
    %189 = tpu.matmul %186, %188, %cst_109 {dimension_numbers = #tpu.dot_dimension_numbers<[1], [0], [0], [1], [0, 0, 1, 1], [], []>} : vector<1x49xf32>, vector<49x392xf32>, vector<1x392xf32> -> vector<1x392xf32>
    %190 = arith.addf %185, %189 : vector<1x392xf32>
    %191 = vector.extract_strided_slice %139 {offsets = [10, 0], sizes = [1, 49], strides = [1, 1]} : vector<16x49xf32> to vector<1x49xf32>
    %c10 = arith.constant 10 : index
    %c0_110 = arith.constant 0 : index
    %c0_111 = arith.constant 0 : index
    %192 = vector.load %arg8[%c10, %c0_110, %c0_111] : memref<16x49x392xf32, #tpu.memory_space<vmem>>, vector<1x49x392xf32>
    %193 = vector.shape_cast %192 : vector<1x49x392xf32> to vector<49x392xf32>
    %cst_112 = arith.constant dense<0.000000e+00> : vector<1x392xf32>
    %194 = tpu.matmul %191, %193, %cst_112 {dimension_numbers = #tpu.dot_dimension_numbers<[1], [0], [0], [1], [0, 0, 1, 1], [], []>} : vector<1x49xf32>, vector<49x392xf32>, vector<1x392xf32> -> vector<1x392xf32>
    %195 = arith.addf %190, %194 : vector<1x392xf32>
    %196 = vector.extract_strided_slice %139 {offsets = [11, 0], sizes = [1, 49], strides = [1, 1]} : vector<16x49xf32> to vector<1x49xf32>
    %c11 = arith.constant 11 : index
    %c0_113 = arith.constant 0 : index
    %c0_114 = arith.constant 0 : index
    %197 = vector.load %arg8[%c11, %c0_113, %c0_114] : memref<16x49x392xf32, #tpu.memory_space<vmem>>, vector<1x49x392xf32>
    %198 = vector.shape_cast %197 : vector<1x49x392xf32> to vector<49x392xf32>
    %cst_115 = arith.constant dense<0.000000e+00> : vector<1x392xf32>
    %199 = tpu.matmul %196, %198, %cst_115 {dimension_numbers = #tpu.dot_dimension_numbers<[1], [0], [0], [1], [0, 0, 1, 1], [], []>} : vector<1x49xf32>, vector<49x392xf32>, vector<1x392xf32> -> vector<1x392xf32>
    %200 = arith.addf %195, %199 : vector<1x392xf32>
    %201 = vector.extract_strided_slice %139 {offsets = [12, 0], sizes = [1, 49], strides = [1, 1]} : vector<16x49xf32> to vector<1x49xf32>
    %c12 = arith.constant 12 : index
    %c0_116 = arith.constant 0 : index
    %c0_117 = arith.constant 0 : index
    %202 = vector.load %arg8[%c12, %c0_116, %c0_117] : memref<16x49x392xf32, #tpu.memory_space<vmem>>, vector<1x49x392xf32>
    %203 = vector.shape_cast %202 : vector<1x49x392xf32> to vector<49x392xf32>
    %cst_118 = arith.constant dense<0.000000e+00> : vector<1x392xf32>
    %204 = tpu.matmul %201, %203, %cst_118 {dimension_numbers = #tpu.dot_dimension_numbers<[1], [0], [0], [1], [0, 0, 1, 1], [], []>} : vector<1x49xf32>, vector<49x392xf32>, vector<1x392xf32> -> vector<1x392xf32>
    %205 = arith.addf %200, %204 : vector<1x392xf32>
    %206 = vector.extract_strided_slice %139 {offsets = [13, 0], sizes = [1, 49], strides = [1, 1]} : vector<16x49xf32> to vector<1x49xf32>
    %c13 = arith.constant 13 : index
    %c0_119 = arith.constant 0 : index
    %c0_120 = arith.constant 0 : index
    %207 = vector.load %arg8[%c13, %c0_119, %c0_120] : memref<16x49x392xf32, #tpu.memory_space<vmem>>, vector<1x49x392xf32>
    %208 = vector.shape_cast %207 : vector<1x49x392xf32> to vector<49x392xf32>
    %cst_121 = arith.constant dense<0.000000e+00> : vector<1x392xf32>
    %209 = tpu.matmul %206, %208, %cst_121 {dimension_numbers = #tpu.dot_dimension_numbers<[1], [0], [0], [1], [0, 0, 1, 1], [], []>} : vector<1x49xf32>, vector<49x392xf32>, vector<1x392xf32> -> vector<1x392xf32>
    %210 = arith.addf %205, %209 : vector<1x392xf32>
    %211 = vector.extract_strided_slice %139 {offsets = [14, 0], sizes = [1, 49], strides = [1, 1]} : vector<16x49xf32> to vector<1x49xf32>
    %c14 = arith.constant 14 : index
    %c0_122 = arith.constant 0 : index
    %c0_123 = arith.constant 0 : index
    %212 = vector.load %arg8[%c14, %c0_122, %c0_123] : memref<16x49x392xf32, #tpu.memory_space<vmem>>, vector<1x49x392xf32>
    %213 = vector.shape_cast %212 : vector<1x49x392xf32> to vector<49x392xf32>
    %cst_124 = arith.constant dense<0.000000e+00> : vector<1x392xf32>
    %214 = tpu.matmul %211, %213, %cst_124 {dimension_numbers = #tpu.dot_dimension_numbers<[1], [0], [0], [1], [0, 0, 1, 1], [], []>} : vector<1x49xf32>, vector<49x392xf32>, vector<1x392xf32> -> vector<1x392xf32>
    %215 = arith.addf %210, %214 : vector<1x392xf32>
    %216 = vector.extract_strided_slice %139 {offsets = [15, 0], sizes = [1, 49], strides = [1, 1]} : vector<16x49xf32> to vector<1x49xf32>
    %c15 = arith.constant 15 : index
    %c0_125 = arith.constant 0 : index
    %c0_126 = arith.constant 0 : index
    %217 = vector.load %arg8[%c15, %c0_125, %c0_126] : memref<16x49x392xf32, #tpu.memory_space<vmem>>, vector<1x49x392xf32>
    %218 = vector.shape_cast %217 : vector<1x49x392xf32> to vector<49x392xf32>
    %cst_127 = arith.constant dense<0.000000e+00> : vector<1x392xf32>
    %219 = tpu.matmul %216, %218, %cst_127 {dimension_numbers = #tpu.dot_dimension_numbers<[1], [0], [0], [1], [0, 0, 1, 1], [], []>} : vector<1x49xf32>, vector<49x392xf32>, vector<1x392xf32> -> vector<1x392xf32>
    %220 = arith.addf %215, %219 : vector<1x392xf32>
    %c0_128 = arith.constant 0 : index
    %c0_129 = arith.constant 0 : index
    %221 = vector.load %arg9[%c0_128, %c0_129] : memref<1x392xf32, #tpu.memory_space<vmem>>, vector<1x392xf32>
    %222 = arith.addf %220, %221 : vector<1x392xf32>
    %cst_130 = arith.constant 0.000000e+00 : f32
    %223 = vector.broadcast %cst_130 : f32 to vector<1x392xf32>
    %224 = arith.maximumf %222, %223 : vector<1x392xf32>
    %c0_131 = arith.constant 0 : index
    %c0_132 = arith.constant 0 : index
    %225 = vector.load %arg10[%c0_131, %c0_132] : memref<392x98xf32, #tpu.memory_space<vmem>>, vector<392x98xf32>
    %cst_133 = arith.constant dense<0.000000e+00> : vector<1x98xf32>
    %226 = tpu.matmul %224, %225, %cst_133 {dimension_numbers = #tpu.dot_dimension_numbers<[1], [0], [0], [1], [0, 0, 1, 1], [], []>} : vector<1x392xf32>, vector<392x98xf32>, vector<1x98xf32> -> vector<1x98xf32>
    %c0_134 = arith.constant 0 : index
    %c0_135 = arith.constant 0 : index
    %227 = vector.load %arg11[%c0_134, %c0_135] : memref<1x98xf32, #tpu.memory_space<vmem>>, vector<1x98xf32>
    %228 = arith.addf %226, %227 : vector<1x98xf32>
    %cst_136 = arith.constant 0.000000e+00 : f32
    %229 = vector.broadcast %cst_136 : f32 to vector<1x98xf32>
    %230 = arith.maximumf %228, %229 : vector<1x98xf32>
    %c0_137 = arith.constant 0 : index
    %c0_138 = arith.constant 0 : index
    %231 = vector.load %arg12[%c0_137, %c0_138] : memref<98x10xf32, #tpu.memory_space<vmem>>, vector<98x10xf32>
    %cst_139 = arith.constant dense<0.000000e+00> : vector<1x10xf32>
    %232 = tpu.matmul %230, %231, %cst_139 {dimension_numbers = #tpu.dot_dimension_numbers<[1], [0], [0], [1], [0, 0, 1, 1], [], []>} : vector<1x98xf32>, vector<98x10xf32>, vector<1x10xf32> -> vector<1x10xf32>
    %c0_140 = arith.constant 0 : index
    %c0_141 = arith.constant 0 : index
    %233 = vector.load %arg13[%c0_140, %c0_141] : memref<1x10xf32, #tpu.memory_space<vmem>>, vector<1x10xf32>
    %234 = arith.addf %232, %233 : vector<1x10xf32>
    %c0_142 = arith.constant 0 : index
    %c0_143 = arith.constant 0 : index
    %c0_144 = arith.constant 0 : index
    %235 = vector.load %arg14[%c0_142, %c0_143, %c0_144] : memref<1x1x10xf32, #tpu.memory_space<vmem>>, vector<1x1x10xf32>
    %236 = vector.shape_cast %235 : vector<1x1x10xf32> to vector<1x10xf32>
    %237 = vector.shape_cast %234 : vector<1x10xf32> to vector<1x1x10xf32>
    tpu.vector_store %arg14[%c0_142, %c0_143, %c0_144], %237 {strides = array<i32>} : memref<1x1x10xf32, #tpu.memory_space<vmem>>, vector<1x1x10xf32>,
    return
  }
  func.func @transform_0(%arg0: i32) -> (i32, i32, i32) {
    %c0_i32 = arith.constant 0 : i32
    %c0_i32_0 = arith.constant 0 : i32
    %c0_i32_1 = arith.constant 0 : i32
    return %arg0, %c0_i32, %c0_i32_0 : i32, i32, i32
  }
  func.func @transform_1(%arg0: i32) -> (i32, i32, i32) {
    %c0_i32 = arith.constant 0 : i32
    %c0_i32_0 = arith.constant 0 : i32
    %c0_i32_1 = arith.constant 0 : i32
    %c0_i32_2 = arith.constant 0 : i32
    return %c0_i32, %c0_i32_0, %c0_i32_1 : i32, i32, i32
  }
  func.func @transform_2(%arg0: i32) -> (i32, i32) {
    %c0_i32 = arith.constant 0 : i32
    %c0_i32_0 = arith.constant 0 : i32
    %c0_i32_1 = arith.constant 0 : i32
    return %c0_i32, %c0_i32_0 : i32, i32
  }
  func.func @transform_3(%arg0: i32) -> (i32, i32) {
    %c0_i32 = arith.constant 0 : i32
    %c0_i32_0 = arith.constant 0 : i32
    %c0_i32_1 = arith.constant 0 : i32
    return %c0_i32, %c0_i32_0 : i32, i32
  }
  func.func @transform_4(%arg0: i32) -> (i32, i32, i32) {
    %c0_i32 = arith.constant 0 : i32
    %c0_i32_0 = arith.constant 0 : i32
    %c0_i32_1 = arith.constant 0 : i32
    %c0_i32_2 = arith.constant 0 : i32
    return %c0_i32, %c0_i32_0, %c0_i32_1 : i32, i32, i32
  }
  func.func @transform_5(%arg0: i32) -> (i32, i32) {
    %c0_i32 = arith.constant 0 : i32
    %c0_i32_0 = arith.constant 0 : i32
    %c0_i32_1 = arith.constant 0 : i32
    return %c0_i32, %c0_i32_0 : i32, i32
  }
  func.func @transform_6(%arg0: i32) -> (i32, i32) {
    %c0_i32 = arith.constant 0 : i32
    %c0_i32_0 = arith.constant 0 : i32
    %c0_i32_1 = arith.constant 0 : i32
    return %c0_i32, %c0_i32_0 : i32, i32
  }
  func.func @transform_7(%arg0: i32) -> (i32, i32, i32) {
    %c0_i32 = arith.constant 0 : i32
    %c0_i32_0 = arith.constant 0 : i32
    %c0_i32_1 = arith.constant 0 : i32
    %c0_i32_2 = arith.constant 0 : i32
    return %c0_i32, %c0_i32_0, %c0_i32_1 : i32, i32, i32
  }
  func.func @transform_8(%arg0: i32) -> (i32, i32) {
    %c0_i32 = arith.constant 0 : i32
    %c0_i32_0 = arith.constant 0 : i32
    %c0_i32_1 = arith.constant 0 : i32
    return %c0_i32, %c0_i32_0 : i32, i32
  }
  func.func @transform_9(%arg0: i32) -> (i32, i32) {
    %c0_i32 = arith.constant 0 : i32
    %c0_i32_0 = arith.constant 0 : i32
    %c0_i32_1 = arith.constant 0 : i32
    return %c0_i32, %c0_i32_0 : i32, i32
  }
  func.func @transform_10(%arg0: i32) -> (i32, i32) {
    %c0_i32 = arith.constant 0 : i32
    %c0_i32_0 = arith.constant 0 : i32
    %c0_i32_1 = arith.constant 0 : i32
    return %c0_i32, %c0_i32_0 : i32, i32
  }
  func.func @transform_11(%arg0: i32) -> (i32, i32) {
    %c0_i32 = arith.constant 0 : i32
    %c0_i32_0 = arith.constant 0 : i32
    %c0_i32_1 = arith.constant 0 : i32
    return %c0_i32, %c0_i32_0 : i32, i32
  }
  func.func @transform_12(%arg0: i32) -> (i32, i32) {
    %c0_i32 = arith.constant 0 : i32
    %c0_i32_0 = arith.constant 0 : i32
    %c0_i32_1 = arith.constant 0 : i32
    return %c0_i32, %c0_i32_0 : i32, i32
  }
  func.func @transform_13(%arg0: i32) -> (i32, i32, i32) {
    %c0_i32 = arith.constant 0 : i32
    %c0_i32_0 = arith.constant 0 : i32
    %c0_i32_1 = arith.constant 0 : i32
    return %arg0, %c0_i32, %c0_i32_0 : i32, i32, i32
  }
}

</mosaic_0001>

<bundles_post_ra>
// kernel: dig_rec_forward.1
= control target key start
LH: loop header
LB: loop body
LE: loop exit
PB: predicated region body
PF: predicated region fallthrough
CT: control target
= control target key end

     0   :  { %s13548_s0 = inlined_call_operand.vmem [shape: f32[2,1,930], index: 0, kind: input, shape index: {}]   ;;  %s13549_s1 = inlined_call_operand.vmem [shape: f32[9,9,1], index: 1, kind: input, shape index: {}]   ;;  %s13550_s2 = inlined_call_operand.vmem [shape: f32[9,1], index: 2, kind: input, shape index: {}]   ;;  %s13551_s3 = inlined_call_operand.vmem [shape: f32[809,272], index: 3, kind: input, shape index: {}]   ;;  %s13552_s4 = inlined_call_operand.vmem [shape: f32[9,16,9], index: 4, kind: input, shape index: {}]   ;;  %s13553_s5 = inlined_call_operand.vmem [shape: f32[16,1], index: 5, kind: input, shape index: {}]   ;;  %s13554_s6 = inlined_call_operand.vmem [shape: f32[207,49], index: 6, kind: input, shape index: {}]   ;;  %s13555_s7 = inlined_call_operand.vmem [shape: f32[16,49,392], index: 7, kind: input, shape index: {}]   ;;  %s13556_s8 = inlined_call_operand.vmem [shape: f32[1,392], index: 8, kind: input, shape index: {}]   ;;  %s13557_s9 = inlined_call_operand.vmem [shape: f32[392,98], index: 9, kind: input, shape index: {}]   ;;  %s13558_s10 = inlined_call_operand.vmem [shape: f32[1,98], index: 10, kind: input, shape index: {}]   ;;  %s13559_s11 = inlined_call_operand.vmem [shape: f32[98,10], index: 11, kind: input, shape index: {}]   ;;  %s13560_s12 = inlined_call_operand.vmem [shape: f32[1,10], index: 12, kind: input, shape index: {}]   ;;  %s13561_s13 = inlined_call_operand.hbm [shape: f32[2,1,10], index: 13, kind: output, shape index: {}]  }
   0x1   :  { %13607 = sst [smem:[#allocation33_spill]] %s13548_s0 }
   0x2   :  { %18 = vsyncpa [#allocation3], 0 }
   0x3   :  { %20 = vsyncpa [#allocation3 + $0x1], 0  ;;  %s9197_s25 = smov 0   ;;  %s9199_s26 = smov 0  }
   0x4   :  { %s9201_s27 = smov 0   ;;  %s9203_s28 = smov 0  }
   0x5 LB: > { %13608 = sst [smem:[#allocation5_spill]] %s9102_s27  ;;  %s9218_s29 = sadd.s32 4294967295, %s9106_s28   ;;  %s9106_s28 = sphi %s9203_s28, %s13683_s28   ;;  %s9102_s27 = sphi %s9201_s27, %s13685_s27   ;;  %s9098_s26 = sphi %s9199_s26, %s13687_s26   ;;  %s9094_s25 = sphi %s9197_s25, %s13686_s25  }
   0x6   : > { %s7103_s30 = sadd.s32 4294967294, %s9106_s28   ;;  %s9222_s14 = sadd.s32 1, %s9106_s28  }
   0x7   : > { %13609 = sst [smem:[#allocation6_spill]] %s9222_s14  ;;  %s311_s15 = sadd.s32 1, %s9102_s27 }
   0x8   : > { %s308_s16 = ssub.s32 %s9106_s28, %s9222_s14  ;;  %p321_p0 = scmp.ne.s32.totalorder %s9102_s27, %s9098_s26 }
   0x9   : > { %p309_p1 = scmp.eq.s32.totalorder %s308_s16, 0  ;;  %p322_p2 = scmp.eq.s32.totalorder %s9218_s29, 1 }
   0xa   : > { %p327_p3 = scmp.ne.s32.totalorder %s9098_s26, %s9094_s25  ;;  %p328_p4 = scmp.eq.s32.totalorder %s7103_s30, 1 }
   0xb   : > { %s9233_s17 = scalar_select %p309_p1, %s9102_s27, %s311_s15  }
   0xc   : > { %p9235_p5 = por %p322_p2, %p321_p0  ;;  %p9239_p6 = por %p328_p4, %p327_p3 }
   0xd   : > { %13610 = sst [smem:[#allocation7_spill]] %s9233_s17  ;;  %p7106_p7 = scmp.ge.s32.totalorder %s9106_s28, 1 }
   0xe   : > { %p389_p8 = scmp.lt.s32.totalorder %s9106_s28, 3 }
  0x10   : > { %p390_p9 = pnand %p7106_p7, %p389_p8 }
  0x12   : > { %393 = sbr.rel (%p390_p9) target bundleno = 2971 (0xb9b), region = 72 }
  0x19   : > { %v7112_v0 = vld [vmem:[%s13549_s1 + $0x30] sm:$0xff]  ;;  %p431_p10 = scmp.lt.s32.totalorder %s9218_s29, 1  ;;  %v449_v2 = vlaneseq  ;;  %v9108_v3 = vmov 0   ;;  %v7114_v4 = vld [vmem:[%s13549_s1 + $0x40] sm:$0xff]  ;;  %s13614_s0 = sld [smem:[#allocation33_spill]]  ;;  %vm581_vm0 = vcmask 1039360  }
  0x1a   : > { %v7108_v1 = vld [vmem:[%s13549_s1 + $0x10] sm:$0xff]  ;;  %8953 = vset.pattern.permute.xlu1 %v9108_v3  ;;  %8952 = vset.pattern.permute.xlu0 %v9108_v3  ;;  %v7110_v5 = vld [vmem:[%s13549_s1 + $0x20] sm:$0xff]  ;;  %v7109_v17 = vld [vmem:[%s13549_s1 + $0x18] sm:$0x1]  ;;  %s13590_s27 = smov 127   ;;  %s13586_s17 = smov 126  }
  0x1b   : > { %737 = vperm.xlu1 %8953, %v7112_v0   ;;  %517 = vperm.xlu0 %8952, %v7108_v1   ;;  %s432_s24 = scalar_select %p431_p10, %s9218_s29, 1  ;;  %v9259_v6 = vshrl.u32 %v449_v2, 7  ;;  %v7118_v7 = vld [vmem:[%s13549_s1 + $0x60] sm:$0xff]  ;;  %v7116_v8 = vld [vmem:[%s13549_s1 + $0x50] sm:$0xff]  ;;  %v7113_v20 = vld [vmem:[%s13549_s1 + $0x38] sm:$0x1] }
  0x1c   : > { %v7122_v14 = vld [vmem:[%s13549_s1 + $0x80] sm:$0xff]  ;;  %v7120_v15 = vld [vmem:[%s13549_s1 + $0x70] sm:$0xff]  ;;  %v7111_v21 = vld [vmem:[%s13549_s1 + $0x28] sm:$0x1]  ;;  %s13588_s14 = smov 98   ;;  %s9112_s20 = smov 97  }
  0x1d   : > { %13613 = vst [vmem:[#allocation8_spill] sm:$0xff] %v9259_v6  ;;  %s7107_s21 = sshll.u32 %s432_s24, 3  ;;  %v471_v9 = vsub.s32 5, %v9259_v6  ;;  %v475_v10 = vsub.s32 6, %v9259_v6  ;;  %v1077_v16 = vsub.s32 7, %v9259_v6  ;;  %v436_v18 = vld [vmem:[%s13549_s1] sm:$0xff] }
  0x1e   : > { %v437_v22 = vld [vmem:[%s13549_s1 + $0x8] sm:$0x1]  ;;  %v7117_v24 = vld [vmem:[%s13549_s1 + $0x58] sm:$0x1]  ;;  %v13565_v28 = vsub.s32 2, %v9259_v6  ;;  %v13567_v29 = vsub.s32 1, %v9259_v6 }
  0x1f   : > { %847 = vperm.xlu1 %8953, %v7114_v4   ;;  %627 = vperm.xlu0 %8952, %v7110_v5   ;;  %s434_s15 = scalar_lea.vmem %s13614_s0, %s7107_s21  ;;  %v7115_v23 = vld [vmem:[%s13549_s1 + $0x48] sm:$0x1]  ;;  %v7121_v26 = vld [vmem:[%s13549_s1 + $0x78] sm:$0x1]  ;;  %v467_v32 = vsub.s32 4, %v9259_v6  ;;  %v13566_v33 = vsub.s32 3, %v9259_v6 }
  0x20   : > { %v435_v11 = vld [vmem:[%s434_s15] sm:$0xff]  ;;  %v7119_v25 = vld [vmem:[%s13549_s1 + $0x68] sm:$0x1]  ;;  %v13568_v35 = vsub.s32 0, %v9259_v6  ;;  %s13584_s21 = smov 96   ;;  %s13593_s22 = smov 68  }
  0x21   : > { %v9272_v12 = vrot.slane %v435_v11, %v471_v9  ;;  %v9274_v13 = vrot.slane %v435_v11, %v475_v10  ;;  %v9289_v19 = vrot.slane %v435_v11, %v1077_v16  ;;  %v7123_v27 = vld [vmem:[%s13549_s1 + $0x88] sm:$0x1]  ;;  %v9319_v30 = vrot.slane %v435_v11, %v13565_v28  ;;  %s13594_s23 = smov 67   ;;  %s13592_s30 = smov 66  }
  0x22   : > { %v9323_v31 = vrot.slane %v435_v11, %v13567_v29  ;;  %v9334_v38 = vrot.slane %v435_v11, %v467_v32  ;;  %v9338_v39 = vrot.slane %v435_v11, %v13566_v33  ;;  %v9348_v42 = vrot.slane %v435_v11, %v13568_v35  ;;  %s9121_s0 = smov 110   ;;  %s9122_s16 = smov 95  }
  0x23   : > { %1067 = vperm.xlu1 %8953, %v7118_v7   ;;  %957 = vperm.xlu0 %8952, %v7116_v8   ;;  %13615 = vst [vmem:[#allocation9_spill] sm:$0xff] %v9289_v19  ;;  %vm691_vm1 = vcmask 1031168   ;;  %vm801_vm2 = vcmask 801792   ;;  %vm911_vm3 = vcmask 793600   ;;  %vm1021_vm4 = vcmask 785408   ;;  %s7705_s15 = sshll.u32 %s9218_s29, 4 }
  0x24   : > { %13616 = vst [vmem:[#allocation10_spill] sm:$0xff] %v9323_v31  ;;  %13617 = vst [vmem:[#allocation11_spill] sm:$0xff] %v9334_v38  ;;  %vm1144_vm5 = vcmask 556032   ;;  %vm1264_vm6 = vcmask 547840   ;;  %vm1384_vm7 = vcmask 539648   ;;  %vm1930_vm8 = vcmask 1040384  }
  0x25   : > { %13618 = vst [vmem:[#allocation12_spill] sm:$0xff] %v9338_v39  ;;  %vm9117_vm9 = vmmov 1   ;;  %vm1923_vm11 = vcmask 334848   ;;  %vm2575_vm12 = vcmask 72704   ;;  %vm2867_vm13 = vcmask 916480   ;;  %s9126_s29 = smov [#allocation2]  }
  0x26   : > { %vm11089_vm10 = vmpackc.low %vm1930_vm8, %vm9117_vm9  ;;  %vm2974_vm14 = vcmask 908288   ;;  %vm3081_vm15 = vcmask 900096  }
  0x27   : > { %1312 = vperm.xlu1 %8953, %v7122_v14   ;;  %1192 = vperm.xlu0 %8952, %v7120_v15  }
  0x2b   : > { %522 = vperm.xlu1 %8953, %v7109_v17   ;;  %440 = vperm.xlu0 %8952, %v436_v18  }
  0x2f   : > { %742 = vperm.xlu1 %8953, %v7113_v20   ;;  %632 = vperm.xlu0 %8952, %v7111_v21  }
  0x33   : > { %445 = vperm.xlu1 %8953, %v437_v22   ;;  %852 = vperm.xlu0 %8952, %v7115_v23  }
  0x37   : > { %962 = vperm.xlu0 %8952, %v7117_v24  }
  0x3b   : > { %1072 = vperm.xlu0 %8952, %v7119_v25  }
  0x3f   : > { %1197 = vperm.xlu0 %8952, %v7121_v26  }
  0x43   : > { %1317 = vperm.xlu0 %8952, %v7123_v27  }
  0x9a   : > { %v9327_v34 = vpop.permute.xlu0 %517  ;;  %v9364_v48 = vpop.permute.xlu1 %737 }
  0x9b   : > { %v527_v36 = vmul.f32 %v9327_v34, %v9319_v30  ;;  %v526_v37 = vmul.f32 %v9327_v34, %v9323_v31  ;;  %v529_v40 = vmul.f32 %v9327_v34, %v9334_v38  ;;  %v528_v41 = vmul.f32 %v9327_v34, %v9338_v39 }
  0x9c   : > { %v525_v45 = vmul.f32 %v9327_v34, %v9348_v42  ;;  %v747_v49 = vmul.f32 %v9364_v48, %v9319_v30  ;;  %v749_v51 = vmul.f32 %v9364_v48, %v9334_v38  ;;  %v746_v55 = vmul.f32 %v9364_v48, %v9323_v31 }
  0x9d   : > { %557 = vrot.lane.b32.xlu0 %v527_v36, %s13590_s27  ;;  %555 = vrot.lane.b32.xlu1 %v526_v37, %s13590_s27  ;;  %v748_v57 = vmul.f32 %v9364_v48, %v9338_v39  ;;  %v745_v60 = vmul.f32 %v9364_v48, %v9348_v42 }
  0x9e   : > { %v9350_v43 = vpop.permute.xlu0 %627  ;;  %v9378_v53 = vpop.permute.xlu1 %847 }
  0x9f   : > { %v637_v44 = vmul.f32 %v9350_v43, %v9319_v30  ;;  %v639_v46 = vmul.f32 %v9350_v43, %v9334_v38  ;;  %v636_v47 = vmul.f32 %v9350_v43, %v9323_v31  ;;  %v638_v50 = vmul.f32 %v9350_v43, %v9338_v39 }
  0xa0   : > { %v635_v52 = vmul.f32 %v9350_v43, %v9348_v42  ;;  %v857_v54 = vmul.f32 %v9378_v53, %v9319_v30  ;;  %v859_v56 = vmul.f32 %v9378_v53, %v9334_v38  ;;  %v856_v62 = vmul.f32 %v9378_v53, %v9323_v31 }
  0xa1   : > { %561 = vrot.lane.b32.xlu0 %v529_v40, %s13590_s27  ;;  %559 = vrot.lane.b32.xlu1 %v528_v41, %s13590_s27  ;;  %v858_v1 = vmul.f32 %v9378_v53, %v9338_v39  ;;  %v855_v3 = vmul.f32 %v9378_v53, %v9348_v42 }
  0xa2   : > { %v9392_v58 = vpop.permute.xlu0 %957  ;;  %v9408_v63 = vpop.permute.xlu1 %1067 }
  0xa3   : > { %v967_v59 = vmul.f32 %v9392_v58, %v9319_v30  ;;  %v969_v61 = vmul.f32 %v9392_v58, %v9334_v38  ;;  %13619 = vst [vmem:[#allocation13_spill] sm:$0xff] %v9408_v63  ;;  %v1081_v0 = vmul.f32 %v9408_v63, %v9323_v31  ;;  %v1083_v2 = vmul.f32 %v9408_v63, %v9338_v39 }
  0xa4   : > { %v1080_v4 = vmul.f32 %v9408_v63, %v9348_v42  ;;  %v966_v5 = vmul.f32 %v9392_v58, %v9323_v31  ;;  %v968_v9 = vmul.f32 %v9392_v58, %v9338_v39  ;;  %v965_v11 = vmul.f32 %v9392_v58, %v9348_v42 }
  0xa5   : > { %667 = vrot.lane.b32.xlu0 %v637_v44, %s13586_s17  ;;  %553 = vrot.lane.b32.xlu1 %v525_v45, %s13590_s27  ;;  %v1082_v16 = vmul.f32 %v9408_v63, %v9319_v30  ;;  %v1084_v18 = vmul.f32 %v9408_v63, %v9334_v38  ;;  %v1085_v28 = vmul.f32 %v9408_v63, %v9272_v12 }
  0xa6   : > { %v9426_v7 = vpop.permute.xlu0 %1192  ;;  %v9442_v14 = vpop.permute.xlu1 %1312 }
  0xa7   : > { %v1202_v8 = vmul.f32 %v9426_v7, %v9319_v30  ;;  %v1204_v10 = vmul.f32 %v9426_v7, %v9334_v38  ;;  %v1321_v15 = vmul.f32 %v9442_v14, %v9323_v31  ;;  %v1323_v17 = vmul.f32 %v9442_v14, %v9338_v39 }
  0xa8   : > { %v1320_v20 = vmul.f32 %v9442_v14, %v9348_v42  ;;  %v1201_v21 = vmul.f32 %v9426_v7, %v9323_v31  ;;  %v1203_v24 = vmul.f32 %v9426_v7, %v9338_v39  ;;  %v1200_v27 = vmul.f32 %v9426_v7, %v9348_v42 }
  0xa9   : > { %671 = vrot.lane.b32.xlu0 %v639_v46, %s13586_s17  ;;  %665 = vrot.lane.b32.xlu1 %v636_v47, %s13586_s17  ;;  %v1322_v36 = vmul.f32 %v9442_v14, %v9319_v30  ;;  %v1324_v41 = vmul.f32 %v9442_v14, %v9334_v38  ;;  %v530_v47 = vmul.f32 %v9327_v34, %v9272_v12 }
  0xaa   : > { %v9462_v22 = vpop.permute.xlu1 %522  ;;  %v9470_v25 = vpop.permute.xlu0 %440  ;;  %v1206_v29 = vmul.f32 %v9426_v7, %v9274_v13 }
  0xab   : > { %v533_v23 = vmul.f32 %v9462_v22, %v9323_v31  ;;  %v535_v26 = vmul.f32 %v9462_v22, %v9338_v39  ;;  %v532_v32 = vmul.f32 %v9462_v22, %v9348_v42  ;;  %v534_v46 = vmul.f32 %v9462_v22, %v9319_v30 }
  0xac   : > { %v487_v6 = vmul.f32 %v9338_v39, %v9470_v25 }
  0xad   : > { %777 = vrot.lane.b32.xlu0 %v747_v49, %s13588_s14  ;;  %669 = vrot.lane.b32.xlu1 %v638_v50, %s13586_s17  ;;  %v536_v49 = vmul.f32 %v9462_v22, %v9334_v38 }
  0xae   : > { %v9482_v37 = vpop.permute.xlu0 %632 }
  0xaf   : > { %v644_v40 = vmul.f32 %v9482_v37, %v9319_v30  ;;  %v646_v45 = vmul.f32 %v9482_v37, %v9334_v38 }
  0xb1   : > { %781 = vrot.lane.b32.xlu0 %v749_v51, %s13588_s14  ;;  %663 = vrot.lane.b32.xlu1 %v635_v52, %s13586_s17  ;;  %v9508_v51 = vpop.permute.xlu1 %742 }
  0xb2   : > { %v9492_v44 = vpop.permute.xlu0 %852  ;;  %v753_v52 = vmul.f32 %v9508_v51, %v9323_v31 }
  0xb5   : > { %887 = vrot.lane.b32.xlu0 %v857_v54, %s9112_s20  ;;  %775 = vrot.lane.b32.xlu1 %v746_v55, %s13588_s14  ;;  %v643_v54 = vmul.f32 %v9482_v37, %v9323_v31 }
  0xb6   : > { %v9504_v50 = vpop.permute.xlu0 %962 }
  0xb9   : > { %891 = vrot.lane.b32.xlu0 %v859_v56, %s9112_s20  ;;  %779 = vrot.lane.b32.xlu1 %v748_v57, %s13588_s14  ;;  %v755_v56 = vmul.f32 %v9508_v51, %v9338_v39  ;;  %v645_v57 = vmul.f32 %v9482_v37, %v9338_v39 }
  0xba   : > { %v9516_v55 = vpop.permute.xlu0 %1072 }
  0xbd   : > { %997 = vrot.lane.b32.xlu0 %v967_v59, %s13584_s21  ;;  %773 = vrot.lane.b32.xlu1 %v745_v60, %s13588_s14  ;;  %v752_v59 = vmul.f32 %v9508_v51, %v9348_v42  ;;  %v642_v60 = vmul.f32 %v9482_v37, %v9348_v42 }
  0xc1   : > { %1001 = vrot.lane.b32.xlu0 %v969_v61, %s13584_s21  ;;  %885 = vrot.lane.b32.xlu1 %v856_v62, %s9112_s20  ;;  %v9528_v61 = vpop.permute.xlu0 %1197  ;;  %v641_v62 = vmul.f32 %v9350_v43, %v9274_v13 }
  0xc5   : > { %1114 = vrot.lane.b32.xlu0 %v1081_v0, %s13593_s22  ;;  %889 = vrot.lane.b32.xlu1 %v858_v1, %s9112_s20  ;;  %v531_v0 = vmul.f32 %v9327_v34, %v9274_v13  ;;  %v9538_v1 = vpop.permute.xlu1 %445 }
  0xc6   : > { %13620 = vst [vmem:[#allocation14_spill] sm:$0xff] %v9538_v1 }
  0xc9   : > { %1118 = vrot.lane.b32.xlu0 %v1083_v2, %s13593_s22  ;;  %883 = vrot.lane.b32.xlu1 %v855_v3, %s9112_s20  ;;  %v9540_v2 = vpop.permute.xlu0 %1317  ;;  %v864_v3 = vmul.f32 %v9492_v44, %v9319_v30 }
  0xcd   : > { %1112 = vrot.lane.b32.xlu0 %v1080_v4, %s13593_s22  ;;  %995 = vrot.lane.b32.xlu1 %v966_v5, %s13584_s21  ;;  %v754_v4 = vmul.f32 %v9508_v51, %v9319_v30 }
  0xd1   : > { %1236 = vrot.lane.b32.xlu0 %v1202_v8, %s13594_s23  ;;  %999 = vrot.lane.b32.xlu1 %v968_v9, %s13584_s21  ;;  %v866_v8 = vmul.f32 %v9492_v44, %v9334_v38  ;;  %v756_v9 = vmul.f32 %v9508_v51, %v9334_v38 }
  0xd5   : > { %1240 = vrot.lane.b32.xlu0 %v1204_v10, %s13594_s23  ;;  %993 = vrot.lane.b32.xlu1 %v965_v11, %s13584_s21 }
  0xd9   : > { %1354 = vrot.lane.b32.xlu0 %v1321_v15, %s13592_s30  ;;  %1116 = vrot.lane.b32.xlu1 %v1082_v16, %s13593_s22  ;;  %v750_v15 = vmul.f32 %v9364_v48, %v9272_v12  ;;  %v640_v16 = vmul.f32 %v9350_v43, %v9272_v12 }
  0xdd   : > { %1358 = vrot.lane.b32.xlu0 %v1323_v17, %s13592_s30  ;;  %1120 = vrot.lane.b32.xlu1 %v1084_v18, %s13593_s22 }
  0xe1   : > { %1352 = vrot.lane.b32.xlu0 %v1320_v20, %s13592_s30  ;;  %1234 = vrot.lane.b32.xlu1 %v1201_v21, %s13594_s23  ;;  %v973_v20 = vmul.f32 %v9504_v50, %v9323_v31  ;;  %v863_v21 = vmul.f32 %v9492_v44, %v9323_v31 }
  0xe5   : > { %569 = vrot.lane.b32.xlu0 %v533_v23, %s13590_s27  ;;  %1238 = vrot.lane.b32.xlu1 %v1203_v24, %s13594_s23  ;;  %v975_v24 = vmul.f32 %v9504_v50, %v9338_v39 }
  0xe9   : > { %573 = vrot.lane.b32.xlu0 %v535_v26, %s13590_s27  ;;  %1232 = vrot.lane.b32.xlu1 %v1200_v27, %s13594_s23  ;;  %v865_v26 = vmul.f32 %v9492_v44, %v9338_v39 }
  0xed   : > { %567 = vrot.lane.b32.xlu0 %v532_v32, %s13590_s27  ;;  %1356 = vrot.lane.b32.xlu1 %v1322_v36, %s13592_s30  ;;  %v972_v36 = vmul.f32 %v9504_v50, %v9348_v42 }
  0xf1   : > { %681 = vrot.lane.b32.xlu0 %v644_v40, %s13586_s17  ;;  %1360 = vrot.lane.b32.xlu1 %v1324_v41, %s13592_s30  ;;  %v862_v40 = vmul.f32 %v9492_v44, %v9348_v42 }
  0xf5   : > { %685 = vrot.lane.b32.xlu0 %v646_v45, %s13586_s17  ;;  %571 = vrot.lane.b32.xlu1 %v534_v46, %s13590_s27  ;;  %v861_v46 = vmul.f32 %v9378_v53, %v9274_v13 }
  0xf9   : > { %563 = vrot.lane.b32.xlu0 %v530_v47, %s13590_s27  ;;  %575 = vrot.lane.b32.xlu1 %v536_v49, %s13590_s27  ;;  %v751_v47 = vmul.f32 %v9364_v48, %v9274_v13 }
  0xfd   : > { %789 = vrot.lane.b32.xlu0 %v753_v52, %s13588_s14  ;;  %679 = vrot.lane.b32.xlu1 %v643_v54, %s13586_s17  ;;  %v1090_v54 = vmul.f32 %v9516_v55, %v9319_v30 }
 0x101   : > { %793 = vrot.lane.b32.xlu0 %v755_v56, %s13588_s14  ;;  %683 = vrot.lane.b32.xlu1 %v645_v57, %s13586_s17  ;;  %v974_v56 = vmul.f32 %v9504_v50, %v9319_v30 }
 0x105   : > { %787 = vrot.lane.b32.xlu0 %v752_v59, %s13588_s14  ;;  %677 = vrot.lane.b32.xlu1 %v642_v60, %s13586_s17  ;;  %v1092_v59 = vmul.f32 %v9516_v55, %v9334_v38  ;;  %v976_v60 = vmul.f32 %v9504_v50, %v9334_v38 }
 0x109   : > { %675 = vrot.lane.b32.xlu0 %v641_v62, %s13586_s17  ;;  %565 = vrot.lane.b32.xlu1 %v531_v0, %s13590_s27 }
 0x10d   : > { %901 = vrot.lane.b32.xlu0 %v864_v3, %s9112_s20  ;;  %791 = vrot.lane.b32.xlu1 %v754_v4, %s13588_s14  ;;  %v537_v3 = vmul.f32 %v9462_v22, %v9272_v12  ;;  %v860_v4 = vmul.f32 %v9378_v53, %v9272_v12 }
 0x10f   : > { %v9548_v5 = vpop.permute.xlu0 %557  ;;  %v9550_v34 = vpop.permute.xlu1 %555 }
 0x111   : > { %905 = vrot.lane.b32.xlu0 %v866_v8, %s9112_s20  ;;  %795 = vrot.lane.b32.xlu1 %v756_v9, %s13588_s14 }
 0x113   : > { %v9558_v10 = vpop.permute.xlu0 %561  ;;  %v9560_v11 = vpop.permute.xlu1 %559 }
 0x114   : > { %13621 = vst [vmem:[#allocation15_spill] sm:$0xff] %v9558_v10 }
 0x115   : > { %783 = vrot.lane.b32.xlu0 %v750_v15, %s13588_s14  ;;  %673 = vrot.lane.b32.xlu1 %v640_v16, %s13586_s17  ;;  %v970_v15 = vmul.f32 %v9392_v58, %v9272_v12  ;;  %v1089_v16 = vmul.f32 %v9516_v55, %v9323_v31 }
 0x117   : > { %v9568_v17 = vpop.permute.xlu0 %667  ;;  %v9570_v18 = vpop.permute.xlu1 %553 }
 0x119   : > { %1009 = vrot.lane.b32.xlu0 %v973_v20, %s13584_s21  ;;  %899 = vrot.lane.b32.xlu1 %v863_v21, %s9112_s20  ;;  %v1209_v21 = vmul.f32 %v9528_v61, %v9323_v31 }
 0x11b   : > { %v9578_v23 = vpop.permute.xlu0 %671  ;;  %v9580_v43 = vpop.permute.xlu1 %665 }
 0x11c   : > { %13622 = vst [vmem:[#allocation16_spill] sm:$0xff] %v9578_v23 }
 0x11d   : > { %1013 = vrot.lane.b32.xlu0 %v975_v24, %s13584_s21  ;;  %903 = vrot.lane.b32.xlu1 %v865_v26, %s9112_s20  ;;  %v1091_v24 = vmul.f32 %v9516_v55, %v9338_v39 }
 0x11f   : > { %v9588_v27 = vpop.permute.xlu0 %777  ;;  %v9590_v32 = vpop.permute.xlu1 %669 }
 0x121   : > { %1007 = vrot.lane.b32.xlu0 %v972_v36, %s13584_s21  ;;  %897 = vrot.lane.b32.xlu1 %v862_v40, %s9112_s20  ;;  %v1211_v40 = vmul.f32 %v9528_v61, %v9338_v39 }
 0x123   : > { %v9598_v41 = vpop.permute.xlu0 %781  ;;  %v9600_v45 = vpop.permute.xlu1 %663 }
 0x124   : > { %13623 = vst [vmem:[#allocation17_spill] sm:$0xff] %v9598_v41 }
 0x125   : > { %895 = vrot.lane.b32.xlu0 %v861_v46, %s9112_s20  ;;  %785 = vrot.lane.b32.xlu1 %v751_v47, %s13588_s14  ;;  %v1088_v46 = vmul.f32 %v9516_v55, %v9348_v42 }
 0x127   : > { %v9608_v49 = vpop.permute.xlu0 %887  ;;  %v9610_v52 = vpop.permute.xlu1 %775 }
 0x129   : > { %1132 = vrot.lane.b32.xlu0 %v1090_v54, %s13593_s22  ;;  %1011 = vrot.lane.b32.xlu1 %v974_v56, %s13584_s21  ;;  %v1208_v56 = vmul.f32 %v9528_v61, %v9348_v42 }
 0x12b   : > { %v9618_v57 = vpop.permute.xlu0 %891  ;;  %v9620_v48 = vpop.permute.xlu1 %779 }
 0x12c   : > { %13624 = vst [vmem:[#allocation18_spill] sm:$0xff] %v9618_v57 }
 0x12d   : > { %1136 = vrot.lane.b32.xlu0 %v1092_v59, %s13593_s22  ;;  %1015 = vrot.lane.b32.xlu1 %v976_v60, %s13584_s21  ;;  %v538_v59 = vmul.f32 %v9462_v22, %v9274_v13 }
 0x12f   : > { %v9628_v62 = vpop.permute.xlu0 %997  ;;  %v9630_v0 = vpop.permute.xlu1 %773 }
 0x131   : > { %577 = vrot.lane.b32.xlu0 %v537_v3, %s13590_s27  ;;  %893 = vrot.lane.b32.xlu1 %v860_v4, %s9112_s20  ;;  %v648_v4 = vmul.f32 %v9482_v37, %v9274_v13 }
 0x133   : > { %v9638_v8 = vpop.permute.xlu0 %1001  ;;  %v9640_v9 = vpop.permute.xlu1 %885 }
 0x135   : > { %1003 = vrot.lane.b32.xlu0 %v970_v15, %s13584_s21  ;;  %1130 = vrot.lane.b32.xlu1 %v1089_v16, %s13593_s22  ;;  %v971_v15 = vmul.f32 %v9392_v58, %v9274_v13 }
 0x137   : > { %v9648_v20 = vpop.permute.xlu0 %1114  ;;  %v9650_v53 = vpop.permute.xlu1 %889 }
 0x139   : > { %1250 = vrot.lane.b32.xlu0 %v1209_v21, %s13594_s23  ;;  %1134 = vrot.lane.b32.xlu1 %v1091_v24, %s13593_s22  ;;  %v1086_v21 = vmul.f32 %v9408_v63, %v9274_v13  ;;  %v1210_v24 = vmul.f32 %v9528_v61, %v9319_v30 }
 0x13b   : > { %v9658_v26 = vpop.permute.xlu0 %1118  ;;  %v9660_v36 = vpop.permute.xlu1 %883 }
 0x13d   : > { %1254 = vrot.lane.b32.xlu0 %v1211_v40, %s13594_s23  ;;  %1128 = vrot.lane.b32.xlu1 %v1088_v46, %s13593_s22  ;;  %v1330_v46 = vmul.f32 %v9540_v2, %v9319_v30 }
 0x13f   : > { %v9668_v47 = vpop.permute.xlu0 %1112  ;;  %v9670_v54 = vpop.permute.xlu1 %995 }
 0x141   : > { %1248 = vrot.lane.b32.xlu0 %v1208_v56, %s13594_s23  ;;  %579 = vrot.lane.b32.xlu1 %v538_v59, %s13590_s27  ;;  %v1212_v56 = vmul.f32 %v9528_v61, %v9334_v38 }
 0x143   : > { %v9678_v60 = vpop.permute.xlu0 %1236  ;;  %v9680_v3 = vpop.permute.xlu1 %999 }
 0x145   : > { %689 = vrot.lane.b32.xlu0 %v648_v4, %s13586_s17  ;;  %1005 = vrot.lane.b32.xlu1 %v971_v15, %s13584_s21  ;;  %v1332_v15 = vmul.f32 %v9540_v2, %v9334_v38  ;;  %v585_v38 = vsel %vm581_vm0, %v9560_v11, %v9558_v10  ;;  %v913_v10 = vsel %vm911_vm3, %v9640_v9, %v9608_v49 }
 0x147   : > { %v9688_v16 = vpop.permute.xlu0 %1240  ;;  %v9690_v22 = vpop.permute.xlu1 %993 }
 0x148   : > { %13625 = vst [vmem:[#allocation19_spill] sm:$0xff] %v9688_v16 }
 0x149   : > { %1124 = vrot.lane.b32.xlu0 %v1086_v21, %s13593_s22  ;;  %1252 = vrot.lane.b32.xlu1 %v1210_v24, %s13594_s23  ;;  %v647_v21 = vmul.f32 %v9482_v37, %v9272_v12  ;;  %v583_v37 = vsel %vm581_vm0, %v9550_v34, %v9548_v5 }
 0x14b   : > { %v9698_v40 = vpop.permute.xlu0 %1354  ;;  %v9700_v58 = vpop.permute.xlu1 %1116 }
 0x14d   : > { %1372 = vrot.lane.b32.xlu0 %v1330_v46, %s13592_s30  ;;  %1256 = vrot.lane.b32.xlu1 %v1212_v56, %s13594_s23  ;;  %v758_v56 = vmul.f32 %v9508_v51, %v9274_v13 }
 0x14f   : > { %v9708_v59 = vpop.permute.xlu0 %1358  ;;  %v9710_v4 = vpop.permute.xlu1 %1120 }
 0x150   : > { %13626 = vst [vmem:[#allocation20_spill] sm:$0xff] %v9710_v4 }
 0x151   : > { %1376 = vrot.lane.b32.xlu0 %v1332_v15, %s13592_s30  ;;  %687 = vrot.lane.b32.xlu1 %v647_v21, %s13586_s17  ;;  %v485_v15 = vmul.f32 %v9323_v31, %v9470_v25  ;;  %s13637_s17 = smov 68  }
 0x153   : > { %v9718_v24 = vpop.permute.xlu0 %1352  ;;  %v9720_v46 = vpop.permute.xlu1 %1234  ;;  %v609_v35 = vadd.f32 %v583_v37, %v485_v15  ;;  %v1331_v15 = vmul.f32 %v9540_v2, %v9338_v39  ;;  %v1023_v39 = vsel %vm1021_vm4, %v9670_v54, %v9628_v62 }
 0x155   : > { %799 = vrot.lane.b32.xlu0 %v758_v56, %s13588_s14  ;;  %1122 = vrot.lane.b32.xlu1 %v1085_v28, %s13593_s22  ;;  %v1329_v56 = vmul.f32 %v9540_v2, %v9323_v31  ;;  %v693_v28 = vsel %vm691_vm1, %v9580_v43, %v9568_v17  ;;  %v803_v31 = vsel %vm801_vm2, %v9610_v52, %v9588_v27 }
 0x157   : > { %v9733_v21 = vpop.permute.xlu0 %569  ;;  %v9735_v33 = vpop.permute.xlu1 %1238 }
 0x158   : > { %13627 = vst [vmem:[#allocation21_spill] sm:$0xff] %v9733_v21  ;;  %v719_v21 = vadd.f32 %v693_v28, %v609_v35  ;;  %v611_v35 = vadd.f32 %v585_v38, %v487_v6  ;;  %v1328_v38 = vmul.f32 %v9540_v2, %v9348_v42 }
 0x159   : > { %1244 = vrot.lane.b32.xlu0 %v1206_v29, %s13594_s23  ;;  %1370 = vrot.lane.b32.xlu1 %v1329_v56, %s13592_s30  ;;  %v867_v29 = vmul.f32 %v9492_v44, %v9272_v12  ;;  %v695_v56 = vsel %vm691_vm1, %v9590_v32, %v9578_v23  ;;  %v1325_v23 = vmul.f32 %v9442_v14, %v9272_v12 }
 0x15a   : > { %v829_v28 = vadd.f32 %v803_v31, %v719_v21  ;;  %v721_v19 = vadd.f32 %v695_v56, %v611_v35  ;;  %v915_v21 = vsel %vm911_vm3, %v9650_v53, %v9618_v57  ;;  %v1266_v56 = vsel %vm1264_vm6, %v9720_v46, %v9678_v60 }
 0x15b   : > { %v9754_v1 = vpop.permute.xlu0 %573  ;;  %v9756_v37 = vpop.permute.xlu1 %1232  ;;  %v757_v35 = vmul.f32 %v9508_v51, %v9272_v12 }
 0x15c   : > { %13628 = vst [vmem:[#allocation22_spill] sm:$0xff] %v9754_v1  ;;  %v805_v1 = vsel %vm801_vm2, %v9620_v48, %v9598_v41  ;;  %v939_v63 = vadd.f32 %v913_v10, %v829_v28  ;;  %v1025_v10 = vsel %vm1021_vm4, %v9680_v3, %v9638_v8 }
 0x15d   : > { %907 = vrot.lane.b32.xlu0 %v867_v29, %s9112_s20  ;;  %1374 = vrot.lane.b32.xlu1 %v1331_v15, %s13592_s30  ;;  %v1146_v29 = vsel %vm1144_vm5, %v9648_v20, %v9700_v58  ;;  %v831_v15 = vadd.f32 %v805_v1, %v721_v19  ;;  %v1148_v1 = vsel %vm1144_vm5, %v9658_v26, %v9710_v4 }
 0x15e   : > { %v1049_v41 = vadd.f32 %v1023_v39, %v939_v63  ;;  %v977_v63 = vmul.f32 %v9504_v50, %v9272_v12 }
 0x15f   : > { %v9778_v6 = vpop.permute.xlu0 %567  ;;  %v9780_v31 = vpop.permute.xlu1 %1356  ;;  %v941_v28 = vadd.f32 %v915_v21, %v831_v15  ;;  %v582_v21 = vsel %vm581_vm0, %v9570_v18, %v9550_v34  ;;  %v1205_v15 = vmul.f32 %v9426_v7, %v9272_v12  ;;  %v694_v34 = vsel %vm691_vm1, %v9568_v17, %v9590_v32 }
 0x160   : > { %v1174_v57 = vadd.f32 %v1146_v29, %v1049_v41  ;;  %v584_v41 = vsel %vm581_vm0, %v9548_v5, %v9560_v11  ;;  %v1268_v29 = vsel %vm1264_vm6, %v9735_v33, %v9688_v16  ;;  %v692_v18 = vsel %vm691_vm1, %v9600_v45, %v9580_v43 }
 0x161   : > { %1362 = vrot.lane.b32.xlu0 %v1325_v23, %s13592_s30  ;;  %1368 = vrot.lane.b32.xlu1 %v1328_v38, %s13592_s30  ;;  %v1386_v23 = vsel %vm1384_vm7, %v9698_v40, %v9780_v31  ;;  %v1051_v38 = vadd.f32 %v1025_v10, %v941_v28  ;;  %v484_v10 = vmul.f32 %v9348_v42, %v9470_v25 }
 0x162   : > { %v1294_v51 = vadd.f32 %v1266_v56, %v1174_v57  ;;  %v486_v57 = vmul.f32 %v9319_v30, %v9470_v25  ;;  %v804_v17 = vsel %vm801_vm2, %v9588_v27, %v9620_v48  ;;  %v802_v43 = vsel %vm801_vm2, %v9630_v0, %v9610_v52 }
 0x163   : > { %v9800_v19 = vpop.permute.xlu0 %681  ;;  %v9802_v39 = vpop.permute.xlu1 %1360  ;;  %v1176_v56 = vadd.f32 %v1148_v1, %v1051_v38  ;;  %v608_v1 = vadd.f32 %v582_v21, %v484_v10  ;;  %v868_v21 = vmul.f32 %v9492_v44, %v9274_v13  ;;  %v912_v27 = vsel %vm911_vm3, %v9660_v36, %v9640_v9 }
 0x164   : > { %13629 = vst [vmem:[#allocation23_spill] sm:$0xff] %v9802_v39  ;;  %v1388_v28 = vsel %vm1384_vm7, %v9708_v59, %v9802_v39  ;;  %v1024_v0 = vsel %vm1021_vm4, %v9628_v62, %v9680_v3  ;;  %v1022_v44 = vsel %vm1021_vm4, %v9690_v22, %v9670_v54  ;;  %v1326_v36 = vmul.f32 %v9442_v14, %v9274_v13 }
 0x165   : > { %1017 = vrot.lane.b32.xlu0 %v977_v63, %s13584_s21  ;;  %797 = vrot.lane.b32.xlu1 %v757_v35, %s13588_s14  ;;  %v9829_v35 = vadd.f32 %v1386_v23, %v1294_v51  ;;  %v610_v63 = vadd.f32 %v584_v41, %v486_v57  ;;  %v1296_v23 = vadd.f32 %v1268_v29, %v1176_v56  ;;  %s9119_s14 = smov 112  }
 0x166   : > { %v718_v45 = vadd.f32 %v692_v18, %v608_v1  ;;  %v914_v29 = vsel %vm911_vm3, %v9608_v49, %v9650_v53  ;;  %v1093_v57 = vmul.f32 %v9516_v55, %v9272_v12  ;;  %v1147_v62 = vsel %vm1144_vm5, %v9700_v58, %v9658_v26 }
 0x167   : > { %13630 = vst [vmem:[#allocation24_spill] sm:$0xff] %v9829_v35  ;;  %v9831_v5 = vpop.permute.xlu0 %685  ;;  %v9833_v11 = vpop.permute.xlu1 %571  ;;  %v720_v32 = vadd.f32 %v694_v34, %v610_v63  ;;  %v9853_v38 = vadd.f32 %v1388_v28, %v1296_v23  ;;  %v1267_v54 = vsel %vm1264_vm6, %v9678_v60, %v9735_v33  ;;  %v978_v18 = vmul.f32 %v9504_v50, %v9274_v13 }
 0x168   : > { %v828_v48 = vadd.f32 %v802_v43, %v718_v45  ;;  %v1213_v26 = vmul.f32 %v9528_v61, %v9272_v12  ;;  %v1145_v58 = vsel %vm1144_vm5, %v9668_v47, %v9648_v20  ;;  %v1265_v28 = vsel %vm1264_vm6, %v9756_v37, %v9720_v46  ;;  %v13635_v43 = vld [vmem:[#allocation9_spill] sm:$0xff] }
 0x169   : > { %1242 = vrot.lane.b32.xlu1 %v1205_v15, %s13594_s23  ;;  %1443 = vrot.lane.b32.xlu0 %v9829_v35, %s13590_s27  ;;  %13631 = vst [vmem:[#allocation25_spill] sm:$0xff] %v9853_v38  ;;  %v830_v52 = vadd.f32 %v804_v17, %v720_v32  ;;  %v1387_v33 = vsel %vm1384_vm7, %v9780_v31, %v9708_v59  ;;  %v13634_v17 = vld [vmem:[#allocation13_spill] sm:$0xff] }
 0x16a   : > { %v938_v53 = vadd.f32 %v912_v27, %v828_v48  ;;  %v1333_v47 = vmul.f32 %v9540_v2, %v9272_v12  ;;  %v1385_v59 = vsel %vm1384_vm7, %v9718_v24, %v9698_v40  ;;  %v1087_v32 = vmul.f32 %v13635_v43, %v13634_v17 }
 0x16b   : > { %v9855_v51 = vpop.permute.xlu0 %563  ;;  %v9857_v41 = vpop.permute.xlu1 %575  ;;  %v940_v49 = vadd.f32 %v914_v29, %v830_v52  ;;  %v1327_v40 = vmul.f32 %v9442_v14, %v13635_v43  ;;  %v1094_v24 = vmul.f32 %v9516_v55, %v9274_v13  ;;  %v1215_v52 = vmul.f32 %v9528_v61, %v13635_v43  ;;  %v1591_v14 = vld [vmem:[%s13550_s2] sm:$0xff] }
 0x16c   : > { %v1048_v10 = vadd.f32 %v1022_v44, %v938_v53  ;;  %v1214_v48 = vmul.f32 %v9528_v61, %v9274_v13 }
 0x16d   : > { %909 = vrot.lane.b32.xlu1 %v868_v21, %s9112_s20  ;;  %1447 = vrot.lane.b32.xlu0 %v9853_v38, %s13590_s27  ;;  %v1050_v3 = vadd.f32 %v1024_v0, %v940_v49  ;;  %v1334_v49 = vmul.f32 %v9540_v2, %v9274_v13  ;;  %s13636_s20 = smov 67  }
 0x16e   : > { %v1173_v63 = vadd.f32 %v1145_v58, %v1048_v10  ;;  %v1623_v58 = vld [vmem:[%s13551_s3 + $0x30] sm:$0xff] }
 0x16f   : > { %v9876_v15 = vpop.permute.xlu0 %789  ;;  %v9878_v9 = vpop.permute.xlu1 %679  ;;  %v1175_v22 = vadd.f32 %v1147_v62, %v1050_v3  ;;  %v1621_v62 = vld [vmem:[%s13551_s3 + $0x20] sm:$0xff] }
 0x170   : > { %v1293_v50 = vadd.f32 %v1265_v28, %v1173_v63  ;;  %v1617_v3 = vld [vmem:[%s13551_s3] sm:$0xff]  ;;  %v1626_v28 = vld [vmem:[%s13551_s3 + $0x48] sm:$0xff] }
 0x171   : > { %1364 = vrot.lane.b32.xlu1 %v1326_v36, %s13592_s30  ;;  %1138 = vrot.lane.b32.xlu0 %v1093_v57, %s13593_s22  ;;  %v1295_v60 = vadd.f32 %v1267_v54, %v1175_v22  ;;  %v1207_v36 = vmul.f32 %v9426_v7, %v13635_v43  ;;  %v1618_v57 = vld [vmem:[%s13551_s3 + $0x8] sm:$0xff]  ;;  %v1620_v54 = vld [vmem:[%s13551_s3 + $0x18] sm:$0xff] }
 0x172   : > { %v9925_v46 = vadd.f32 %v1385_v59, %v1293_v50  ;;  %v7923_v10 = vpack.c.bf16 %v1621_v62, %v1618_v57  ;;  %v1624_v7 = vld [vmem:[%s13551_s3 + $0x38] sm:$0xff]  ;;  %v1627_v22 = vld [vmem:[%s13551_s3 + $0x50] sm:$0xff]  ;;  %v7929_v59 = vpack.c.bf16 %v1626_v28, %v1623_v58  ;;  %v1638_v62 = vld [vmem:[%s13551_s3 + $0xa8] sm:$0xff] }
 0x173   : > { %v9892_v56 = vpop.permute.xlu0 %793  ;;  %v9894_v34 = vpop.permute.xlu1 %683  ;;  %v9911_v1 = vadd.f32 %v1387_v33, %v1295_v60  ;;  %v1630_v33 = vld [vmem:[%s13551_s3 + $0x68] sm:$0xff]  ;;  %v1633_v60 = vld [vmem:[%s13551_s3 + $0x80] sm:$0xff]  ;;  %v1635_v57 = vld [vmem:[%s13551_s3 + $0x90] sm:$0xff] }
 0x174   : > { %13633 = vst [vmem:[#allocation27_spill] sm:$0xff] %v9925_v46  ;;  %7924 = vmatprep.subr.bf16.mxu1 %v7923_v10  ;;  %v7931_v17 = vpack.c.bf16 %v1633_v60, %v1630_v33  ;;  %v1651_v58 = vld [vmem:[%s13551_s3 + $0x110] sm:$0xff] }
 0x175   : > { %1019 = vrot.lane.b32.xlu1 %v978_v18, %s13584_s21  ;;  %1258 = vrot.lane.b32.xlu0 %v1213_v26, %s13594_s23  ;;  %13632 = vst [vmem:[#allocation26_spill] sm:$0xff] %v9911_v1  ;;  %v7925_v18 = vpack.c.bf16 %v1620_v54, %v1617_v3  ;;  %v7927_v26 = vpack.c.bf16 %v1627_v22, %v1624_v7  ;;  %v1642_v3 = vld [vmem:[%s13551_s3 + $0xc8] sm:$0xff]  ;;  %v1641_v22 = vld [vmem:[%s13551_s3 + $0xc0] sm:$0xff]  ;;  %s13669_s21 = smov 98  }
 0x176   : > { %v7937_v54 = vpack.c.bf16 %v1638_v62, %v1635_v57  ;;  %v490_v57 = vmul.f32 %v9274_v13, %v9470_v25 }
 0x177   : > { %v9913_v23 = vpop.permute.xlu0 %787  ;;  %v9915_v20 = vpop.permute.xlu1 %677  ;;  %7926 = vmatpush1.bf16.msra.mxu1 %v7925_v18  ;;  %v1644_v18 = vld [vmem:[%s13551_s3 + $0xd8] sm:$0xff] }
 0x178   : > { %7928 = vmatprep.subr.bf16.mxu1 %v7927_v26  ;;  %v1648_v26 = vld [vmem:[%s13551_s3 + $0xf8] sm:$0xff]  ;;  %v7941_v60 = vpack.c.bf16 %v1644_v18, %v1641_v22 }
 0x179   : > { %1445 = vrot.lane.b32.xlu1 %v9911_v1, %s13590_s27  ;;  %1378 = vrot.lane.b32.xlu0 %v1333_v47, %s13592_s30  ;;  %v1095_v47 = vmul.f32 %v13635_v43, %v9516_v55  ;;  %v1639_v55 = vld [vmem:[%s13551_s3 + $0xb0] sm:$0xff] }
 0x17a   : > { %v13648_v1 = vld [vmem:[#allocation21_spill] sm:$0xff] }
 0x17b   : > { %v9927_v37 = vpop.permute.xlu0 %675  ;;  %v9929_v31 = vpop.permute.xlu1 %565  ;;  %7930 = vmatpush1.bf16.msra.mxu1 %v7929_v59  ;;  %v1647_v59 = vld [vmem:[%s13551_s3 + $0xf0] sm:$0xff] }
 0x17c   : > { %7932 = vmatprep.subr.bf16.mxu1 %v7931_v17  ;;  %v1650_v17 = vld [vmem:[%s13551_s3 + $0x108] sm:$0xff] }
 0x17d   : > { %1126 = vrot.lane.b32.xlu0 %v1087_v32, %s13593_s22  ;;  %1441 = vrot.lane.b32.xlu1 %v9925_v46, %s13590_s27  ;;  %v1629_v32 = vld [vmem:[%s13551_s3 + $0x60] sm:$0xff]  ;;  %s13676_s27 = smov 126  }
 0x17f   : > { %v9936_v45 = vpop.permute.xlu0 %901  ;;  %v9938_v21 = vpop.permute.xlu1 %791 }
 0x181   : > { %1366 = vrot.lane.b32.xlu0 %v1327_v40, %s13592_s30  ;;  %1140 = vrot.lane.b32.xlu1 %v1094_v24, %s13593_s22  ;;  %v1632_v40 = vld [vmem:[%s13551_s3 + $0x78] sm:$0xff]  ;;  %s9120_s22 = smov 111  }
 0x182   : > { %v1636_v24 = vld [vmem:[%s13551_s3 + $0x98] sm:$0xff] }
 0x183   : > { %v9946_v29 = vpop.permute.xlu0 %905  ;;  %v9948_v27 = vpop.permute.xlu1 %795 }
 0x185   : > { %1262 = vrot.lane.b32.xlu0 %v1215_v52, %s13594_s23  ;;  %1260 = vrot.lane.b32.xlu1 %v1214_v48, %s13594_s23  ;;  %s13677_s23 = smov 96  }
 0x187   : > { %v9959_v0 = vpop.permute.xlu0 %783  ;;  %v9961_v44 = vpop.permute.xlu1 %673 }
 0x189   : > { %1595 = vperm.xlu0 %8952, %v1591_v14   ;;  %1380 = vrot.lane.b32.xlu1 %v1334_v49, %s13592_s30  ;;  %v1335_v14 = vmul.f32 %v9540_v2, %v13635_v43  ;;  %v7933_v49 = vpack.c.bf16 %v1632_v40, %v1629_v32  ;;  %v1645_v2 = vld [vmem:[%s13551_s3 + $0xe0] sm:$0xff]  ;;  %s13652_s30 = smov 127  }
 0x18a   : > { %v7939_v7 = vpack.c.bf16 %v1645_v2, %v1642_v3  ;;  %v614_v2 = vadd.f32 %v9929_v31, %v490_v57 }
 0x18b   : > { %v9966_v53 = vpop.permute.xlu0 %1009  ;;  %v9968_v61 = vpop.permute.xlu1 %899  ;;  %7934 = vmatpush1.bf16.msra.mxu1 %v7933_v49 }
 0x18c   : > { %v724_v22 = vadd.f32 %v9927_v37, %v614_v2 }
 0x18d   : > { %1246 = vrot.lane.b32.xlu1 %v1207_v36, %s13636_s20  ;;  %v7935_v36 = vpack.c.bf16 %v1639_v55, %v1636_v24  ;;  %s13638_s20 = smov 66   ;;  %v7945_v24 = vpack.c.bf16 %v1650_v17, %v1647_v59 }
 0x18f   : > { %v10003_v63 = vpop.permute.xlu0 %1013  ;;  %v10005_v50 = vpop.permute.xlu1 %903  ;;  %7936 = vmatprep.subr.bf16.mxu1 %v7935_v36 }
 0x190   : > { %7938 = vmatpush1.bf16.msra.mxu1 %v7937_v54 }
 0x191   : > { %1142 = vrot.lane.b32.xlu1 %v1095_v47, %s13637_s17  ;;  %7940 = vmatprep.subr.bf16.mxu1 %v7939_v7  ;;  %v7943_v47 = vpack.c.bf16 %v1651_v58, %v1648_v26  ;;  %v13641_v26 = vld [vmem:[#allocation14_spill] sm:$0xff] }
 0x192   : > { %v497_v58 = vmul.f32 %v9274_v13, %v13641_v26 }
 0x193   : > { %v10022_v52 = vpop.permute.xlu0 %1007  ;;  %v10024_v48 = vpop.permute.xlu1 %897 }
 0x194   : > { %7942 = vmatpush1.bf16.msra.mxu1 %v7941_v60 }
 0x195   : > { %1382 = vrot.lane.b32.xlu1 %v1335_v14, %s13638_s20  ;;  %7944 = vmatprep.subr.bf16.mxu1 %v7943_v47  ;;  %v496_v47 = vmul.f32 %v9272_v12, %v13641_v26 }
 0x197   : > { %v10041_v43 = vpop.permute.xlu0 %895  ;;  %v10043_v10 = vpop.permute.xlu1 %785 }
 0x198   : > { %13639 = vst [vmem:[#allocation13_spill] sm:$0xff] %v10041_v43  ;;  %13640 = vst [vmem:[#allocation9_spill] sm:$0xff] %v10043_v10  ;;  %7946 = vmatpush1.bf16.msra.mxu1 %v7945_v24  ;;  %v834_v18 = vadd.f32 %v10043_v10, %v724_v22 }
 0x19a   : > { %v944_v2 = vadd.f32 %v10041_v43, %v834_v18  ;;  %v13649_v18 = vld [vmem:[#allocation10_spill] sm:$0xff] }
 0x19b   : > { %v10057_v28 = vpop.permute.xlu0 %1132  ;;  %v10059_v33 = vpop.permute.xlu1 %1011 }
 0x19f   : > { %v10067_v32 = vpop.permute.xlu0 %1136  ;;  %v10069_v40 = vpop.permute.xlu1 %1015 }
 0x1a3   : > { %v10071_v55 = vpop.permute.xlu0 %577  ;;  %v10073_v14 = vpop.permute.xlu1 %893 }
 0x1a7   : > { %v10075_v49 = vpop.permute.xlu0 %1003  ;;  %v10077_v36 = vpop.permute.xlu1 %1130 }
 0x1ab   : > { %v10081_v62 = vpop.permute.xlu0 %1250  ;;  %v10083_v3 = vpop.permute.xlu1 %1134 }
 0x1af   : > { %v10086_v54 = vpop.permute.xlu0 %1254  ;;  %v10088_v7 = vpop.permute.xlu1 %1128 }
 0x1b3   : > { %v10094_v60 = vpop.permute.xlu0 %1248  ;;  %v580_v59 = vpop.permute.xlu1 %579 }
 0x1b4   : > { %v593_v17 = vsel %vm581_vm0, %v10071_v55, %v580_v59  ;;  %v10100_v24 = vadd.f32 %v580_v59, %v497_v58  ;;  %v589_v58 = vsel %vm581_vm0, %v13648_v1, %v9833_v11  ;;  %v492_v59 = vmul.f32 %v13649_v18, %v13641_v26 }
 0x1b5   : > { %v10102_v57 = vadd.f32 %v593_v17, %v496_v47  ;;  %v588_v47 = vsel %vm581_vm0, %v9778_v6, %v13648_v1  ;;  %v491_v17 = vmul.f32 %v9348_v42, %v13641_v26  ;;  %v13650_v1 = vld [vmem:[#allocation22_spill] sm:$0xff] }
 0x1b6   : > { %13642 = vst [vmem:[#allocation14_spill] sm:$0xff] %v10100_v24  ;;  %v698_v24 = vsel %vm691_vm1, %v9915_v20, %v9878_v9  ;;  %v590_v18 = vsel %vm581_vm0, %v9833_v11, %v13650_v1  ;;  %v591_v42 = vsel %vm581_vm0, %v13650_v1, %v9857_v41  ;;  %v13651_v20 = vld [vmem:[#allocation12_spill] sm:$0xff] }
 0x1b7   : > { %13643 = vst [vmem:[#allocation28_spill] sm:$0xff] %v10102_v57  ;;  %v10105_v38 = vpop.permute.xlu0 %689  ;;  %v10107_v22 = vpop.permute.xlu1 %1005  ;;  %v615_v6 = vadd.f32 %v588_v47, %v491_v17  ;;  %v700_v47 = vsel %vm691_vm1, %v9800_v19, %v9894_v34  ;;  %v1654_v11 = vld [vmem:[%s13551_s3 + $0x128] sm:$0xff]  ;;  %v1657_v17 = vld [vmem:[%s13551_s3 + $0x140] sm:$0xff] }
 0x1b8   : > { %13644 = vst [vmem:[#allocation29_spill] sm:$0xff] %v10105_v38  ;;  %13645 = vst [vmem:[#allocation30_spill] sm:$0xff] %v10107_v22  ;;  %v10110_v13 = vadd.f32 %v10107_v22, %v944_v2  ;;  %v699_v2 = vsel %vm691_vm1, %v9878_v9, %v9800_v19  ;;  %v493_v9 = vmul.f32 %v9319_v30, %v13641_v26  ;;  %v1653_v30 = vld [vmem:[%s13551_s3 + $0x120] sm:$0xff] }
 0x1b9   : > { %v919_v19 = vsel %vm911_vm3, %v9968_v61, %v9936_v45  ;;  %v7947_v1 = vpack.c.bf16 %v1657_v17, %v1654_v11 }
 0x1ba   : > { %13646 = vst [vmem:[#allocation31_spill] sm:$0xff] %v10110_v13  ;;  %v616_v13 = vadd.f32 %v589_v58, %v492_v59  ;;  %v809_v58 = vsel %vm801_vm2, %v9876_v15, %v9938_v21  ;;  %v494_v59 = vmul.f32 %v13651_v20, %v13641_v26  ;;  %v1656_v20 = vld [vmem:[%s13551_s3 + $0x138] sm:$0xff]  ;;  %v617_v38 = vadd.f32 %v590_v18, %v493_v9 }
 0x1bb   : > { %v10112_v46 = vpop.permute.xlu0 %1124  ;;  %v10114_v39 = vpop.permute.xlu1 %1252  ;;  %v7949_v10 = vpack.c.bf16 %v1656_v20, %v1653_v30  ;;  %7948 = vmatprep.subr.bf16.mxu1 %v7947_v1  ;;  %v1662_v30 = vld [vmem:[%s13551_s3 + $0x168] sm:$0xff] }
 0x1bc   : > { %13647 = vst [vmem:[#allocation32_spill] sm:$0xff] %v10112_v46  ;;  %v726_v35 = vadd.f32 %v699_v2, %v616_v13  ;;  %v701_v13 = vsel %vm691_vm1, %v9894_v34, %v9831_v5  ;;  %v725_v2 = vadd.f32 %v698_v24, %v615_v6  ;;  %v618_v22 = vadd.f32 %v591_v42, %v494_v59 }
 0x1bd   : > { %v810_v34 = vsel %vm801_vm2, %v9938_v21, %v9892_v56  ;;  %v811_v24 = vsel %vm801_vm2, %v9892_v56, %v9948_v27  ;;  %v1029_v6 = vsel %vm1021_vm4, %v9966_v53, %v10059_v33  ;;  %v727_v18 = vadd.f32 %v700_v47, %v617_v38  ;;  %7950 = vmatpush1.bf16.msra.mxu1 %v7949_v10  ;;  %v1659_v47 = vld [vmem:[%s13551_s3 + $0x150] sm:$0xff] }
 0x1be   : > { %v836_v16 = vadd.f32 %v809_v58, %v726_v35  ;;  %v728_v35 = vadd.f32 %v701_v13, %v618_v22  ;;  %v808_v42 = vsel %vm801_vm2, %v9913_v23, %v9876_v15  ;;  %v920_v21 = vsel %vm911_vm3, %v9936_v45, %v10005_v50  ;;  %v1660_v45 = vld [vmem:[%s13551_s3 + $0x158] sm:$0xff] }
 0x1bf   : > { %v10132_v57 = vpop.permute.xlu0 %1372  ;;  %v10134_v46 = vpop.permute.xlu1 %1256  ;;  %v921_v56 = vsel %vm911_vm3, %v10005_v50, %v9946_v29  ;;  %v835_v9 = vadd.f32 %v808_v42, %v725_v2  ;;  %v1153_v38 = vsel %vm1144_vm5, %v10077_v36, %v10057_v28  ;;  %v837_v22 = vadd.f32 %v810_v34, %v727_v18  ;;  %v1663_v50 = vld [vmem:[%s13551_s3 + $0x170] sm:$0xff]  ;;  %v1666_v42 = vld [vmem:[%s13551_s3 + $0x188] sm:$0xff] }
 0x1c0   : > { %v946_v58 = vadd.f32 %v919_v19, %v836_v16  ;;  %v838_v59 = vadd.f32 %v811_v24, %v728_v35  ;;  %v918_v16 = vsel %vm911_vm3, %v10024_v48, %v9968_v61  ;;  %v1030_v61 = vsel %vm1021_vm4, %v10059_v33, %v10003_v63 }
 0x1c1   : > { %v1031_v48 = vsel %vm1021_vm4, %v10003_v63, %v10069_v40  ;;  %v1273_v11 = vsel %vm1264_vm6, %v10081_v62, %v10114_v39  ;;  %v7951_v17 = vpack.c.bf16 %v1663_v50, %v1660_v45  ;;  %v947_v13 = vadd.f32 %v920_v21, %v837_v22  ;;  %v1671_v45 = vld [vmem:[%s13551_s3 + $0x1b0] sm:$0xff] }
 0x1c2   : > { %v1056_v15 = vadd.f32 %v1029_v6, %v946_v58  ;;  %v948_v2 = vadd.f32 %v921_v56, %v838_v59  ;;  %v7953_v1 = vpack.c.bf16 %v1662_v30, %v1659_v47  ;;  %v1154_v33 = vsel %vm1144_vm5, %v10057_v28, %v10083_v3  ;;  %v1669_v28 = vld [vmem:[%s13551_s3 + $0x1a0] sm:$0xff] }
 0x1c3   : > { %v10170_v43 = vpop.permute.xlu0 %1376  ;;  %v10172_v4 = vpop.permute.xlu1 %687  ;;  %v1155_v63 = vsel %vm1144_vm5, %v10083_v3, %v10067_v32  ;;  %7952 = vmatprep.subr.bf16.mxu1 %v7951_v17  ;;  %v945_v20 = vadd.f32 %v918_v16, %v835_v9  ;;  %v1057_v34 = vadd.f32 %v1030_v61, %v947_v13  ;;  %v1665_v3 = vld [vmem:[%s13551_s3 + $0x180] sm:$0xff]  ;;  %v1274_v58 = vsel %vm1264_vm6, %v10114_v39, %v10086_v54  ;;  %v1672_v39 = vld [vmem:[%s13551_s3 + $0x1b8] sm:$0xff] }
 0x1c4   : > { %v1181_v19 = vadd.f32 %v1153_v38, %v1056_v15  ;;  %v1058_v24 = vadd.f32 %v1031_v48, %v948_v2  ;;  %7954 = vmatpush1.bf16.msra.mxu1 %v7953_v1  ;;  %v1275_v21 = vsel %vm1264_vm6, %v10086_v54, %v10134_v46  ;;  %v7955_v9 = vpack.c.bf16 %v1669_v28, %v1666_v42  ;;  %v1668_v38 = vld [vmem:[%s13551_s3 + $0x198] sm:$0xff]  ;;  %v1675_v54 = vld [vmem:[%s13551_s3 + $0x1d0] sm:$0xff]  ;;  %v1674_v48 = vld [vmem:[%s13551_s3 + $0x1c8] sm:$0xff] }
 0x1c5   : > { %v1182_v22 = vadd.f32 %v1154_v33, %v1057_v34  ;;  %v7957_v15 = vpack.c.bf16 %v1668_v38, %v1665_v3  ;;  %v1028_v50 = vsel %vm1021_vm4, %v10022_v52, %v9966_v53  ;;  %v1152_v47 = vsel %vm1144_vm5, %v10088_v7, %v10077_v36  ;;  %v1681_v17 = vld [vmem:[%s13551_s3 + $0x200] sm:$0xff]  ;;  %v1686_v38 = vld [vmem:[%s13551_s3 + $0x228] sm:$0xff] }
 0x1c6   : > { %v1301_v6 = vadd.f32 %v1273_v11, %v1181_v19  ;;  %v1183_v59 = vadd.f32 %v1155_v63, %v1058_v24  ;;  %7956 = vmatprep.subr.bf16.mxu1 %v7955_v9  ;;  %v7959_v61 = vpack.c.bf16 %v1675_v54, %v1672_v39  ;;  %v1678_v11 = vld [vmem:[%s13551_s3 + $0x1e8] sm:$0xff]  ;;  %v1055_v30 = vadd.f32 %v1028_v50, %v945_v20  ;;  %v1677_v24 = vld [vmem:[%s13551_s3 + $0x1e0] sm:$0xff]  ;;  %v1683_v9 = vld [vmem:[%s13551_s3 + $0x210] sm:$0xff] }
 0x1c7   : > { %v10198_v23 = vpop.permute.xlu0 %799  ;;  %v10200_v10 = vpop.permute.xlu1 %1122  ;;  %v1302_v53 = vadd.f32 %v1274_v58, %v1182_v22  ;;  %v1272_v7 = vsel %vm1264_vm6, %v10094_v60, %v10081_v62  ;;  %v7961_v1 = vpack.c.bf16 %v1674_v48, %v1671_v45  ;;  %v7963_v34 = vpack.c.bf16 %v1681_v17, %v1678_v11  ;;  %v1680_v62 = vld [vmem:[%s13551_s3 + $0x1f8] sm:$0xff]  ;;  %v1690_v22 = vld [vmem:[%s13551_s3 + $0x248] sm:$0xff]  ;;  %v1689_v45 = vld [vmem:[%s13551_s3 + $0x240] sm:$0xff] }
 0x1c8   : > { %v1303_v52 = vadd.f32 %v1275_v21, %v1183_v59  ;;  %7958 = vmatpush1.bf16.msra.mxu1 %v7957_v15  ;;  %v1180_v33 = vadd.f32 %v1152_v47, %v1055_v30  ;;  %v1684_v60 = vld [vmem:[%s13551_s3 + $0x218] sm:$0xff]  ;;  %v7965_v58 = vpack.c.bf16 %v1680_v62, %v1677_v24  ;;  %v7969_v39 = vpack.c.bf16 %v1686_v38, %v1683_v9 }
 0x1c9   : > { %7960 = vmatprep.subr.bf16.mxu1 %v7959_v61  ;;  %v1692_v50 = vld [vmem:[%s13551_s3 + $0x258] sm:$0xff]  ;;  %v1699_v61 = vld [vmem:[%s13551_s3 + $0x290] sm:$0xff] }
 0x1ca   : > { %v1696_v47 = vld [vmem:[%s13551_s3 + $0x278] sm:$0xff] }
 0x1cb   : > { %v10229_v18 = vpop.permute.xlu0 %1244  ;;  %v1371_v35 = vpop.permute.xlu1 %1370  ;;  %v13653_v17 = vld [vmem:[#allocation15_spill] sm:$0xff] }
 0x1cc   : > { %v1393_v56 = vsel %vm1384_vm7, %v1371_v35, %v10132_v57  ;;  %7962 = vmatpush1.bf16.msra.mxu1 %v7961_v1  ;;  %v586_v30 = vsel %vm581_vm0, %v13653_v17, %v9855_v51  ;;  %v13655_v1 = vld [vmem:[#allocation16_spill] sm:$0xff]  ;;  %v1026_v17 = vsel %vm1021_vm4, %v9638_v8, %v10075_v49  ;;  %v1707_v8 = vld [vmem:[%s13551_s3 + $0x2d0] sm:$0xff] }
 0x1cd   : > { %v10251_v16 = vadd.f32 %v1393_v56, %v1301_v6  ;;  %v1300_v6 = vadd.f32 %v1272_v7, %v1180_v33  ;;  %7964 = vmatprep.subr.bf16.mxu1 %v7963_v34  ;;  %v7975_v7 = vpack.c.bf16 %v1699_v61, %v1696_v47  ;;  %v696_v33 = vsel %vm691_vm1, %v13655_v1, %v9961_v44  ;;  %v1710_v1 = vld [vmem:[%s13551_s3 + $0x2e8] sm:$0xff] }
 0x1cf   : > { %v10277_v13 = vpop.permute.xlu0 %907  ;;  %v1375_v36 = vpop.permute.xlu1 %1374  ;;  %1457 = vrot.lane.b32.xlu1 %v10251_v16, %s13652_s30 }
 0x1d0   : > { %v1394_v2 = vsel %vm1384_vm7, %v10132_v57, %v1375_v36  ;;  %v1395_v19 = vsel %vm1384_vm7, %v1375_v36, %v10170_v43  ;;  %v1687_v57 = vld [vmem:[%s13551_s3 + $0x230] sm:$0xff]  ;;  %7966 = vmatpush1.bf16.msra.mxu1 %v7965_v58  ;;  %v489_v58 = vmul.f32 %v9272_v12, %v9470_v25  ;;  %v1701_v12 = vld [vmem:[%s13551_s3 + $0x2a0] sm:$0xff] }
 0x1d1   : > { %v10288_v63 = vadd.f32 %v1394_v2, %v1302_v53  ;;  %v10290_v20 = vadd.f32 %v1395_v19, %v1303_v52  ;;  %v7967_v56 = vpack.c.bf16 %v1687_v57, %v1684_v60  ;;  %v7973_v53 = vpack.c.bf16 %v1692_v50, %v1689_v45  ;;  %v13654_v52 = vld [vmem:[#allocation11_spill] sm:$0xff]  ;;  %v1695_v2 = vld [vmem:[%s13551_s3 + $0x270] sm:$0xff]  ;;  %v1698_v19 = vld [vmem:[%s13551_s3 + $0x288] sm:$0xff] }
 0x1d2   : > { %v488_v36 = vmul.f32 %v13654_v52, %v9470_v25  ;;  %v592_v60 = vsel %vm581_vm0, %v9857_v41, %v10071_v55  ;;  %v7977_v57 = vpack.c.bf16 %v1698_v19, %v1695_v2  ;;  %v13656_v25 = vld [vmem:[#allocation17_spill] sm:$0xff]  ;;  %v13659_v2 = vld [vmem:[#allocation20_spill] sm:$0xff] }
 0x1d3   : > { %v10304_v42 = vpop.permute.xlu0 %1362  ;;  %1459 = vrot.lane.b32.xlu0 %v10288_v63, %s13652_s30  ;;  %v1369_v28 = vpop.permute.xlu1 %1368  ;;  %1461 = vrot.lane.b32.xlu1 %v10290_v20, %s13652_s30 }
 0x1d4   : > { %v1392_v3 = vsel %vm1384_vm7, %v1369_v28, %v1371_v35  ;;  %v1693_v35 = vld [vmem:[%s13551_s3 + $0x260] sm:$0xff]  ;;  %7968 = vmatprep.subr.bf16.mxu1 %v7967_v56  ;;  %v612_v34 = vadd.f32 %v586_v30, %v488_v36  ;;  %v495_v28 = vmul.f32 %v13654_v52, %v13641_v26  ;;  %v587_v56 = vsel %vm581_vm0, %v9855_v51, %v9929_v31  ;;  %v1702_v26 = vld [vmem:[%s13551_s3 + $0x2a8] sm:$0xff]  ;;  %v13657_v31 = vld [vmem:[#allocation18_spill] sm:$0xff] }
 0x1d5   : > { %v10311_v21 = vadd.f32 %v1392_v3, %v1300_v6  ;;  %v7971_v54 = vpack.c.bf16 %v1693_v35, %v1690_v22  ;;  %7970 = vmatpush1.bf16.msra.mxu1 %v7969_v39  ;;  %v702_v3 = vsel %vm691_vm1, %v9831_v5, %v10172_v4  ;;  %v1705_v5 = vld [vmem:[%s13551_s3 + $0x2c0] sm:$0xff]  ;;  %v806_v51 = vsel %vm801_vm2, %v13656_v25, %v9959_v0  ;;  %v1704_v39 = vld [vmem:[%s13551_s3 + $0x2b8] sm:$0xff] }
 0x1d6   : > { %v722_v6 = vadd.f32 %v696_v33, %v612_v34  ;;  %v619_v9 = vadd.f32 %v592_v60, %v495_v28  ;;  %v916_v38 = vsel %vm911_vm3, %v13657_v31, %v10073_v14  ;;  %v7979_v35 = vpack.c.bf16 %v1705_v5, %v1702_v26  ;;  %v13660_v33 = vld [vmem:[#allocation13_spill] sm:$0xff] }
 0x1d7   : > { %v10325_v59 = vpop.permute.xlu0 %1017  ;;  %v10327_v15 = vpop.permute.xlu1 %797  ;;  %1455 = vrot.lane.b32.xlu0 %v10311_v21, %s13652_s30  ;;  %7972 = vmatprep.subr.bf16.mxu1 %v7971_v54  ;;  %v697_v54 = vsel %vm691_vm1, %v9961_v44, %v9927_v37  ;;  %v7981_v47 = vpack.c.bf16 %v1704_v39, %v1701_v12  ;;  %v613_v61 = vadd.f32 %v587_v56, %v489_v58  ;;  %v1708_v37 = vld [vmem:[%s13551_s3 + $0x2d8] sm:$0xff]  ;;  %v1711_v44 = vld [vmem:[%s13551_s3 + $0x2f0] sm:$0xff] }
 0x1d8   : > { %v812_v22 = vsel %vm801_vm2, %v9948_v27, %v10327_v15  ;;  %v832_v45 = vadd.f32 %v806_v51, %v722_v6  ;;  %v729_v50 = vadd.f32 %v702_v3, %v619_v9  ;;  %v13658_v27 = vld [vmem:[#allocation9_spill] sm:$0xff]  ;;  %v7983_v19 = vpack.c.bf16 %v1711_v44, %v1708_v37  ;;  %v13661_v58 = vld [vmem:[#allocation19_spill] sm:$0xff]  ;;  %v13662_v9 = vld [vmem:[#allocation30_spill] sm:$0xff] }
 0x1d9   : > { %7974 = vmatpush1.bf16.msra.mxu1 %v7973_v53  ;;  %v807_v30 = vsel %vm801_vm2, %v9959_v0, %v13658_v27  ;;  %v1149_v0 = vsel %vm1144_vm5, %v13659_v2, %v10200_v10  ;;  %v917_v34 = vsel %vm911_vm3, %v10073_v14, %v13660_v33  ;;  %v7985_v6 = vpack.c.bf16 %v1710_v1, %v1707_v8  ;;  %v13663_v51 = vld [vmem:[#allocation29_spill] sm:$0xff] }
 0x1da   : > { %7976 = vmatprep.subr.bf16.mxu1 %v7975_v7  ;;  %v942_v53 = vadd.f32 %v916_v38, %v832_v45  ;;  %v839_v52 = vadd.f32 %v812_v22, %v729_v50  ;;  %v723_v7 = vadd.f32 %v697_v54, %v613_v61  ;;  %v922_v3 = vsel %vm911_vm3, %v9946_v29, %v10277_v13  ;;  %v13666_v50 = vld [vmem:[#allocation32_spill] sm:$0xff] }
 0x1db   : > { %v10343_v48 = vpop.permute.xlu0 %1443  ;;  %v10345_v11 = vpop.permute.xlu1 %1242  ;;  %v1027_v26 = vsel %vm1021_vm4, %v10075_v49, %v13662_v9  ;;  %v703_v31 = vsel %vm691_vm1, %v10172_v4, %v13663_v51  ;;  %v13665_v49 = vld [vmem:[#allocation26_spill] sm:$0xff]  ;;  %v1032_v4 = vsel %vm1021_vm4, %v10069_v40, %v10325_v59  ;;  %v813_v40 = vsel %vm801_vm2, %v10327_v15, %v10198_v23 }
 0x1dc   : > { %v1052_v60 = vadd.f32 %v1026_v17, %v942_v53  ;;  %v833_v28 = vadd.f32 %v807_v30, %v723_v7  ;;  %v1269_v56 = vsel %vm1264_vm6, %v13661_v58, %v10345_v11  ;;  %v949_v12 = vadd.f32 %v922_v3, %v839_v52  ;;  %v13667_v17 = vld [vmem:[#allocation28_spill] sm:$0xff]  ;;  %v13668_v30 = vld [vmem:[#allocation23_spill] sm:$0xff] }
 0x1dd   : > { %7978 = vmatpush1.bf16.msra.mxu1 %v7977_v57  ;;  %v730_v27 = vadd.f32 %v703_v31, %v13667_v17  ;;  %v1389_v53 = vsel %vm1384_vm7, %v13668_v30, %v10304_v42 }
 0x1de   : > { %7980 = vmatprep.subr.bf16.mxu1 %v7979_v35  ;;  %v1177_v5 = vadd.f32 %v1149_v0, %v1052_v60  ;;  %v943_v25 = vadd.f32 %v917_v34, %v833_v28  ;;  %v13664_v35 = vld [vmem:[#allocation24_spill] sm:$0xff]  ;;  %v1059_v52 = vadd.f32 %v1032_v4, %v949_v12 }
 0x1df   : > { %v10361_v24 = vpop.permute.xlu0 %1447  ;;  %v10363_v62 = vpop.permute.xlu1 %909  ;;  %v840_v33 = vadd.f32 %v813_v40, %v730_v27  ;;  %v1810_v40 = vld [vmem:[%s13551_s3 + $0x608] sm:$0xff] }
 0x1e0   : > { %v1297_v22 = vadd.f32 %v1269_v56, %v1177_v5  ;;  %v1053_v45 = vadd.f32 %v1027_v26, %v943_v25  ;;  %v923_v15 = vsel %vm911_vm3, %v10277_v13, %v10363_v62  ;;  %vm3413_vm3 = vcmask 769024  }
 0x1e1   : > { %7982 = vmatpush1.bf16.msra.mxu1 %v7981_v47  ;;  %v1150_v47 = vsel %vm1144_vm5, %v10200_v10, %v13666_v50 }
 0x1e2   : > { %7984 = vmatprep.subr.bf16.mxu1 %v7983_v19  ;;  %v1178_v7 = vadd.f32 %v1150_v47, %v1053_v45  ;;  %v10481_v2 = vadd.f32 %v1389_v53, %v1297_v22  ;;  %v13670_v19 = vld [vmem:[#allocation27_spill] sm:$0xff]  ;;  %v1714_v53 = vld [vmem:[%s13551_s3 + $0x308] sm:$0xff] }
 0x1e3   : > { %v10378_v41 = vpop.permute.xlu0 %1138  ;;  %v10380_v55 = vpop.permute.xlu1 %1364  ;;  %v13672_v22 = vld [vmem:[#allocation31_spill] sm:$0xff] }
 0x1e4   : > { %v1156_v61 = vsel %vm1144_vm5, %v10067_v32, %v10378_v41  ;;  %v1270_v32 = vsel %vm1264_vm6, %v10345_v11, %v10229_v18  ;;  %v1390_v11 = vsel %vm1384_vm7, %v10304_v42, %v10380_v55 }
 0x1e5   : > { %7986 = vmatpush1.bf16.msra.mxu1 %v7985_v6  ;;  %v1184_v0 = vadd.f32 %v1156_v61, %v1059_v52  ;;  %v950_v6 = vadd.f32 %v923_v15, %v840_v33  ;;  %v1717_v52 = vld [vmem:[%s13551_s3 + $0x320] sm:$0xff]  ;;  %v1819_v15 = vld [vmem:[%s13551_s3 + $0x650] sm:$0xff]  ;;  %v1818_v33 = vld [vmem:[%s13551_s3 + $0x648] sm:$0xff] }
 0x1e7   : > { %v10412_v36 = vpop.permute.xlu1 %1019  ;;  %v1259_v57 = vpop.permute.xlu0 %1258 }
 0x1e8   : > { %v1276_v44 = vsel %vm1264_vm6, %v10134_v46, %v1259_v57  ;;  %v1033_v13 = vsel %vm1021_vm4, %v10325_v59, %v10412_v36 }
 0x1e9   : > { %v1304_v34 = vadd.f32 %v1276_v44, %v1184_v0  ;;  %v1060_v3 = vadd.f32 %v1033_v13, %v950_v6  ;;  %v1809_v44 = vld [vmem:[%s13551_s3 + $0x600] sm:$0xff] }
 0x1eb   : > { %v1446_v14 = vpop.permute.xlu1 %1445  ;;  %v1379_v37 = vpop.permute.xlu0 %1378 }
 0x1ec   : > { %v1470_v29 = vsel %vm581_vm0, %v10343_v48, %v1446_v14  ;;  %v1471_v38 = vsel %vm581_vm0, %v1446_v14, %v10361_v24  ;;  %v1396_v46 = vsel %vm1384_vm7, %v10170_v43, %v1379_v37 }
 0x1ed   : > { %v10449_v39 = vmax.f32 %v13664_v35, %v1470_v29  ;;  %v10452_v54 = vmax.f32 %v13665_v49, %v1471_v38  ;;  %v10503_v42 = vadd.f32 %v1396_v46, %v1304_v34  ;;  %v1815_v46 = vld [vmem:[%s13551_s3 + $0x630] sm:$0xff]  ;;  %v1822_v34 = vld [vmem:[%s13551_s3 + $0x668] sm:$0xff] }
 0x1ef   : > { %1527 = vrot.lane.b32.xlu0 %v10452_v54, %s13669_s21  ;;  %1525 = vrot.lane.b32.xlu1 %v10449_v39, %s13669_s21  ;;  %v1442_v10 = vpop.permute.xlu1 %1441  ;;  %v1127_v58 = vpop.permute.xlu0 %1126 }
 0x1f0   : > { %v1469_v8 = vsel %vm581_vm0, %v1442_v10, %v10343_v48  ;;  %v1298_v48 = vadd.f32 %v1270_v32, %v1178_v7  ;;  %v1151_v12 = vsel %vm1144_vm5, %v13666_v50, %v1127_v58  ;;  %v7987_v10 = vpack.c.bf16 %v1717_v52, %v1714_v53  ;;  %v1813_v32 = vld [vmem:[%s13551_s3 + $0x620] sm:$0xff]  ;;  %v1824_v58 = vld [vmem:[%s13551_s3 + $0x678] sm:$0xff] }
 0x1f1   : > { %v10484_v1 = vmax.f32 %v13670_v19, %v1469_v8  ;;  %v1179_v35 = vadd.f32 %v1151_v12, %v13672_v22  ;;  %v1812_v8 = vld [vmem:[%s13551_s3 + $0x618] sm:$0xff]  ;;  %v8051_v7 = vpack.c.bf16 %v1813_v32, %v1810_v40  ;;  %v1830_v12 = vld [vmem:[%s13551_s3 + $0x6a8] sm:$0xff]  ;;  %v1855_v40 = vld [vmem:[%s13551_s3 + $0x770] sm:$0xff] }
 0x1f2   : > { %v10501_v28 = vadd.f32 %v1390_v11, %v1298_v48  ;;  %7988 = vmatprep.subr.bf16.mxu1 %v7987_v10  ;;  %v8053_v0 = vpack.c.bf16 %v1812_v8, %v1809_v44  ;;  %v1816_v19 = vld [vmem:[%s13551_s3 + $0x638] sm:$0xff]  ;;  %v8057_v48 = vpack.c.bf16 %v1818_v33, %v1815_v46  ;;  %v1834_v22 = vld [vmem:[%s13551_s3 + $0x6c8] sm:$0xff]  ;;  %v1851_v8 = vld [vmem:[%s13551_s3 + $0x750] sm:$0xff] }
 0x1f3   : > { %1449 = vrot.lane.b32.xlu0 %v10481_v2, %s13652_s30  ;;  %1523 = vrot.lane.b32.xlu1 %v10484_v1, %s13669_s21  ;;  %v1141_v60 = vpop.permute.xlu1 %1140  ;;  %v1367_v31 = vpop.permute.xlu0 %1366  ;;  %v8055_v11 = vpack.c.bf16 %v1819_v15, %v1816_v19  ;;  %v1848_v52 = vld [vmem:[%s13551_s3 + $0x738] sm:$0xff]  ;;  %v1861_v19 = vld [vmem:[%s13551_s3 + $0x7a0] sm:$0xff] }
 0x1f4   : > { %v1157_v43 = vsel %vm1144_vm5, %v10378_v41, %v1141_v60  ;;  %v13671_v41 = vld [vmem:[#allocation14_spill] sm:$0xff]  ;;  %8052 = vmatprep.subr.bf16.mxu0 %v8051_v7  ;;  %v1854_v7 = vld [vmem:[%s13551_s3 + $0x768] sm:$0xff]  ;;  %v1857_v46 = vld [vmem:[%s13551_s3 + $0x780] sm:$0xff] }
 0x1f5   : > { %v1185_v59 = vadd.f32 %v1157_v43, %v1060_v3  ;;  %v731_v25 = vadd.f32 %v13663_v51, %v13671_v41  ;;  %v1391_v51 = vsel %vm1384_vm7, %v10380_v55, %v1367_v31  ;;  %8054 = vmatpush1.bf16.msra.mxu0 %v8053_v0  ;;  %v1821_v3 = vld [vmem:[%s13551_s3 + $0x660] sm:$0xff]  ;;  %v1852_v10 = vld [vmem:[%s13551_s3 + $0x758] sm:$0xff]  ;;  %v1858_v0 = vld [vmem:[%s13551_s3 + $0x788] sm:$0xff]  ;;  %v8081_v15 = vpack.c.bf16 %v1854_v7, %v1851_v8 }
 0x1f6   : > { %8056 = vmatprep.subr.bf16.mxu0 %v8055_v11  ;;  %v8079_v44 = vpack.c.bf16 %v1855_v40, %v1852_v10  ;;  %v8083_v11 = vpack.c.bf16 %v1861_v19, %v1858_v0  ;;  %v1860_v33 = vld [vmem:[%s13551_s3 + $0x798] sm:$0xff]  ;;  %v1722_v8 = vld [vmem:[%s13551_s3 + $0x348] sm:$0xff]  ;;  %v1881_v7 = vld [vmem:[%s13551_s3 + $0x840] sm:$0xff] }
 0x1f7   : > { %1463 = vrot.lane.b32.xlu0 %v10503_v42, %s13652_s30  ;;  %1451 = vrot.lane.b32.xlu1 %v10501_v28, %s13652_s30  ;;  %v1261_v56 = vpop.permute.xlu1 %1260  ;;  %v841_v38 = vadd.f32 %v10198_v23, %v731_v25  ;;  %v1263_v4 = vpop.permute.xlu0 %1262  ;;  %v1884_v0 = vld [vmem:[%s13551_s3 + $0x858] sm:$0xff] }
 0x1f8   : > { %v1277_v9 = vsel %vm1264_vm6, %v1259_v57, %v1261_v56 }
 0x1f9   : > { %v1305_v26 = vadd.f32 %v1277_v9, %v1185_v59  ;;  %v951_v45 = vadd.f32 %v10363_v62, %v841_v38  ;;  %v1592_v62 = vld [vmem:[%s13550_s2 + $0x8] sm:$0x1]  ;;  %8058 = vmatpush1.bf16.msra.mxu0 %v8057_v48  ;;  %v1828_v9 = vld [vmem:[%s13551_s3 + $0x698] sm:$0xff]  ;;  %v1831_v59 = vld [vmem:[%s13551_s3 + $0x6b0] sm:$0xff] }
 0x1fa   : > { %v1864_v48 = vld [vmem:[%s13551_s3 + $0x7b8] sm:$0xff] }
 0x1fb   : > { %v1381_v5 = vpop.permute.xlu1 %1380  ;;  %v1061_v47 = vadd.f32 %v10412_v36, %v951_v45 }
 0x1fc   : > { %v1397_v14 = vsel %vm1384_vm7, %v1379_v37, %v1381_v5 }
 0x1fd   : > { %v10517_v29 = vadd.f32 %v1397_v14, %v1305_v26  ;;  %v1827_v26 = vld [vmem:[%s13551_s3 + $0x690] sm:$0xff] }
 0x1fe   : > { %v8065_v25 = vpack.c.bf16 %v1830_v12, %v1827_v26  ;;  %v1873_v26 = vld [vmem:[%s13551_s3 + $0x800] sm:$0xff] }
 0x1ff   : > { %1465 = vrot.lane.b32.xlu1 %v10517_v29, %s13652_s30  ;;  %v1247_v57 = vpop.permute.xlu1 %1246 }
 0x200   : > { %v1271_v49 = vsel %vm1264_vm6, %v10229_v18, %v1247_v57  ;;  %v1278_v18 = vsel %vm1264_vm6, %v1261_v56, %v1263_v4  ;;  %v8061_v56 = vpack.c.bf16 %v1824_v58, %v1821_v3  ;;  %v1866_v3 = vld [vmem:[%s13551_s3 + $0x7c8] sm:$0xff]  ;;  %vm3597_vm6 = vcmask 646144  }
 0x201   : > { %v1299_v50 = vadd.f32 %v1271_v49, %v1179_v35  ;;  %v1837_v35 = vld [vmem:[%s13551_s3 + $0x6e0] sm:$0xff] }
 0x202   : > { %v8067_v45 = vpack.c.bf16 %v1837_v35, %v1834_v22  ;;  %v1876_v22 = vld [vmem:[%s13551_s3 + $0x818] sm:$0xff]  ;;  %v1879_v35 = vld [vmem:[%s13551_s3 + $0x830] sm:$0xff] }
 0x203   : > { %v10529_v61 = vadd.f32 %v1391_v51, %v1299_v50  ;;  %v1143_v23 = vpop.permute.xlu1 %1142  ;;  %v1833_v50 = vld [vmem:[%s13551_s3 + $0x6c0] sm:$0xff]  ;;  %v1836_v51 = vld [vmem:[%s13551_s3 + $0x6d8] sm:$0xff] }
 0x204   : > { %v1158_v17 = vsel %vm1144_vm5, %v1141_v60, %v1143_v23  ;;  %v1825_v60 = vld [vmem:[%s13551_s3 + $0x680] sm:$0xff] }
 0x205   : > { %v1186_v27 = vadd.f32 %v1158_v17, %v1061_v47  ;;  %1453 = vrot.lane.b32.xlu0 %v10529_v61, %s13652_s30  ;;  %v8059_v13 = vpack.c.bf16 %v1825_v60, %v1822_v34  ;;  %v8069_v47 = vpack.c.bf16 %v1836_v51, %v1833_v50  ;;  %v1867_v34 = vld [vmem:[%s13551_s3 + $0x7d0] sm:$0xff]  ;;  %v8085_v60 = vpack.c.bf16 %v1860_v33, %v1857_v46  ;;  %v1878_v50 = vld [vmem:[%s13551_s3 + $0x828] sm:$0xff]  ;;  %v1729_v33 = vld [vmem:[%s13551_s3 + $0x380] sm:$0xff] }
 0x206   : > { %v1726_v46 = vld [vmem:[%s13551_s3 + $0x368] sm:$0xff] }
 0x207   : > { %v1306_v30 = vadd.f32 %v1278_v18, %v1186_v27  ;;  %v1383_v55 = vpop.permute.xlu1 %1382  ;;  %8060 = vmatprep.subr.bf16.mxu0 %v8059_v13  ;;  %v1839_v27 = vld [vmem:[%s13551_s3 + $0x6f0] sm:$0xff]  ;;  %v1842_v18 = vld [vmem:[%s13551_s3 + $0x708] sm:$0xff]  ;;  %v8087_v13 = vpack.c.bf16 %v1867_v34, %v1864_v48  ;;  %v8101_v48 = vpack.c.bf16 %v1884_v0, %v1881_v7 }
 0x208   : > { %v1398_v36 = vsel %vm1384_vm7, %v1381_v5, %v1383_v55  ;;  %v10579_v6 = vpop.permute.xlu0 %1595  ;;  %8062 = vmatpush1.bf16.msra.mxu0 %v8061_v56  ;;  %v8063_v5 = vpack.c.bf16 %v1831_v59, %v1828_v9  ;;  %v1846_v55 = vld [vmem:[%s13551_s3 + $0x728] sm:$0xff]  ;;  %vm6797_vm7 = vcmask 64512  }
 0x209   : > { %v10545_v37 = vadd.f32 %v1398_v36, %v1306_v30  ;;  %1600 = vperm.xlu0 %8952, %v1592_v62   ;;  %v8073_v30 = vpack.c.bf16 %v1842_v18, %v1839_v27  ;;  %v1849_v36 = vld [vmem:[%s13551_s3 + $0x740] sm:$0xff]  ;;  %v1870_v59 = vld [vmem:[%s13551_s3 + $0x7e8] sm:$0xff]  ;;  %v1720_v27 = vld [vmem:[%s13551_s3 + $0x338] sm:$0xff] }
 0x20a   : > { %8064 = vmatprep.subr.bf16.mxu0 %v8063_v5  ;;  %v8075_v53 = vpack.c.bf16 %v1849_v36, %v1846_v55  ;;  %v1869_v5 = vld [vmem:[%s13551_s3 + $0x7e0] sm:$0xff] }
 0x20b   : > { %1467 = vrot.lane.b32.xlu1 %v10545_v37, %s13652_s30 }
 0x20c   : > { %8066 = vmatpush1.bf16.msra.mxu0 %v8065_v25  ;;  %v1872_v25 = vld [vmem:[%s13551_s3 + $0x7f8] sm:$0xff] }
 0x20d   : > { %8068 = vmatprep.subr.bf16.mxu0 %v8067_v45  ;;  %v1875_v45 = vld [vmem:[%s13551_s3 + $0x810] sm:$0xff] }
 0x20e   : > { %v8097_v18 = vpack.c.bf16 %v1878_v50, %v1875_v45  ;;  %v1897_v45 = vld [vmem:[%s13551_s3 + $0x8c0] sm:$0xff] }
 0x20f   : > { %v1893_v50 = vld [vmem:[%s13551_s3 + $0x8a0] sm:$0xff] }
 0x210   : > { %8070 = vmatpush1.bf16.msra.mxu0 %v8069_v47 }
 0x241   : > { %v1458_v43 = vpop.permute.xlu1 %1457 }
 0x245   : > { %v1460_v14 = vpop.permute.xlu0 %1459  ;;  %v10599_v41 = vpop.permute.xlu1 %1461 }
 0x246   : > { %v1476_v31 = vsel %vm581_vm0, %v1458_v43, %v1460_v14  ;;  %v1477_v38 = vsel %vm581_vm0, %v1460_v14, %v10599_v41  ;;  %v8091_v14 = vpack.c.bf16 %v1873_v26, %v1870_v59  ;;  %v1728_v59 = vld [vmem:[%s13551_s3 + $0x378] sm:$0xff] }
 0x247   : > { %v10611_v57 = vmax.f32 %v10251_v16, %v1476_v31  ;;  %v10614_v49 = vmax.f32 %v10288_v63, %v1477_v38  ;;  %v1840_v16 = vld [vmem:[%s13551_s3 + $0x6f8] sm:$0xff]  ;;  %v1843_v63 = vld [vmem:[%s13551_s3 + $0x710] sm:$0xff]  ;;  %v8093_v38 = vpack.c.bf16 %v1872_v25, %v1869_v5 }
 0x248   : > { %v8071_v17 = vpack.c.bf16 %v1843_v63, %v1840_v16  ;;  %v1716_v16 = vld [vmem:[%s13551_s3 + $0x318] sm:$0xff]  ;;  %v8095_v63 = vpack.c.bf16 %v1879_v35, %v1876_v22  ;;  %v1735_v5 = vld [vmem:[%s13551_s3 + $0x3b0] sm:$0xff] }
 0x249   : > { %v1456_v4 = vpop.permute.xlu0 %1455  ;;  %1539 = vrot.lane.b32.xlu1 %v10611_v57, %s13669_s21  ;;  %1541 = vrot.lane.b32.xlu0 %v10614_v49, %s13669_s21  ;;  %v1732_v26 = vld [vmem:[%s13551_s3 + $0x398] sm:$0xff]  ;;  %v1731_v25 = vld [vmem:[%s13551_s3 + $0x390] sm:$0xff] }
 0x24a   : > { %v1475_v23 = vsel %vm581_vm0, %v1456_v4, %v1458_v43  ;;  %8072 = vmatprep.subr.bf16.mxu0 %v8071_v17  ;;  %v1863_v43 = vld [vmem:[%s13551_s3 + $0x7b0] sm:$0xff]  ;;  %v1713_v4 = vld [vmem:[%s13551_s3 + $0x300] sm:$0xff]  ;;  %v7999_v35 = vpack.c.bf16 %v1735_v5, %v1732_v26  ;;  %v1758_v26 = vld [vmem:[%s13551_s3 + $0x468] sm:$0xff] }
 0x24b   : > { %v10640_v62 = vmax.f32 %v10311_v21, %v1475_v23  ;;  %v1845_v21 = vld [vmem:[%s13551_s3 + $0x720] sm:$0xff]  ;;  %8074 = vmatpush1.bf16.msra.mxu0 %v8073_v30  ;;  %v8089_v58 = vpack.c.bf16 %v1866_v3, %v1863_v43  ;;  %v13673_v30 = vld [vmem:[#allocation25_spill] sm:$0xff] }
 0x24c   : > { %v8077_v32 = vpack.c.bf16 %v1848_v52, %v1845_v21  ;;  %8076 = vmatprep.subr.bf16.mxu0 %v8075_v53  ;;  %v1723_v53 = vld [vmem:[%s13551_s3 + $0x350] sm:$0xff]  ;;  %v1885_v21 = vld [vmem:[%s13551_s3 + $0x860] sm:$0xff]  ;;  %v7989_v52 = vpack.c.bf16 %v1716_v16, %v1713_v4  ;;  %v1738_v4 = vld [vmem:[%s13551_s3 + $0x3c8] sm:$0xff] }
 0x24d   : > { %1537 = vrot.lane.b32.xlu1 %v10640_v62, %s13669_s21  ;;  %v1887_v43 = vld [vmem:[%s13551_s3 + $0x870] sm:$0xff]  ;;  %v1741_v16 = vld [vmem:[%s13551_s3 + $0x3e0] sm:$0xff] }
 0x24f   : > { %8078 = vmatpush1.bf16.msra.mxu0 %v8077_v32 }
 0x250   : > { %8080 = vmatprep.subr.bf16.mxu0 %v8079_v44 }
 0x253   : > { %8082 = vmatpush1.bf16.msra.mxu0 %v8081_v15 }
 0x254   : > { %8084 = vmatprep.subr.bf16.mxu0 %v8083_v11  ;;  %v7991_v11 = vpack.c.bf16 %v1723_v53, %v1720_v27  ;;  %v1903_v53 = vld [vmem:[%s13551_s3 + $0x8f0] sm:$0xff] }
 0x257   : > { %8086 = vmatpush1.bf16.msra.mxu0 %v8085_v60 }
 0x258   : > { %8088 = vmatprep.subr.bf16.mxu0 %v8087_v13  ;;  %v1891_v13 = vld [vmem:[%s13551_s3 + $0x890] sm:$0xff] }
 0x25b   : > { %8090 = vmatpush1.bf16.msra.mxu0 %v8089_v58  ;;  %v7995_v58 = vpack.c.bf16 %v1729_v33, %v1726_v46  ;;  %v1746_v46 = vld [vmem:[%s13551_s3 + $0x408] sm:$0xff] }
 0x25c   : > { %8092 = vmatprep.subr.bf16.mxu0 %v8091_v14 }
 0x25f   : > { %8094 = vmatpush1.bf16.msra.mxu0 %v8093_v38  ;;  %v1894_v38 = vld [vmem:[%s13551_s3 + $0x8a8] sm:$0xff] }
 0x260   : > { %8096 = vmatprep.subr.bf16.mxu0 %v8095_v63  ;;  %v8107_v63 = vpack.c.bf16 %v1897_v45, %v1894_v38  ;;  %v1764_v38 = vld [vmem:[%s13551_s3 + $0x498] sm:$0xff] }
 0x261   : > { %v10692_v56 = vpop.permute.xlu0 %1527  ;;  %v1526_v9 = vpop.permute.xlu1 %1525 }
 0x262   : > { %v1552_v12 = vsel %vm801_vm2, %v1526_v9, %v10692_v56 }
 0x263   : > { %v1578_v31 = vmax.f32 %v10449_v39, %v1552_v12  ;;  %8098 = vmatpush1.bf16.msra.mxu0 %v8097_v18  ;;  %v1737_v18 = vld [vmem:[%s13551_s3 + $0x3c0] sm:$0xff] }
 0x265   : > { %v1450_v51 = vpop.permute.xlu0 %1449  ;;  %v1524_v39 = vpop.permute.xlu1 %1523  ;;  %v10722_v47 = vadd.f32 %v10579_v6, %v1578_v31  ;;  %v1734_v31 = vld [vmem:[%s13551_s3 + $0x3a8] sm:$0xff] }
 0x266   : > { %v1472_v23 = vsel %vm581_vm0, %v10361_v24, %v1450_v51  ;;  %v1551_v17 = vsel %vm801_vm2, %v1524_v39, %v1526_v9  ;;  %v1882_v24 = vld [vmem:[%s13551_s3 + $0x848] sm:$0xff]  ;;  %v1725_v9 = vld [vmem:[%s13551_s3 + $0x360] sm:$0xff]  ;;  %v8001_v27 = vpack.c.bf16 %v1734_v31, %v1731_v25 }
 0x267   : > { %v10737_v55 = vmax.f32 %v13673_v30, %v1472_v23  ;;  %v1577_v36 = vmax.f32 %v10484_v1, %v1551_v17  ;;  %2004 = vmatprep.mubr.f32.mxu1 %v10722_v47  ;;  %v1719_v1 = vld [vmem:[%s13551_s3 + $0x330] sm:$0xff]  ;;  %v8099_v10 = vpack.c.bf16 %v1885_v21, %v1882_v24  ;;  %v7997_v14 = vpack.c.bf16 %v1728_v59, %v1725_v9  ;;  %v1740_v30 = vld [vmem:[%s13551_s3 + $0x3d8] sm:$0xff] }
 0x268   : > { %v1899_v24 = vld [vmem:[%s13551_s3 + $0x8d0] sm:$0xff]  ;;  %v1744_v21 = vld [vmem:[%s13551_s3 + $0x3f8] sm:$0xff]  ;;  %v8005_v0 = vpack.c.bf16 %v1740_v30, %v1737_v18 }
 0x269   : > { %v1464_v40 = vpop.permute.xlu0 %1463  ;;  %1529 = vrot.lane.b32.xlu0 %v10737_v55, %s13669_s21  ;;  %v10755_v32 = vpop.permute.xlu1 %1451  ;;  %v10758_v44 = vadd.f32 %v10579_v6, %v1577_v36  ;;  %8100 = vmatprep.subr.bf16.mxu0 %v8099_v10  ;;  %v8003_v36 = vpack.c.bf16 %v1741_v16, %v1738_v4  ;;  %v1902_v10 = vld [vmem:[%s13551_s3 + $0x8e8] sm:$0xff]  ;;  %v1755_v59 = vld [vmem:[%s13551_s3 + $0x450] sm:$0xff]  ;;  %v1777_v16 = vld [vmem:[%s13551_s3 + $0x500] sm:$0xff] }
 0x26a   : > { %v1478_v19 = vsel %vm581_vm0, %v10599_v41, %v1464_v40  ;;  %v1473_v15 = vsel %vm581_vm0, %v1450_v51, %v10755_v32  ;;  %v1888_v41 = vld [vmem:[%s13551_s3 + $0x878] sm:$0xff]  ;;  %8102 = vmatpush1.bf16.msra.mxu0 %v8101_v48  ;;  %v8017_v25 = vpack.c.bf16 %v1758_v26, %v1755_v59  ;;  %v1774_v4 = vld [vmem:[%s13551_s3 + $0x4e8] sm:$0xff]  ;;  %v1803_v59 = vld [vmem:[%s13551_s3 + $0x5d0] sm:$0xff] }
 0x26b   : > { %v10780_v34 = vmax.f32 %v10290_v20, %v1478_v19  ;;  %v10783_v60 = vmax.f32 %v10481_v2, %v1473_v15  ;;  %2005 = vmatmul.mubr.f32.vlgmr.msra.gmra.mrb[0].mxu1 %v10758_v44  ;;  %v7993_v20 = vpack.c.bf16 %v1722_v8, %v1719_v1  ;;  %v8103_v3 = vpack.c.bf16 %v1891_v13, %v1888_v41  ;;  %v1890_v2 = vld [vmem:[%s13551_s3 + $0x888] sm:$0xff]  ;;  %v1896_v51 = vld [vmem:[%s13551_s3 + $0x8b8] sm:$0xff] }
 0x26c   : > { %7990 = vmatpush1.bf16.msra.mxu1 %v7989_v52  ;;  %v8105_v12 = vpack.c.bf16 %v1890_v2, %v1887_v43  ;;  %v8109_v23 = vpack.c.bf16 %v1896_v51, %v1893_v50  ;;  %v1747_v52 = vld [vmem:[%s13551_s3 + $0x410] sm:$0xff]  ;;  %v8113_v8 = vpack.c.bf16 %v1902_v10, %v1899_v24  ;;  %v1749_v43 = vld [vmem:[%s13551_s3 + $0x420] sm:$0xff]  ;;  %v1776_v18 = vld [vmem:[%s13551_s3 + $0x4f8] sm:$0xff] }
 0x26d   : > { %1543 = vrot.lane.b32.xlu0 %v10780_v34, %s13669_s21  ;;  %1531 = vrot.lane.b32.xlu1 %v10783_v60, %s13669_s21  ;;  %v8007_v15 = vpack.c.bf16 %v1747_v52, %v1744_v21  ;;  %v1759_v2 = vld [vmem:[%s13551_s3 + $0x470] sm:$0xff]  ;;  %v1780_v30 = vld [vmem:[%s13551_s3 + $0x518] sm:$0xff] }
 0x26e   : > { %7992 = vmatprep.subr.bf16.mxu1 %v7991_v11  ;;  %8104 = vmatprep.subr.bf16.mxu0 %v8103_v3  ;;  %v1743_v11 = vld [vmem:[%s13551_s3 + $0x3f0] sm:$0xff]  ;;  %v1782_v21 = vld [vmem:[%s13551_s3 + $0x528] sm:$0xff] }
 0x26f   : > { %8106 = vmatpush1.bf16.msra.mxu0 %v8105_v12  ;;  %v8009_v48 = vpack.c.bf16 %v1746_v46, %v1743_v11  ;;  %v1762_v12 = vld [vmem:[%s13551_s3 + $0x488] sm:$0xff]  ;;  %v1767_v51 = vld [vmem:[%s13551_s3 + $0x4b0] sm:$0xff] }
 0x270   : > { %7994 = vmatpush1.bf16.msra.mxu1 %v7993_v20  ;;  %8108 = vmatprep.subr.bf16.mxu0 %v8107_v63  ;;  %v1752_v20 = vld [vmem:[%s13551_s3 + $0x438] sm:$0xff]  ;;  %v1779_v24 = vld [vmem:[%s13551_s3 + $0x510] sm:$0xff]  ;;  %v1786_v52 = vld [vmem:[%s13551_s3 + $0x548] sm:$0xff] }
 0x271   : > { %v1466_v22 = vpop.permute.xlu1 %1465  ;;  %7996 = vmatprep.subr.bf16.mxu1 %v7995_v58  ;;  %v8013_v9 = vpack.c.bf16 %v1752_v20, %v1749_v43  ;;  %v8033_v10 = vpack.c.bf16 %v1782_v21, %v1779_v24  ;;  %v1797_v20 = vld [vmem:[%s13551_s3 + $0x5a0] sm:$0xff]  ;;  %v1806_v26 = vld [vmem:[%s13551_s3 + $0x5e8] sm:$0xff] }
 0x272   : > { %v1479_v39 = vsel %vm581_vm0, %v1464_v40, %v1466_v22 }
 0x273   : > { %v10840_v17 = vmax.f32 %v10503_v42, %v1479_v39  ;;  %v1900_v42 = vld [vmem:[%s13551_s3 + $0x8d8] sm:$0xff]  ;;  %8110 = vmatpush1.bf16.msra.mxu0 %v8109_v23  ;;  %v1770_v39 = vld [vmem:[%s13551_s3 + $0x4c8] sm:$0xff]  ;;  %v8027_v23 = vpack.c.bf16 %v1777_v16, %v1774_v4 }
 0x274   : > { %7998 = vmatpush1.bf16.msra.mxu1 %v7997_v14  ;;  %v8111_v1 = vpack.c.bf16 %v1903_v53, %v1900_v42  ;;  %v1765_v14 = vld [vmem:[%s13551_s3 + $0x4a0] sm:$0xff]  ;;  %v8025_v63 = vpack.c.bf16 %v1770_v39, %v1767_v51 }
 0x275   : > { %1545 = vrot.lane.b32.xlu1 %v10840_v17, %s13669_s21  ;;  %8000 = vmatprep.subr.bf16.mxu1 %v7999_v35  ;;  %v8019_v31 = vpack.c.bf16 %v1765_v14, %v1762_v12  ;;  %v1771_v35 = vld [vmem:[%s13551_s3 + $0x4d0] sm:$0xff]  ;;  %v1906_v12 = vld [vmem:[%s13551_s3 + $0x908] sm:$0xff]  ;;  %v1909_v14 = vld [vmem:[%s13551_s3 + $0x920] sm:$0xff] }
 0x276   : > { %8112 = vmatprep.subr.bf16.mxu0 %v8111_v1  ;;  %v1789_v1 = vld [vmem:[%s13551_s3 + $0x560] sm:$0xff] }
 0x277   : > { %v1454_v40 = vpop.permute.xlu0 %1453  ;;  %8114 = vmatpush1.bf16.msra.mxu0 %v8113_v8  ;;  %v1785_v8 = vld [vmem:[%s13551_s3 + $0x540] sm:$0xff] }
 0x278   : > { %v10869_v7 = vmax.f32 %v10529_v61, %v1454_v40  ;;  %8002 = vmatpush1.bf16.msra.mxu1 %v8001_v27  ;;  %v1474_v19 = vsel %vm581_vm0, %v10755_v32, %v1454_v40  ;;  %v1750_v61 = vld [vmem:[%s13551_s3 + $0x428] sm:$0xff]  ;;  %v1753_v32 = vld [vmem:[%s13551_s3 + $0x440] sm:$0xff]  ;;  %v8035_v40 = vpack.c.bf16 %v1789_v1, %v1786_v52 }
 0x279   : > { %8004 = vmatprep.subr.bf16.mxu1 %v8003_v36  ;;  %v10888_v33 = vmax.f32 %v10501_v28, %v1474_v19  ;;  %v8011_v13 = vpack.c.bf16 %v1753_v32, %v1750_v61  ;;  %v1756_v28 = vld [vmem:[%s13551_s3 + $0x458] sm:$0xff]  ;;  %v1773_v27 = vld [vmem:[%s13551_s3 + $0x4e0] sm:$0xff]  ;;  %v1783_v36 = vld [vmem:[%s13551_s3 + $0x530] sm:$0xff] }
 0x27a   : > { %1535 = vrot.lane.b32.xlu0 %v10869_v7, %s13669_s21  ;;  %v8029_v42 = vpack.c.bf16 %v1776_v18, %v1773_v27  ;;  %v8031_v53 = vpack.c.bf16 %v1783_v36, %v1780_v30  ;;  %v1792_v19 = vld [vmem:[%s13551_s3 + $0x578] sm:$0xff]  ;;  %v1791_v61 = vld [vmem:[%s13551_s3 + $0x570] sm:$0xff]  ;;  %v1794_v32 = vld [vmem:[%s13551_s3 + $0x588] sm:$0xff] }
 0x27b   : > { %v1908_v30 = vld [vmem:[%s13551_s3 + $0x918] sm:$0xff]  ;;  %v1914_v1 = vld [vmem:[%s13551_s3 + $0x948] sm:$0xff] }
 0x27c   : > { %8006 = vmatpush1.bf16.msra.mxu1 %v8005_v0  ;;  %v1788_v0 = vld [vmem:[%s13551_s3 + $0x558] sm:$0xff] }
 0x27d   : > { %v1468_v41 = vpop.permute.xlu1 %1467  ;;  %8008 = vmatprep.subr.bf16.mxu1 %v8007_v15  ;;  %v1795_v15 = vld [vmem:[%s13551_s3 + $0x590] sm:$0xff]  ;;  %v8037_v11 = vpack.c.bf16 %v1788_v0, %v1785_v8  ;;  %v1921_v8 = vld [vmem:[%s13551_s3 + $0x980] sm:$0x1] }
 0x27e   : > { %v10897_v3 = vmax.f32 %v10545_v37, %v1468_v41  ;;  %1533 = vrot.lane.b32.xlu0 %v10888_v33, %s13669_s21  ;;  %v1480_v58 = vsel %vm581_vm0, %v1466_v22, %v1468_v41  ;;  %v8015_v37 = vpack.c.bf16 %v1759_v2, %v1756_v28  ;;  %v1768_v22 = vld [vmem:[%s13551_s3 + $0x4b8] sm:$0xff]  ;;  %v8039_v46 = vpack.c.bf16 %v1795_v15, %v1792_v19  ;;  %v1801_v41 = vld [vmem:[%s13551_s3 + $0x5c0] sm:$0xff] }
 0x27f   : > { %v10917_v5 = vmax.f32 %v10517_v29, %v1480_v58  ;;  %v1761_v29 = vld [vmem:[%s13551_s3 + $0x480] sm:$0xff]  ;;  %v8023_v50 = vpack.c.bf16 %v1771_v35, %v1768_v22  ;;  %v1800_v28 = vld [vmem:[%s13551_s3 + $0x5b8] sm:$0xff]  ;;  %v1807_v58 = vld [vmem:[%s13551_s3 + $0x5f0] sm:$0xff] }
 0x280   : > { %1549 = vrot.lane.b32.xlu1 %v10897_v3, %s13669_s21  ;;  %8010 = vmatpush1.bf16.msra.mxu1 %v8009_v48  ;;  %v8021_v45 = vpack.c.bf16 %v1764_v38, %v1761_v29  ;;  %v1798_v48 = vld [vmem:[%s13551_s3 + $0x5a8] sm:$0xff]  ;;  %v1804_v2 = vld [vmem:[%s13551_s3 + $0x5d8] sm:$0xff] }
 0x281   : > { %8012 = vmatprep.subr.bf16.mxu1 %v8011_v13  ;;  %v8041_v13 = vpack.c.bf16 %v1794_v32, %v1791_v61  ;;  %v8043_v43 = vpack.c.bf16 %v1801_v41, %v1798_v48  ;;  %v1917_v61 = vld [vmem:[%s13551_s3 + $0x960] sm:$0xff]  ;;  %v1920_v32 = vld [vmem:[%s13551_s3 + $0x978] sm:$0x1]  ;;  %v1667_v41 = vld [vmem:[%s13551_s3 + $0x190] sm:$0xff] }
 0x284   : > { %1547 = vrot.lane.b32.xlu1 %v10917_v5, %s13669_s21  ;;  %8014 = vmatpush1.bf16.msra.mxu1 %v8013_v9  ;;  %v8045_v9 = vpack.c.bf16 %v1800_v28, %v1797_v20  ;;  %s9123_s21 = smov 94  }
 0x285   : > { %8016 = vmatprep.subr.bf16.mxu1 %v8015_v37  ;;  %v8047_v37 = vpack.c.bf16 %v1807_v58, %v1804_v2  ;;  %v1619_v58 = vld [vmem:[%s13551_s3 + $0x10] sm:$0xff] }
 0x288   : > { %8018 = vmatpush1.bf16.msra.mxu1 %v8017_v25  ;;  %v8049_v25 = vpack.c.bf16 %v1806_v26, %v1803_v59  ;;  %v11023_v29 = vpop.permute.xlu0 %1600  ;;  %v1673_v59 = vld [vmem:[%s13551_s3 + $0x1c0] sm:$0xff]  ;;  %v1676_v26 = vld [vmem:[%s13551_s3 + $0x1d8] sm:$0xff] }
 0x289   : > { %8020 = vmatprep.subr.bf16.mxu1 %v8019_v31  ;;  %v8115_v31 = vpack.c.bf16 %v1909_v14, %v1906_v12  ;;  %v9118_v14 = vmov 0.0  }
 0x28c   : > { %8022 = vmatpush1.bf16.msra.mxu1 %v8021_v45 }
 0x28d   : > { %8024 = vmatprep.subr.bf16.mxu1 %v8023_v50 }
 0x290   : > { %8026 = vmatpush1.bf16.msra.mxu1 %v8025_v63 }
 0x291   : > { %8028 = vmatprep.subr.bf16.mxu1 %v8027_v23 }
 0x294   : > { %8030 = vmatpush1.bf16.msra.mxu1 %v8029_v42  ;;  %v1912_v42 = vld [vmem:[%s13551_s3 + $0x938] sm:$0xff] }
 0x295   : > { %8032 = vmatprep.subr.bf16.mxu1 %v8031_v53 }
 0x298   : > { %8034 = vmatpush1.bf16.msra.mxu1 %v8033_v10 }
 0x299   : > { %8036 = vmatprep.subr.bf16.mxu1 %v8035_v40  ;;  %v1918_v40 = vld [vmem:[%s13551_s3 + $0x968] sm:$0xff] }
 0x29c   : > { %8038 = vmatpush1.bf16.msra.mxu1 %v8037_v11 }
 0x29d   : > { %8040 = vmatprep.subr.bf16.mxu1 %v8039_v46  ;;  %v8123_v46 = vpack.c.bf16 %v1921_v8, %v1918_v40  ;;  %v1640_v40 = vld [vmem:[%s13551_s3 + $0xb8] sm:$0xff] }
 0x2a0   : > { %8042 = vmatpush1.bf16.msra.mxu1 %v8041_v13  ;;  %v1670_v13 = vld [vmem:[%s13551_s3 + $0x1a8] sm:$0xff] }
 0x2a1   : > { %8044 = vmatprep.subr.bf16.mxu1 %v8043_v43  ;;  %v8129_v2 = vpack.c.bf16 %v1670_v13, %v1667_v41  ;;  %v1652_v41 = vld [vmem:[%s13551_s3 + $0x118] sm:$0xff]  ;;  %v1703_v13 = vld [vmem:[%s13551_s3 + $0x2b0] sm:$0xff] }
 0x2a4   : > { %8046 = vmatpush1.bf16.msra.mxu1 %v8045_v9  ;;  %v1622_v9 = vld [vmem:[%s13551_s3 + $0x28] sm:$0xff] }
 0x2a5   : > { %8048 = vmatprep.subr.bf16.mxu1 %v8047_v37 }
 0x2a8   : > { %8050 = vmatpush1.bf16.msra.mxu1 %v8049_v25 }
 0x2a9   : > { %8116 = vmatprep.subr.bf16.mxu1 %v8115_v31  ;;  %v8133_v31 = vpack.c.bf16 %v1676_v26, %v1673_v59  ;;  %v1712_v59 = vld [vmem:[%s13551_s3 + $0x2f8] sm:$0xff] }
 0x2bb   : > { %v1542_v38 = vpop.permute.xlu0 %1541  ;;  %v1540_v22 = vpop.permute.xlu1 %1539 }
 0x2bc   : > { %v1558_v35 = vsel %vm801_vm2, %v1540_v22, %v1542_v38 }
 0x2bd   : > { %v1585_v45 = vmax.f32 %v10611_v57, %v1558_v35 }
 0x2bf   : > { %v1538_v50 = vpop.permute.xlu1 %1537  ;;  %v11028_v51 = vadd.f32 %v11023_v29, %v1585_v45 }
 0x2c0   : > { %v1557_v39 = vsel %vm801_vm2, %v1538_v50, %v1540_v22  ;;  %v1628_v22 = vld [vmem:[%s13551_s3 + $0x58] sm:$0xff]  ;;  %v1679_v50 = vld [vmem:[%s13551_s3 + $0x1f0] sm:$0xff] }
 0x2c1   : > { %v1584_v4 = vmax.f32 %v10640_v62, %v1557_v39  ;;  %2010 = vmatprep.mubr.f32.mxu1 %v11028_v51  ;;  %v1905_v62 = vld [vmem:[%s13551_s3 + $0x900] sm:$0xff]  ;;  %v1682_v39 = vld [vmem:[%s13551_s3 + $0x208] sm:$0xff] }
 0x2c2   : > { %v8117_v24 = vpack.c.bf16 %v1908_v30, %v1905_v62  ;;  %v1634_v30 = vld [vmem:[%s13551_s3 + $0x88] sm:$0xff] }
 0x2c3   : > { %v11034_v16 = vadd.f32 %v11023_v29, %v1584_v4 }
 0x2c5   : > { %2011 = vmatmul.mubr.f32.gmra.mrb[2].mxu1 %v11034_v16 }
 0x2db   : > { %v1530_v63 = vpop.permute.xlu0 %1529 }
 0x2dc   : > { %v1553_v23 = vsel %vm801_vm2, %v10692_v56, %v1530_v63 }
 0x2dd   : > { %v1579_v27 = vmax.f32 %v10452_v54, %v1553_v23  ;;  %v1915_v54 = vld [vmem:[%s13551_s3 + $0x950] sm:$0xff] }
 0x2de   : > { %v8119_v52 = vpack.c.bf16 %v1915_v54, %v1912_v42 }
 0x2df   : > { %v1532_v57 = vpop.permute.xlu1 %1531  ;;  %v1544_v56 = vpop.permute.xlu0 %1543  ;;  %v11058_v21 = vadd.f32 %v10579_v6, %v1579_v27 }
 0x2e0   : > { %v1554_v18 = vsel %vm801_vm2, %v1530_v63, %v1532_v57  ;;  %v1559_v10 = vsel %vm801_vm2, %v1542_v38, %v1544_v56  ;;  %v1625_v38 = vld [vmem:[%s13551_s3 + $0x40] sm:$0xff] }
 0x2e1   : > { %v1580_v36 = vmax.f32 %v10737_v55, %v1554_v18  ;;  %v1911_v55 = vld [vmem:[%s13551_s3 + $0x930] sm:$0xff]  ;;  %v1586_v15 = vmax.f32 %v10614_v49, %v1559_v10  ;;  %v8135_v27 = vpack.c.bf16 %v1628_v22, %v1625_v38  ;;  %v1637_v10 = vld [vmem:[%s13551_s3 + $0xa0] sm:$0xff]  ;;  %v1766_v22 = vld [vmem:[%s13551_s3 + $0x4a8] sm:$0xff] }
 0x2e2   : > { %v8121_v19 = vpack.c.bf16 %v1914_v1, %v1911_v55  ;;  %v1763_v38 = vld [vmem:[%s13551_s3 + $0x490] sm:$0xff] }
 0x2e3   : > { %v11055_v53 = vadd.f32 %v10579_v6, %v1580_v36  ;;  %v11105_v28 = vadd.f32 %v11023_v29, %v1586_v15  ;;  %v1685_v36 = vld [vmem:[%s13551_s3 + $0x220] sm:$0xff]  ;;  %v1643_v15 = vld [vmem:[%s13551_s3 + $0xd0] sm:$0xff] }
 0x2e5   : > { %2081 = vmatprep.mubr.f32.mxu1 %v11055_v53 }
 0x2e6   : > { %2082 = vmatmul.mubr.f32.vlgmr.msra.gmra.mrb[0].mxu1 %v11058_v21 }
 0x2e7   : > { %8118 = vmatpush1.bf16.msra.mxu1 %v8117_v24  ;;  %v11075_v0 = vpop.permute.xlu1 %1545 }
 0x2e8   : > { %v1560_v11 = vsel %vm801_vm2, %v1544_v56, %v11075_v0  ;;  %8120 = vmatprep.subr.bf16.mxu1 %v8119_v52 }
 0x2e9   : > { %v1587_v48 = vmax.f32 %v10780_v34, %v1560_v11  ;;  %v8126_v34 = vpack.c.bf16 %v1920_v32, %v1917_v61  ;;  %v1646_v11 = vld [vmem:[%s13551_s3 + $0xe8] sm:$0xff] }
 0x2ea   : > { %v8147_v61 = vpack.c.bf16 %v1646_v11, %v1643_v15  ;;  %v1745_v11 = vld [vmem:[%s13551_s3 + $0x400] sm:$0xff] }
 0x2eb   : > { %8122 = vmatpush1.bf16.msra.mxu1 %v8121_v19  ;;  %v11100_v43 = vadd.f32 %v11023_v29, %v1587_v48  ;;  %v8143_v19 = vpack.c.bf16 %v1640_v40, %v1637_v10  ;;  %v1649_v48 = vld [vmem:[%s13551_s3 + $0x100] sm:$0xff]  ;;  %v1739_v40 = vld [vmem:[%s13551_s3 + $0x3d0] sm:$0xff] }
 0x2ec   : > { %v1536_v20 = vpop.permute.xlu0 %1535  ;;  %8125 = vmatprep.subr.msk.bf16.mxu1 %vm11089_vm10, %v8123_v46  ;;  %v1700_v46 = vld [vmem:[%s13551_s3 + $0x298] sm:$0xff] }
 0x2ed   : > { %v1583_v37 = vmax.f32 %v10869_v7, %v1536_v20  ;;  %2087 = vmatprep.mubr.f32.mxu1 %v11100_v43  ;;  %v8131_v7 = vpack.c.bf16 %v1622_v9, %v1619_v58  ;;  %v1655_v58 = vld [vmem:[%s13551_s3 + $0x130] sm:$0xff]  ;;  %v1658_v9 = vld [vmem:[%s13551_s3 + $0x148] sm:$0xff] }
 0x2ee   : > { %2088 = vmatmul.mubr.f32.gmra.mrb[2].mxu1 %v11105_v28  ;;  %v8155_v26 = vpack.c.bf16 %v1658_v9, %v1655_v58  ;;  %v1757_v9 = vld [vmem:[%s13551_s3 + $0x460] sm:$0xff] }
 0x2ef   : > { %v11123_v12 = vadd.f32 %v10579_v6, %v1583_v37  ;;  %8128 = vmatpush1.bf16.msk.msra.mxu1 %vm11089_vm10, %v8126_v34  ;;  %2235 = vmatprep.mubr.f32.mxu1 %v9118_v14  ;;  %v1706_v34 = vld [vmem:[%s13551_s3 + $0x2c8] sm:$0xff]  ;;  %v1709_v37 = vld [vmem:[%s13551_s3 + $0x2e0] sm:$0xff] }
 0x2f0   : > { %v1534_v25 = vpop.permute.xlu0 %1533  ;;  %8130 = vmatprep.subr.bf16.mxu1 %v8129_v2  ;;  %v8153_v2 = vpack.c.bf16 %v1706_v34, %v1703_v13  ;;  %v1754_v13 = vld [vmem:[%s13551_s3 + $0x448] sm:$0xff]  ;;  %v1805_v34 = vld [vmem:[%s13551_s3 + $0x5e0] sm:$0xff] }
 0x2f1   : > { %v1555_v35 = vsel %vm801_vm2, %v1532_v57, %v1534_v25  ;;  %v1556_v45 = vsel %vm801_vm2, %v1534_v25, %v1536_v20  ;;  %v8151_v20 = vpack.c.bf16 %v1652_v41, %v1649_v48  ;;  %v1661_v25 = vld [vmem:[%s13551_s3 + $0x160] sm:$0xff]  ;;  %v1751_v41 = vld [vmem:[%s13551_s3 + $0x430] sm:$0xff] }
 0x2f2   : > { %v1581_v4 = vmax.f32 %v10783_v60, %v1555_v35  ;;  %v1582_v63 = vmax.f32 %v10888_v33, %v1556_v45  ;;  %7126 = vmatmul.mubr.msk.f32.vlgmr.msra.gmra.mrb[4].mxu1 %vm1923_vm11, %v11123_v12  ;;  %v1550_v23 = vpop.permute.xlu1 %1549  ;;  %v8137_v60 = vpack.c.bf16 %v1682_v39, %v1679_v50  ;;  %v1631_v33 = vld [vmem:[%s13551_s3 + $0x70] sm:$0xff]  ;;  %v8161_v45 = vpack.c.bf16 %v1766_v22, %v1763_v38  ;;  %v1718_v39 = vld [vmem:[%s13551_s3 + $0x328] sm:$0xff]  ;;  %v1865_v22 = vld [vmem:[%s13551_s3 + $0x7c0] sm:$0xff] }
 0x2f3   : > { %8132 = vmatpush3.bf16.msra.mxu1 %v8131_v7  ;;  %v1590_v57 = vmax.f32 %v10897_v3, %v1550_v23  ;;  %2241 = vmatprep.mubr.f32.mxu1 %v9118_v14  ;;  %v8139_v24 = vpack.c.bf16 %v1634_v30, %v1631_v33  ;;  %v8157_v7 = vpack.c.bf16 %v1712_v59, %v1709_v37  ;;  %v1715_v50 = vld [vmem:[%s13551_s3 + $0x310] sm:$0xff]  ;;  %v1778_v30 = vld [vmem:[%s13551_s3 + $0x508] sm:$0xff]  ;;  %v1760_v37 = vld [vmem:[%s13551_s3 + $0x478] sm:$0xff] }
 0x2f4   : > { %8134 = vmatprep.subr.bf16.mxu1 %v8133_v31  ;;  %v11149_v18 = vadd.f32 %v10579_v6, %v1582_v63  ;;  %v11152_v62 = vadd.f32 %v10579_v6, %v1581_v4  ;;  %v1688_v6 = vld [vmem:[%s13551_s3 + $0x238] sm:$0xff]  ;;  %v1769_v4 = vld [vmem:[%s13551_s3 + $0x4c0] sm:$0xff]  ;;  %v1775_v33 = vld [vmem:[%s13551_s3 + $0x4f0] sm:$0xff] }
 0x2f5   : > { %v11161_v3 = vadd.f32 %v11023_v29, %v1590_v57  ;;  %v8141_v1 = vpack.c.bf16 %v1688_v6, %v1685_v36  ;;  %v1664_v31 = vld [vmem:[%s13551_s3 + $0x178] sm:$0xff]  ;;  %v8169_v6 = vpack.c.bf16 %v1778_v30, %v1775_v33  ;;  %v1859_v59 = vld [vmem:[%s13551_s3 + $0x790] sm:$0xff]  ;;  %v1814_v38 = vld [vmem:[%s13551_s3 + $0x628] sm:$0xff] }
 0x2f6   : > { %2158 = vmatprep.mubr.f32.mxu0 %v11149_v18  ;;  %v1548_v42 = vpop.permute.xlu1 %1547  ;;  %v8159_v35 = vpack.c.bf16 %v1664_v31, %v1661_v25  ;;  %v1772_v63 = vld [vmem:[%s13551_s3 + $0x4d8] sm:$0xff]  ;;  %v1811_v31 = vld [vmem:[%s13551_s3 + $0x610] sm:$0xff]  ;;  %v1826_v33 = vld [vmem:[%s13551_s3 + $0x688] sm:$0xff] }
 0x2f7   : > { %8136 = vmatpush3.bf16.msra.mxu1 %v8135_v27  ;;  %v1561_v54 = vsel %vm801_vm2, %v11075_v0, %v1548_v42  ;;  %v1562_v56 = vsel %vm801_vm2, %v1548_v42, %v1550_v23  ;;  %2159 = vmatmul.mubr.f32.vlgmr.msra.gmra.mrb[0].mxu0 %v11152_v62  ;;  %v8163_v23 = vpack.c.bf16 %v1718_v39, %v1715_v50  ;;  %v1721_v27 = vld [vmem:[%s13551_s3 + $0x340] sm:$0xff]  ;;  %v1727_v42 = vld [vmem:[%s13551_s3 + $0x370] sm:$0xff] }
 0x2f8   : > { %v1588_v52 = vmax.f32 %v10840_v17, %v1561_v54  ;;  %v1589_v55 = vmax.f32 %v10917_v5, %v1562_v56  ;;  %7127 = vmatmul.mubr.msk.f32.gmra.mrb[6].mxu1 %vm1923_vm11, %v11161_v3  ;;  %8138 = vmatprep.subr.bf16.mxu1 %v8137_v60  ;;  %v1691_v17 = vld [vmem:[%s13551_s3 + $0x250] sm:$0xff]  ;;  %v1694_v5 = vld [vmem:[%s13551_s3 + $0x268] sm:$0xff]  ;;  %v8165_v57 = vpack.c.bf16 %v1772_v63, %v1769_v4  ;;  %v1724_v60 = vld [vmem:[%s13551_s3 + $0x358] sm:$0xff] }
 0x2f9   : > { %2312 = vmatprep.mubr.f32.mxu1 %v10722_v47  ;;  %v8145_v47 = vpack.c.bf16 %v1694_v5, %v1691_v17  ;;  %v8167_v36 = vpack.c.bf16 %v1724_v60, %v1721_v27  ;;  %v1730_v54 = vld [vmem:[%s13551_s3 + $0x388] sm:$0xff]  ;;  %v1781_v56 = vld [vmem:[%s13551_s3 + $0x520] sm:$0xff]  ;;  %v1820_v4 = vld [vmem:[%s13551_s3 + $0x658] sm:$0xff] }
 0x2fa   : > { %v11192_v8 = vadd.f32 %v11023_v29, %v1589_v55  ;;  %v11195_v0 = vadd.f32 %v11023_v29, %v1588_v52  ;;  %v1697_v29 = vld [vmem:[%s13551_s3 + $0x280] sm:$0xff]  ;;  %v1736_v55 = vld [vmem:[%s13551_s3 + $0x3b8] sm:$0xff]  ;;  %v1742_v17 = vld [vmem:[%s13551_s3 + $0x3e8] sm:$0xff] }
 0x2fb   : > { %8140 = vmatpush3.bf16.msra.mxu1 %v8139_v24  ;;  %v8149_v32 = vpack.c.bf16 %v1700_v46, %v1697_v29  ;;  %v1733_v52 = vld [vmem:[%s13551_s3 + $0x3a0] sm:$0xff]  ;;  %v1748_v29 = vld [vmem:[%s13551_s3 + $0x418] sm:$0xff]  ;;  %v1799_v46 = vld [vmem:[%s13551_s3 + $0x5b0] sm:$0xff] }
 0x2fc   : > { %2164 = vmatprep.mubr.f32.mxu0 %v11192_v8  ;;  %8142 = vmatprep.subr.bf16.mxu1 %v8141_v1  ;;  %v1787_v1 = vld [vmem:[%s13551_s3 + $0x550] sm:$0xff]  ;;  %v1793_v5 = vld [vmem:[%s13551_s3 + $0x580] sm:$0xff] }
 0x2fd   : > { %2165 = vmatmul.mubr.f32.gmra.mrb[2].mxu0 %v11195_v0  ;;  %v1817_v39 = vld [vmem:[%s13551_s3 + $0x640] sm:$0xff]  ;;  %v1871_v63 = vld [vmem:[%s13551_s3 + $0x7f0] sm:$0xff] }
 0x2fe   : > { %3979 = vmatprep.mubr.f32.mxu0 %v9118_v14  ;;  %v1823_v60 = vld [vmem:[%s13551_s3 + $0x670] sm:$0xff]  ;;  %v1877_v30 = vld [vmem:[%s13551_s3 + $0x820] sm:$0xff] }
 0x2ff   : > { %8144 = vmatpush3.bf16.msra.mxu1 %v8143_v19  ;;  %v1796_v19 = vld [vmem:[%s13551_s3 + $0x598] sm:$0xff] }
 0x300   : > { %8146 = vmatprep.subr.bf16.mxu1 %v8145_v47  ;;  %v8179_v47 = vpack.c.bf16 %v1742_v17, %v1739_v40  ;;  %v8181_v15 = vpack.c.bf16 %v1796_v19, %v1793_v5  ;;  %v1898_v40 = vld [vmem:[%s13551_s3 + $0x8c8] sm:$0xff]  ;;  %v1847_v19 = vld [vmem:[%s13551_s3 + $0x730] sm:$0xff] }
 0x303   : > { %8148 = vmatpush3.bf16.msra.mxu1 %v8147_v61  ;;  %v1802_v61 = vld [vmem:[%s13551_s3 + $0x5c8] sm:$0xff] }
 0x304   : > { %8150 = vmatprep.subr.bf16.mxu1 %v8149_v32  ;;  %v8183_v32 = vpack.c.bf16 %v1748_v29, %v1745_v11  ;;  %v8185_v48 = vpack.c.bf16 %v1802_v61, %v1799_v46  ;;  %v1904_v11 = vld [vmem:[%s13551_s3 + $0x8f8] sm:$0xff]  ;;  %v1853_v61 = vld [vmem:[%s13551_s3 + $0x760] sm:$0xff] }
 0x307   : > { %8152 = vmatpush3.bf16.msra.mxu1 %v8151_v20  ;;  %v1808_v20 = vld [vmem:[%s13551_s3 + $0x5f8] sm:$0xff] }
 0x308   : > { %8154 = vmatprep.subr.bf16.mxu1 %v8153_v2  ;;  %v8187_v2 = vpack.c.bf16 %v1754_v13, %v1751_v41  ;;  %v8189_v58 = vpack.c.bf16 %v1808_v20, %v1805_v34  ;;  %v1910_v41 = vld [vmem:[%s13551_s3 + $0x928] sm:$0xff]  ;;  %v1913_v20 = vld [vmem:[%s13551_s3 + $0x940] sm:$0xff] }
 0x30b   : > { %8156 = vmatpush3.bf16.msra.mxu1 %v8155_v26  ;;  %v1862_v26 = vld [vmem:[%s13551_s3 + $0x7a8] sm:$0xff] }
 0x30c   : > { %8158 = vmatprep.subr.bf16.mxu1 %v8157_v7  ;;  %v8191_v7 = vpack.c.bf16 %v1760_v37, %v1757_v9  ;;  %v8193_v25 = vpack.c.bf16 %v1862_v26, %v1859_v59  ;;  %v1919_v9 = vld [vmem:[%s13551_s3 + $0x970] sm:$0xff]  ;;  %v1922_v37 = vld [vmem:[%s13551_s3 + $0x988] sm:$0x1] }
 0x30d   : > { %v8233_v59 = vpack.c.bf16 %v1922_v37, %v1919_v9 }
 0x30f   : > { %8160 = vmatpush3.bf16.msra.mxu1 %v8159_v35  ;;  %v1868_v35 = vld [vmem:[%s13551_s3 + $0x7d8] sm:$0xff] }
 0x310   : > { %8162 = vmatprep.subr.bf16.mxu1 %v8161_v45  ;;  %v8195_v45 = vpack.c.bf16 %v1814_v38, %v1811_v31  ;;  %v8197_v50 = vpack.c.bf16 %v1868_v35, %v1865_v22 }
 0x312   : > { %2313 = vmatmul.mubr.f32.vlgmr.msra.gmra.mrb[8].mxu1 %v10758_v44  ;;  %v1784_v44 = vld [vmem:[%s13551_s3 + $0x538] sm:$0xff] }
 0x313   : > { %2317 = vmatprep.mubr.f32.mxu1 %v11028_v51  ;;  %8164 = vmatpush3.bf16.msra.mxu1 %v8163_v23  ;;  %v8171_v51 = vpack.c.bf16 %v1730_v54, %v1727_v42  ;;  %v8173_v24 = vpack.c.bf16 %v1784_v44, %v1781_v56  ;;  %v1874_v23 = vld [vmem:[%s13551_s3 + $0x808] sm:$0xff]  ;;  %v1832_v42 = vld [vmem:[%s13551_s3 + $0x6b8] sm:$0xff]  ;;  %v1883_v54 = vld [vmem:[%s13551_s3 + $0x850] sm:$0xff] }
 0x314   : > { %8166 = vmatprep.subr.bf16.mxu1 %v8165_v57  ;;  %v8199_v57 = vpack.c.bf16 %v1820_v4, %v1817_v39  ;;  %v8201_v27 = vpack.c.bf16 %v1874_v23, %v1871_v63  ;;  %v1835_v44 = vld [vmem:[%s13551_s3 + $0x6d0] sm:$0xff] }
 0x316   : > { %2318 = vmatmul.mubr.f32.gmra.mrb[10].mxu1 %v11034_v16  ;;  %v1790_v16 = vld [vmem:[%s13551_s3 + $0x568] sm:$0xff] }
 0x317   : > { %8168 = vmatpush3.bf16.msra.mxu1 %v8167_v36  ;;  %2387 = vmatprep.mubr.f32.mxu1 %v11055_v53  ;;  %v8175_v53 = vpack.c.bf16 %v1736_v55, %v1733_v52  ;;  %v8177_v10 = vpack.c.bf16 %v1790_v16, %v1787_v1  ;;  %v1892_v52 = vld [vmem:[%s13551_s3 + $0x898] sm:$0xff]  ;;  %v1841_v16 = vld [vmem:[%s13551_s3 + $0x700] sm:$0xff] }
 0x318   : > { %8170 = vmatprep.subr.bf16.mxu1 %v8169_v6  ;;  %v1829_v6 = vld [vmem:[%s13551_s3 + $0x6a0] sm:$0xff] }
 0x31b   : > { %8172 = vmatpush3.bf16.msra.mxu1 %v8171_v51  ;;  %v1838_v51 = vld [vmem:[%s13551_s3 + $0x6e8] sm:$0xff] }
 0x31c   : > { %8174 = vmatprep.subr.bf16.mxu1 %v8173_v24  ;;  %v1889_v24 = vld [vmem:[%s13551_s3 + $0x880] sm:$0xff]  ;;  %v8211_v55 = vpack.c.bf16 %v1838_v51, %v1835_v44 }
 0x31d   : > { %v8213_v1 = vpack.c.bf16 %v1892_v52, %v1889_v24 }
 0x31f   : > { %8176 = vmatpush3.bf16.msra.mxu1 %v8175_v53  ;;  %v1844_v53 = vld [vmem:[%s13551_s3 + $0x718] sm:$0xff] }
 0x320   : > { %8178 = vmatprep.subr.bf16.mxu1 %v8177_v10  ;;  %v1895_v10 = vld [vmem:[%s13551_s3 + $0x8b0] sm:$0xff]  ;;  %v8215_v17 = vpack.c.bf16 %v1844_v53, %v1841_v16 }
 0x321   : > { %v8217_v5 = vpack.c.bf16 %v1898_v40, %v1895_v10 }
 0x323   : > { %8180 = vmatpush3.bf16.msra.mxu1 %v8179_v47  ;;  %v1850_v47 = vld [vmem:[%s13551_s3 + $0x748] sm:$0xff] }
 0x324   : > { %8182 = vmatprep.subr.bf16.mxu1 %v8181_v15  ;;  %v1901_v15 = vld [vmem:[%s13551_s3 + $0x8e0] sm:$0xff]  ;;  %v8219_v29 = vpack.c.bf16 %v1850_v47, %v1847_v19 }
 0x325   : > { %v8221_v46 = vpack.c.bf16 %v1904_v11, %v1901_v15 }
 0x327   : > { %8184 = vmatpush3.bf16.msra.mxu1 %v8183_v32  ;;  %v1856_v32 = vld [vmem:[%s13551_s3 + $0x778] sm:$0xff] }
 0x328   : > { %8186 = vmatprep.subr.bf16.mxu1 %v8185_v48  ;;  %v1907_v48 = vld [vmem:[%s13551_s3 + $0x910] sm:$0xff]  ;;  %v8223_v13 = vpack.c.bf16 %v1856_v32, %v1853_v61 }
 0x329   : > { %v8225_v34 = vpack.c.bf16 %v1910_v41, %v1907_v48 }
 0x32b   : > { %8188 = vmatpush3.bf16.msra.mxu1 %v8187_v2  ;;  %v1916_v2 = vld [vmem:[%s13551_s3 + $0x958] sm:$0xff] }
 0x32c   : > { %8190 = vmatprep.subr.bf16.mxu1 %v8189_v58  ;;  %v8229_v58 = vpack.c.bf16 %v1916_v2, %v1913_v20 }
 0x32f   : > { %8192 = vmatpush3.bf16.msra.mxu1 %v8191_v7 }
 0x330   : > { %8194 = vmatprep.subr.bf16.mxu1 %v8193_v25 }
 0x332   : > { %2388 = vmatmul.mubr.f32.vlgmr.msra.gmra.mrb[12].mxu1 %v11058_v21  ;;  %v1880_v21 = vld [vmem:[%s13551_s3 + $0x838] sm:$0xff] }
 0x333   : > { %2392 = vmatprep.mubr.f32.mxu1 %v11100_v43  ;;  %8196 = vmatpush3.bf16.msra.mxu1 %v8195_v45  ;;  %v8203_v43 = vpack.c.bf16 %v1826_v33, %v1823_v60  ;;  %v8205_v36 = vpack.c.bf16 %v1880_v21, %v1877_v30 }
 0x334   : > { %8198 = vmatprep.subr.bf16.mxu1 %v8197_v50 }
 0x336   : > { %2393 = vmatmul.mubr.f32.gmra.mrb[14].mxu1 %v11105_v28  ;;  %v1886_v28 = vld [vmem:[%s13551_s3 + $0x868] sm:$0xff] }
 0x337   : > { %8200 = vmatpush3.bf16.msra.mxu1 %v8199_v57  ;;  %2462 = vmatprep.mubr.f32.mxu1 %v11149_v18  ;;  %v8207_v18 = vpack.c.bf16 %v1832_v42, %v1829_v6  ;;  %v8209_v56 = vpack.c.bf16 %v1886_v28, %v1883_v54 }
 0x338   : > { %8202 = vmatprep.subr.bf16.mxu1 %v8201_v27 }
 0x33b   : > { %8204 = vmatpush3.bf16.msra.mxu1 %v8203_v43 }
 0x33c   : > { %8206 = vmatprep.subr.bf16.mxu1 %v8205_v36 }
 0x33f   : > { %8208 = vmatpush3.bf16.msra.mxu1 %v8207_v18 }
 0x340   : > { %8210 = vmatprep.subr.bf16.mxu1 %v8209_v56 }
 0x343   : > { %8212 = vmatpush3.bf16.msra.mxu1 %v8211_v55 }
 0x344   : > { %8214 = vmatprep.subr.bf16.mxu1 %v8213_v1 }
 0x347   : > { %8216 = vmatpush3.bf16.msra.mxu1 %v8215_v17 }
 0x348   : > { %8218 = vmatprep.subr.bf16.mxu1 %v8217_v5 }
 0x34b   : > { %8220 = vmatpush3.bf16.msra.mxu1 %v8219_v29 }
 0x34c   : > { %8222 = vmatprep.subr.bf16.mxu1 %v8221_v46 }
 0x34f   : > { %8224 = vmatpush3.bf16.msra.mxu1 %v8223_v13 }
 0x350   : > { %8226 = vmatprep.subr.bf16.mxu1 %v8225_v34 }
 0x352   : > { %2463 = vmatmul.mubr.f32.vlgmr.msra.gmra.mrb[16].mxu1 %v11152_v62 }
 0x353   : > { %2467 = vmatprep.mubr.f32.mxu1 %v11192_v8  ;;  %8228 = vmatpush3.bf16.msra.mxu1 %v8225_v34 }
 0x354   : > { %8230 = vmatprep.subr.bf16.mxu1 %v8229_v58 }
 0x356   : > { %2468 = vmatmul.mubr.f32.gmra.mrb[18].mxu1 %v11195_v0 }
 0x357   : > { %8232 = vmatpush3.bf16.msra.mxu1 %v8229_v58  ;;  %7891 = vmatprep.mubr.msk.f32.mxu1 %vm1923_vm11, %v11123_v12 }
 0x358   : > { %8235 = vmatprep.subr.msk.bf16.mxu1 %vm11089_vm10, %v8233_v59 }
 0x35b   : > { %8238 = vmatpush3.bf16.msk.msra.mxu1 %vm11089_vm10, %v8233_v59 }
 0x35e   : > { %7892 = vmatmul.mubr.msk.f32.vlgmr.msra.gmra.mrb[20].mxu1 %vm1923_vm11, %v11161_v3 }
 0x35f   : > { %2650 = vmatprep.mubr.f32.mxu1 %v9118_v14 }
 0x3b9   : > { %v2083_v62 = vpop.f32.mrb[0].mxu1 }
 0x3ba   : > { %v2085_v8 = vpop.f32.mrb[1].mxu1 }
 0x3c1   : > { %v2089_v26 = vpop.f32.mrb[2].mxu1 }
 0x3c2   : > { %v2091_v7 = vpop.f32.mrb[3].mxu1 }
 0x3c5   : > { %v2237_v0 = vpop.f32.mrb[4].mxu1 }
 0x3c6   : > { %v2239_v25 = vpop.f32.mrb[5].mxu1 }
 0x3ca   : > { %v2160_v31 = vpop.f32.mrb[0].mxu0 }
 0x3cb   : > { %v8791_v38 = vadd.f32 %v2160_v31, %v2083_v62  ;;  %v2243_v12 = vpop.f32.mrb[6].mxu1  ;;  %v2162_v22 = vpop.f32.mrb[1].mxu0 }
 0x3cc   : > { %v8793_v35 = vadd.f32 %v2162_v22, %v2085_v8  ;;  %v2245_v45 = vpop.f32.mrb[7].mxu1 }
 0x3cd   : > { %v8792_v50 = vadd.f32 %v8791_v38, %v2237_v0 }
 0x3ce   : > { %v8794_v39 = vadd.f32 %v8793_v35, %v2239_v25  ;;  %v7131_v35 = vld [vmem:[%s13552_s4 + $0x10] sm:$0xff] }
 0x3cf   : > { %v11472_v4 = vmax.f32 %v8792_v50, 0.0 }
 0x3d0   : > { %v11474_v63 = vmax.f32 %v8794_v39, 0.0  ;;  %v2166_v3 = vpop.f32.mrb[2].mxu0 }
 0x3d1   : > { %v8795_v23 = vadd.f32 %v2166_v3, %v2089_v26  ;;  %v2168_v57 = vpop.f32.mrb[3].mxu0 }
 0x3d2   : > { %v8797_v27 = vadd.f32 %v2168_v57, %v2091_v7  ;;  %v8954_v60 = vpack.i.bf16 %v11474_v63, %v11472_v4 }
 0x3d3   : > { %v8796_v33 = vadd.f32 %v8795_v23, %v2243_v12 }
 0x3d4   : > { %v8798_v30 = vadd.f32 %v8797_v27, %v2245_v45  ;;  %8955 = vrot.lane.b32.xlu0 %v8954_v60, %s13652_s30 }
 0x3d5   : > { %v11479_v21 = vmax.f32 %v8796_v33, 0.0 }
 0x3d6   : > { %v11481_v43 = vmax.f32 %v8798_v30, 0.0 }
 0x3d7   : > { %v9024_v36 = vpack.i.bf16 %v11479_v21, %v11472_v4  ;;  %v8248_v6 = vpack.c.bf16 %v11479_v21, %v11472_v4  ;;  %v2554_v4 = vld [vmem:[%s13552_s4] sm:$0xff] }
 0x3d8   : > { %8965 = vrot.lane.b32.xlu0 %v8954_v60, %s13676_s27  ;;  %v8959_v42 = vpack.i.bf16 %v11481_v43, %v11479_v21  ;;  %v8245_v22 = vpack.c.bf16 %v11481_v43, %v11474_v63 }
 0x3da   : > { %8960 = vrot.lane.b32.xlu1 %v8959_v42, %s13652_s30 }
 0x3dc   : > { %8975 = vrot.lane.b32.xlu0 %v8954_v60, %s9119_s14 }
 0x3de   : > { %8970 = vrot.lane.b32.xlu1 %v8959_v42, %s13676_s27 }
 0x3e0   : > { %8985 = vrot.lane.b32.xlu0 %v8954_v60, %s9120_s22 }
 0x3e2   : > { %8980 = vrot.lane.b32.xlu1 %v8959_v42, %s9119_s14 }
 0x3e4   : > { %8995 = vrot.lane.b32.xlu0 %v8954_v60, %s9121_s0 }
 0x3e5   : > { %v7740_v54 = vpop.f32.mrb[8].mxu1 }
 0x3e6   : > { %v7741_v28 = vpop.f32.mrb[9].mxu1  ;;  %8990 = vrot.lane.b32.xlu1 %v8959_v42, %s9120_s22 }
 0x3e7   : > { %v7742_v18 = vadd.f32 %v7741_v28, %v7740_v54 }
 0x3e8   : > { %9005 = vrot.lane.b32.xlu0 %v8954_v60, %s13677_s23 }
 0x3e9   : > { %v7743_v56 = vpop.f32.mrb[10].mxu1 }
 0x3ea   : > { %v7744_v44 = vpop.f32.mrb[11].mxu1  ;;  %9000 = vrot.lane.b32.xlu1 %v8959_v42, %s9121_s0  ;;  %s13506_s0 = scalar_lea.hbm %s13561_s13, %s7705_s15 }
 0x3eb   : > { %v7745_v51 = vadd.f32 %v7744_v44, %v7743_v56  ;;  %v7141_v44 = vld [vmem:[%s13552_s4 + $0x20] sm:$0xff] }
 0x3ee   : > { %9010 = vrot.lane.b32.xlu1 %v8959_v42, %s13677_s23  ;;  %v2555_v42 = vld [vmem:[%s13552_s4 + $0x8] sm:$0xff] }
 0x405   : > { %v7778_v24 = vpop.f32.mrb[12].mxu1 }
 0x406   : > { %v7779_v52 = vpop.f32.mrb[13].mxu1 }
 0x407   : > { %v7780_v55 = vadd.f32 %v7779_v52, %v7778_v24 }
 0x409   : > { %v2390_v1 = vadd.f32 %v7780_v55, %v7742_v18  ;;  %v7781_v16 = vpop.f32.mrb[14].mxu1 }
 0x40a   : > { %v7782_v53 = vpop.f32.mrb[15].mxu1 }
 0x40b   : > { %v7783_v10 = vadd.f32 %v7782_v53, %v7781_v16  ;;  %v7142_v53 = vld [vmem:[%s13552_s4 + $0x28] sm:$0xff] }
 0x40d   : > { %v2395_v40 = vadd.f32 %v7783_v10, %v7745_v51 }
 0x425   : > { %v7816_v17 = vpop.f32.mrb[16].mxu1 }
 0x426   : > { %v7817_v5 = vpop.f32.mrb[17].mxu1 }
 0x427   : > { %v7818_v19 = vadd.f32 %v7817_v5, %v7816_v17 }
 0x429   : > { %v7819_v47 = vpop.f32.mrb[18].mxu1  ;;  %v2465_v15 = vadd.f32 %v7818_v19, %v2390_v1  ;;  %v7147_v19 = vld [vmem:[%s13552_s4 + $0x30] sm:$0xff] }
 0x42a   : > { %v7820_v11 = vpop.f32.mrb[19].mxu1 }
 0x42b   : > { %v7821_v29 = vadd.f32 %v7820_v11, %v7819_v47 }
 0x42d   : > { %v2470_v46 = vadd.f32 %v7821_v29, %v2395_v40 }
 0x431   : > { %v7893_v61 = vpop.f32.mrb[20].mxu1 }
 0x432   : > { %v2545_v32 = vadd.f32 %v7893_v61, %v2470_v46  ;;  %v2539_v48 = vpop.f32.mrb[21].mxu1 }
 0x433   : > { %v2540_v41 = vadd.f32 %v2539_v48, %v2465_v15 }
 0x434   : > { %v2553_v13 = vmax.f32 %v2545_v32, 0.0  ;;  %v7148_v32 = vld [vmem:[%s13552_s4 + $0x38] sm:$0xff] }
 0x435   : > { %v2550_v34 = vmax.f32 %v2540_v41, 0.0 }
 0x436   : > { %v9014_v20 = vpack.i.bf16 %v2553_v13, %v11481_v43 }
 0x437   : > { %v9019_v2 = vpack.i.bf16 %v2550_v34, %v11474_v63  ;;  %v7132_v63 = vld [vmem:[%s13552_s4 + $0x18] sm:$0xff] }
 0x438   : > { %9015 = vrot.lane.b32.xlu1 %v9014_v20, %s9122_s16 }
 0x439   : > { %9020 = vrot.lane.b32.xlu0 %v9019_v2, %s9122_s16 }
 0x43c   : > { %9035 = vrot.lane.b32.xlu1 %v9019_v2, %s9123_s21 }
 0x43d   : > { %9025 = vrot.lane.b32.xlu0 %v9024_v36, %s9122_s16  ;;  %s429_s16 = sand.u32 1, %s9098_s26  }
 0x43e   : > { %s430_s17 = scalar_lea.vmem [#allocation2], %s429_s16 }
 0x43f   : > { %s7048_s24 = sshll.u32 %s430_s17, 4  ;;  %s13508_s24 = int_to_ptr.vmem [resolvable:$true] %s7048_s24 }
 0x440   : > { %9040 = vrot.lane.b32.xlu1 %v9024_v36, %s9123_s21  ;;  %s9044_s23 = scalar_lea.vmem %s13508_s24, 16 }
 0x441   : > { %9030 = vrot.lane.b32.xlu0 %v9014_v20, %s9123_s21  ;;  %v7153_v20 = vld [vmem:[%s13552_s4 + $0x40] sm:$0xff]  ;;  %p9045_p11 = scmp.ne.s32.totalorder %s13508_s24, %s9044_s23 }
 0x443   : > { %p9046_p12 = pnand %p9045_p11, %p9235_p5 }
 0x445   : > { %p9047_p13 = pneg %p9046_p12 }
 0x446   : > { %v8956_v58 = vpop.permute.xlu0 %8955 }
 0x447   : > { %v8958_v9 = vunpack.i.h.bf16 %v8956_v58  ;;  %v8957_v37 = vunpack.i.l.bf16 %v8956_v58 }
 0x449   : > { %v2571_v26 = vsel %vm581_vm0, %v8957_v37, %v8958_v9 }
 0x44a   : > { %v8966_v25 = vpop.permute.xlu0 %8965 }
 0x44b   : > { %v8968_v45 = vunpack.i.h.bf16 %v8966_v25  ;;  %v8967_v23 = vunpack.i.l.bf16 %v8966_v25 }
 0x44c   : > { %v8961_v59 = vpop.permute.xlu1 %8960 }
 0x44d   : > { %v8963_v62 = vunpack.i.h.bf16 %v8961_v59  ;;  %v8962_v8 = vunpack.i.l.bf16 %v8961_v59  ;;  %v2761_v33 = vsel %vm691_vm1, %v8967_v23, %v8968_v45 }
 0x44e   : > { %v8976_v57 = vpop.permute.xlu0 %8975 }
 0x44f   : > { %v8239_v7 = vpack.c.bf16 %v8963_v62, %v8958_v9  ;;  %v2572_v0 = vsel %vm581_vm0, %v8962_v8, %v8963_v62  ;;  %v8978_v30 = vunpack.i.h.bf16 %v8976_v57  ;;  %v8977_v54 = vunpack.i.l.bf16 %v8976_v57  ;;  %v7154_v62 = vld [vmem:[%s13552_s4 + $0x48] sm:$0xff] }
 0x450   : > { %v8242_v31 = vpack.c.bf16 %v2572_v0, %v2571_v26  ;;  %v8971_v38 = vpop.permute.xlu1 %8970 }
 0x451   : > { %v8973_v12 = vunpack.i.h.bf16 %v8971_v38  ;;  %8241 = vmatprep.subr.msk.bf16.mxu1 %vm11089_vm10, %v8239_v7  ;;  %v8972_v39 = vunpack.i.l.bf16 %v8971_v38  ;;  %v2868_v51 = vsel %vm2867_vm13, %v8977_v54, %v8978_v30  ;;  %v7159_v7 = vld [vmem:[%s13552_s4 + $0x50] sm:$0xff]  ;;  %v7165_v38 = vld [vmem:[%s13552_s4 + $0x60] sm:$0xff] }
 0x452   : > { %8244 = vmatpush1.bf16.msk.msra.mxu1 %vm11089_vm10, %v8242_v31  ;;  %v8986_v28 = vpop.permute.xlu0 %8985  ;;  %v7160_v31 = vld [vmem:[%s13552_s4 + $0x58] sm:$0xff] }
 0x453   : > { %8247 = vmatprep.subr.msk.bf16.mxu1 %vm11089_vm10, %v8245_v22  ;;  %v8251_v50 = vpack.c.bf16 %v8973_v12, %v8968_v45  ;;  %v2762_v27 = vsel %vm691_vm1, %v8972_v39, %v8973_v12  ;;  %v8988_v24 = vunpack.i.h.bf16 %v8986_v28  ;;  %v8987_v10 = vunpack.i.l.bf16 %v8986_v28  ;;  %v7166_v12 = vld [vmem:[%s13552_s4 + $0x68] sm:$0xff] }
 0x454   : > { %v8981_v3 = vpop.permute.xlu1 %8980  ;;  %v8254_v21 = vpack.c.bf16 %v2762_v27, %v2761_v33  ;;  %vm3300_vm1 = vcmask 777216  }
 0x455   : > { %7135 = vmatmul.mubr.msk.f32.vlgmr.msra.gmra.mrb[22].mxu1 %vm2575_vm12, %v7131_v35  ;;  %v8983_v60 = vunpack.i.h.bf16 %v8981_v3  ;;  %v8982_v36 = vunpack.i.l.bf16 %v8981_v3  ;;  %v2975_v47 = vsel %vm2974_vm14, %v8987_v10, %v8988_v24  ;;  %v7172_v10 = vld [vmem:[%s13552_s4 + $0x78] sm:$0xff] }
 0x456   : > { %8250 = vmatpush1.bf16.msk.msra.mxu1 %vm11089_vm10, %v8248_v6  ;;  %2656 = vmatprep.mubr.f32.mxu1 %v9118_v14  ;;  %v8996_v40 = vpop.permute.xlu0 %8995 }
 0x457   : > { %8253 = vmatprep.subr.msk.bf16.mxu1 %vm11089_vm10, %v8251_v50  ;;  %v8257_v43 = vpack.c.bf16 %v8983_v60, %v8978_v30  ;;  %v2869_v18 = vsel %vm2867_vm13, %v8982_v36, %v8983_v60  ;;  %v8998_v15 = vunpack.i.h.bf16 %v8996_v40  ;;  %v8997_v48 = vunpack.i.l.bf16 %v8996_v40  ;;  %v7177_v40 = vld [vmem:[%s13552_s4 + $0x80] sm:$0xff] }
 0x458   : > { %v8991_v6 = vpop.permute.xlu1 %8990  ;;  %v8260_v52 = vpack.c.bf16 %v2869_v18, %v2868_v51 }
 0x459   : > { %7136 = vmatmul.mubr.msk.f32.gmra.mrb[24].mxu1 %vm2575_vm12, %v7132_v63  ;;  %v8993_v56 = vunpack.i.h.bf16 %v8991_v6  ;;  %v8992_v1 = vunpack.i.l.bf16 %v8991_v6  ;;  %v3082_v2 = vsel %vm3081_vm15, %v8997_v48, %v8998_v15  ;;  %v3574_v48 = vld [vmem:[%s13554_s6 + $0x18] sm:$0xff] }
 0x45a   : > { %2737 = vmatprep.mubr.f32.mxu1 %v9118_v14  ;;  %v9006_v41 = vpop.permute.xlu0 %9005 }
 0x45b   : > { %v8263_v55 = vpack.c.bf16 %v8993_v56, %v8988_v24  ;;  %v2976_v17 = vsel %vm2974_vm14, %v8992_v1, %v8993_v56  ;;  %v9008_v58 = vunpack.i.h.bf16 %v9006_v41  ;;  %v9007_v8 = vunpack.i.l.bf16 %v9006_v41  ;;  %v7171_v24 = vld [vmem:[%s13552_s4 + $0x70] sm:$0xff] }
 0x45c   : > { %v9001_v16 = vpop.permute.xlu1 %9000  ;;  %v8266_v11 = vpack.c.bf16 %v2976_v17, %v2975_v47  ;;  %v7178_v17 = vld [vmem:[%s13552_s4 + $0x88] sm:$0xff] }
 0x45d   : > { %7139 = vmatmul.mubr.msk.f32.vlgmr.msra.gmra.mrb[22].mxu1 %vm2575_vm12, %v2554_v4  ;;  %v9003_v5 = vunpack.i.h.bf16 %v9001_v16  ;;  %v9002_v46 = vunpack.i.l.bf16 %v9001_v16  ;;  %v3188_v0 = vsel %vm1021_vm4, %v9007_v8, %v9008_v58  ;;  %v3581_v8 = vld [vmem:[%s13554_s6 + $0x50] sm:$0xff] }
 0x45e   : > { %8256 = vmatpush1.bf16.msk.msra.mxu1 %vm11089_vm10, %v8254_v21  ;;  %2743 = vmatprep.mubr.f32.mxu1 %v9118_v14 }
 0x45f   : > { %8259 = vmatprep.subr.msk.bf16.mxu1 %vm11089_vm10, %v8257_v43  ;;  %v8269_v29 = vpack.c.bf16 %v9003_v5, %v8998_v15  ;;  %v3083_v13 = vsel %vm3081_vm15, %v9002_v46, %v9003_v5  ;;  %v3571_v15 = vld [vmem:[%s13554_s6] sm:$0xff] }
 0x460   : > { %v9011_v61 = vpop.permute.xlu1 %9010  ;;  %v8272_v9 = vpack.c.bf16 %v3083_v13, %v3082_v2  ;;  %v3575_v13 = vld [vmem:[%s13554_s6 + $0x20] sm:$0xff]  ;;  %v3577_v2 = vld [vmem:[%s13554_s6 + $0x30] sm:$0xff] }
 0x461   : > { %7140 = vmatmul.mubr.msk.f32.gmra.mrb[24].mxu1 %vm2575_vm12, %v2555_v42  ;;  %v9013_v34 = vunpack.i.h.bf16 %v9011_v61  ;;  %v9012_v59 = vunpack.i.l.bf16 %v9011_v61  ;;  %v9124_v61 = vmov 0.0|0.0  }
 0x462   : > { %2839 = vmatprep.mubr.f32.mxu1 %v9118_v14 }
 0x463   : > { %v8275_v37 = vpack.c.bf16 %v9013_v34, %v9008_v58  ;;  %v3189_v26 = vsel %vm1021_vm4, %v9012_v59, %v9013_v34  ;;  %v3576_v34 = vld [vmem:[%s13554_s6 + $0x28] sm:$0xff]  ;;  %v3578_v58 = vld [vmem:[%s13554_s6 + $0x38] sm:$0xff]  ;;  %vm3604_vm4 = vcmask 1046528  }
 0x464   : > { %v8278_v25 = vpack.c.bf16 %v3189_v26, %v3188_v0  ;;  %v3580_v59 = vld [vmem:[%s13554_s6 + $0x48] sm:$0xff]  ;;  %v3582_v26 = vld [vmem:[%s13554_s6 + $0x58] sm:$0xff]  ;;  %v3583_v0 = vld [vmem:[%s13554_s6 + $0x60] sm:$0xff] }
 0x465   : > { %7145 = vmatmul.mubr.msk.f32.vlgmr.msra.gmra.mrb[22].mxu1 %vm2575_vm12, %v7141_v44  ;;  %vm8331_vm5 = vmpackc.low %vm3604_vm4, %vm9117_vm9  ;;  %vm6959_vm9 = vcmask 1041408  }
 0x466   : > { %8262 = vmatpush1.bf16.msk.msra.mxu1 %vm11089_vm10, %v8260_v52  ;;  %2845 = vmatprep.mubr.f32.mxu1 %v9118_v14 }
 0x467   : > { %8265 = vmatprep.subr.msk.bf16.mxu1 %vm11089_vm10, %v8263_v55 }
 0x469   : > { %7146 = vmatmul.mubr.msk.f32.gmra.mrb[24].mxu1 %vm2575_vm12, %v7142_v53 }
 0x46a   : > { %2946 = vmatprep.mubr.f32.mxu1 %v9118_v14 }
 0x46d   : > { %7151 = vmatmul.mubr.msk.f32.vlgmr.msra.gmra.mrb[22].mxu1 %vm2575_vm12, %v7147_v19  ;;  %v3555_v19 = vld [vmem:[%s13553_s5] sm:$0xff] }
 0x46e   : > { %8268 = vmatpush1.bf16.msk.msra.mxu1 %vm11089_vm10, %v8266_v11  ;;  %2952 = vmatprep.mubr.f32.mxu1 %v9118_v14  ;;  %v3572_v11 = vld [vmem:[%s13554_s6 + $0x8] sm:$0xff] }
 0x46f   : > { %8271 = vmatprep.subr.msk.bf16.mxu1 %vm11089_vm10, %v8269_v29  ;;  %v3573_v29 = vld [vmem:[%s13554_s6 + $0x10] sm:$0xff] }
 0x470   : > { %v8297_v41 = vpack.c.bf16 %v3574_v48, %v3573_v29  ;;  %v7190_v29 = vld [vmem:[%s13555_s7 + $0x100] sm:$0xff] }
 0x471   : > { %7152 = vmatmul.mubr.msk.f32.gmra.mrb[24].mxu1 %vm2575_vm12, %v7148_v32  ;;  %v8294_v32 = vpack.c.bf16 %v3572_v11, %v3571_v15  ;;  %v7186_v11 = vld [vmem:[%s13555_s7 + $0xe0] sm:$0xff] }
 0x472   : > { %3053 = vmatprep.mubr.f32.mxu1 %v9118_v14 }
 0x475   : > { %7157 = vmatmul.mubr.msk.f32.vlgmr.msra.gmra.mrb[22].mxu1 %vm2575_vm12, %v7153_v20  ;;  %v8300_v20 = vpack.c.bf16 %v3576_v34, %v3575_v13  ;;  %v3698_v13 = vld [vmem:[%s13555_s7 + $0x68] sm:$0xff]  ;;  %v3693_v34 = vld [vmem:[%s13555_s7 + $0x40] sm:$0xff] }
 0x476   : > { %8274 = vmatpush1.bf16.msk.msra.mxu1 %vm11089_vm10, %v8272_v9  ;;  %3059 = vmatprep.mubr.f32.mxu1 %v9118_v14  ;;  %v8303_v9 = vpack.c.bf16 %v3578_v58, %v3577_v2 }
 0x477   : > { %8277 = vmatprep.subr.msk.bf16.mxu1 %vm11089_vm10, %v8275_v37  ;;  %v3579_v37 = vld [vmem:[%s13554_s6 + $0x40] sm:$0xff] }
 0x479   : > { %7158 = vmatmul.mubr.msk.f32.gmra.mrb[24].mxu1 %vm2575_vm12, %v7154_v62  ;;  %v8306_v62 = vpack.c.bf16 %v3580_v59, %v3579_v37  ;;  %v7195_v59 = vld [vmem:[%s13555_s7 + $0x128] sm:$0xff] }
 0x47a   : > { %3160 = vmatprep.mubr.f32.mxu1 %v9118_v14 }
 0x47d   : > { %7163 = vmatmul.mubr.msk.f32.vlgmr.msra.gmra.mrb[22].mxu1 %vm2575_vm12, %v7159_v7  ;;  %v8309_v7 = vpack.c.bf16 %v3582_v26, %v3581_v8  ;;  %v7194_v8 = vld [vmem:[%s13555_s7 + $0x120] sm:$0xff] }
 0x47e   : > { %8280 = vmatpush1.bf16.msk.msra.mxu1 %vm11089_vm10, %v8278_v25  ;;  %3166 = vmatprep.mubr.f32.mxu1 %v9118_v14  ;;  %v3584_v25 = vld [vmem:[%s13554_s6 + $0x68] sm:$0xff] }
 0x481   : > { %7164 = vmatmul.mubr.msk.f32.gmra.mrb[24].mxu1 %vm2575_vm12, %v7160_v31  ;;  %v8312_v31 = vpack.c.bf16 %v3584_v25, %v3583_v0  ;;  %v7198_v0 = vld [vmem:[%s13555_s7 + $0x140] sm:$0xff]  ;;  %v3702_v25 = vld [vmem:[%s13555_s7 + $0x88] sm:$0xff] }
 0x482   : > { %3266 = vmatprep.mubr.f32.mxu1 %v9118_v14 }
 0x485   : > { %7169 = vmatmul.mubr.msk.f32.vlgmr.msra.gmra.mrb[22].mxu1 %vm2575_vm12, %v7165_v38  ;;  %v3585_v38 = vld [vmem:[%s13554_s6 + $0x70] sm:$0xff] }
 0x486   : > { %3272 = vmatprep.mubr.f32.mxu1 %v9118_v14 }
 0x489   : > { %7170 = vmatmul.mubr.msk.f32.gmra.mrb[24].mxu1 %vm2575_vm12, %v7166_v12  ;;  %v3586_v12 = vld [vmem:[%s13554_s6 + $0x78] sm:$0xff] }
 0x48a   : > { %3381 = vmatprep.mubr.f32.mxu1 %v9118_v14 }
 0x4aa   : > { %v9016_v22 = vpop.permute.xlu1 %9015 }
 0x4ab   : > { %v9018_v35 = vunpack.i.h.bf16 %v9016_v22  ;;  %v9017_v45 = vunpack.i.l.bf16 %v9016_v22  ;;  %v9021_v50 = vpop.permute.xlu0 %9020  ;;  %v8315_v22 = vpack.c.bf16 %v3586_v12, %v3585_v38 }
 0x4ac   : > { %v9023_v39 = vunpack.i.h.bf16 %v9021_v50  ;;  %v9022_v3 = vunpack.i.l.bf16 %v9021_v50 }
 0x4ad   : > { %v3304_v63 = vsel %vm3300_vm1, %v9017_v45, %v9018_v35  ;;  %v3587_v35 = vld [vmem:[%s13554_s6 + $0x80] sm:$0xff] }
 0x4ae   : > { %v3302_v23 = vsel %vm3300_vm1, %v9022_v3, %v9023_v39  ;;  %v9036_v57 = vpop.permute.xlu1 %9035  ;;  %v3589_v39 = vld [vmem:[%s13554_s6 + $0x90] sm:$0xff] }
 0x4af   : > { %v8281_v27 = vpack.c.bf16 %v3304_v63, %v3302_v23  ;;  %v9026_v60 = vpop.permute.xlu0 %9025  ;;  %v9038_v30 = vunpack.i.h.bf16 %v9036_v57  ;;  %v9037_v21 = vunpack.i.l.bf16 %v9036_v57  ;;  %v3591_v23 = vld [vmem:[%s13554_s6 + $0xa0] sm:$0xff]  ;;  %v3592_v57 = vld [vmem:[%s13554_s6 + $0xa8] sm:$0xff] }
 0x4b0   : > { %v9028_v4 = vunpack.i.h.bf16 %v9026_v60  ;;  %v9027_v33 = vunpack.i.l.bf16 %v9026_v60  ;;  %v3593_v60 = vld [vmem:[%s13554_s6 + $0xb0] sm:$0xff] }
 0x4b1   : > { %8283 = vmatprep.subr.msk.bf16.mxu1 %vm11089_vm10, %v8281_v27  ;;  %v3415_v52 = vsel %vm3413_vm3, %v9037_v21, %v9038_v30  ;;  %v8324_v27 = vpack.c.bf16 %v3592_v57, %v3591_v23  ;;  %v3595_v30 = vld [vmem:[%s13554_s6 + $0xc0] sm:$0xff] }
 0x4b2   : > { %v3301_v43 = vsel %vm3300_vm1, %v9027_v33, %v9022_v3  ;;  %v3303_v36 = vsel %vm3300_vm1, %v9028_v4, %v9017_v45  ;;  %v9041_v6 = vpop.permute.xlu1 %9040  ;;  %v3588_v45 = vld [vmem:[%s13554_s6 + $0x88] sm:$0xff]  ;;  %v3590_v3 = vld [vmem:[%s13554_s6 + $0x98] sm:$0xff]  ;;  %v7206_v23 = vld [vmem:[%s13555_s7 + $0x180] sm:$0xff] }
 0x4b3   : > { %v8284_v42 = vpack.c.bf16 %v3303_v36, %v3301_v43  ;;  %v9043_v54 = vunpack.i.h.bf16 %v9041_v6  ;;  %v9042_v28 = vunpack.i.l.bf16 %v9041_v6  ;;  %v9031_v18 = vpop.permute.xlu0 %9030  ;;  %v8318_v50 = vpack.c.bf16 %v3588_v45, %v3587_v35  ;;  %v3594_v4 = vld [vmem:[%s13554_s6 + $0xb8] sm:$0xff]  ;;  %v3705_v35 = vld [vmem:[%s13555_s7 + $0xa0] sm:$0xff]  ;;  %v7203_v45 = vld [vmem:[%s13555_s7 + $0x168] sm:$0xff] }
 0x4b4   : > { %v9033_v56 = vunpack.i.h.bf16 %v9031_v18  ;;  %v9032_v44 = vunpack.i.l.bf16 %v9031_v18  ;;  %v8321_v63 = vpack.c.bf16 %v3590_v3, %v3589_v39  ;;  %v8327_v33 = vpack.c.bf16 %v3594_v4, %v3593_v60  ;;  %v3556_v18 = vld [vmem:[%s13553_s5 + $0x8] sm:$0xff]  ;;  %v3709_v60 = vld [vmem:[%s13555_s7 + $0xc0] sm:$0x1] }
 0x4b5   : > { %v3414_v51 = vsel %vm3413_vm3, %v9042_v28, %v9037_v21  ;;  %8286 = vmatpush1.bf16.msk.msra.mxu1 %vm11089_vm10, %v8284_v42  ;;  %v3596_v21 = vld [vmem:[%s13554_s6 + $0xc8] sm:$0x7f] }
 0x4b6   : > { %v3416_v55 = vsel %vm3413_vm3, %v9043_v54, %v9032_v44  ;;  %v3417_v1 = vsel %vm3413_vm3, %v9032_v44, %v9033_v56  ;;  %v8330_v43 = vpack.c.bf16 %v3596_v21, %v3595_v30  ;;  %v7211_v4 = vld [vmem:[%s13555_s7 + $0x1a8] sm:$0x1]  ;;  %v3692_v30 = vld [vmem:[%s13555_s7 + $0x38] sm:$0xff]  ;;  %v7210_v21 = vld [vmem:[%s13555_s7 + $0x1a0] sm:$0x1] }
 0x4b7   : > { %v8287_v16 = vpack.c.bf16 %v3417_v1, %v3415_v52  ;;  %v8290_v53 = vpack.c.bf16 %v3416_v55, %v3414_v51  ;;  %v3686_v52 = vld [vmem:[%s13555_s7 + $0x8] sm:$0xff]  ;;  %v3685_v1 = vld [vmem:[%s13555_s7] sm:$0xff] }
 0x4b8   : > { %7175 = vmatmul.mubr.msk.f32.vlgmr.msra.gmra.mrb[22].mxu1 %vm2575_vm12, %v7171_v24  ;;  %v3690_v55 = vld [vmem:[%s13555_s7 + $0x28] sm:$0xff] }
 0x4b9   : > { %8289 = vmatprep.subr.msk.bf16.mxu1 %vm11089_vm10, %v8287_v16  ;;  %3387 = vmatprep.mubr.f32.mxu1 %v9118_v14 }
 0x4ba   : > { %8292 = vmatpush1.bf16.msk.msra.mxu1 %vm11089_vm10, %v8290_v53  ;;  %v8357_v53 = vpack.c.bf16 %v3690_v55, %v3686_v52  ;;  %v3687_v55 = vld [vmem:[%s13555_s7 + $0x10] sm:$0xff]  ;;  %vm7033_vm10 = vcmask 73728  }
 0x4bb   : > { %8293 = vmatprep.subr.bf16.mxu1 %v9124_v61 }
 0x4bc   : > { %7176 = vmatmul.mubr.msk.f32.gmra.mrb[24].mxu1 %vm2575_vm12, %v7172_v10  ;;  %v3689_v10 = vld [vmem:[%s13555_s7 + $0x20] sm:$0xff]  ;;  %8358 = vmatprep.subr.bf16.mxu0 %v8357_v53  ;;  %v3700_v53 = vld [vmem:[%s13555_s7 + $0x78] sm:$0xff] }
 0x4bd   : > { %3494 = vmatprep.mubr.f32.mxu1 %v9118_v14 }
 0x4c0   : > { %7181 = vmatmul.mubr.msk.f32.vlgmr.msra.gmra.mrb[22].mxu1 %vm2575_vm12, %v7177_v40  ;;  %v7187_v40 = vld [vmem:[%s13555_s7 + $0xe8] sm:$0xff] }
 0x4c1   : > { %3500 = vmatprep.mubr.f32.mxu1 %v9118_v14  ;;  %8295 = vmatpush1.bf16.msra.mxu1 %v8294_v32  ;;  %v3694_v32 = vld [vmem:[%s13555_s7 + $0x48] sm:$0xff] }
 0x4c2   : > { %8296 = vmatprep.subr.bf16.mxu1 %v9124_v61  ;;  %v8361_v37 = vpack.c.bf16 %v3698_v13, %v3694_v32  ;;  %v3695_v32 = vld [vmem:[%s13555_s7 + $0x50] sm:$0xff]  ;;  %v3704_v13 = vld [vmem:[%s13555_s7 + $0x98] sm:$0xff] }
 0x4c4   : > { %7182 = vmatmul.mubr.msk.f32.gmra.mrb[24].mxu1 %vm2575_vm12, %v7178_v17  ;;  %v7191_v17 = vld [vmem:[%s13555_s7 + $0x108] sm:$0xff] }
 0x4c5   : > { %8298 = vmatpush1.bf16.msra.mxu1 %v8297_v41  ;;  %v8333_v15 = vpack.c.bf16 %v7191_v17, %v7187_v40  ;;  %v8335_v41 = vpack.c.bf16 %v7190_v29, %v7186_v11  ;;  %v7192_v40 = vld [vmem:[%s13555_s7 + $0x110] sm:$0xff] }
 0x4c6   : > { %8299 = vmatprep.subr.bf16.mxu1 %v9124_v61 }
 0x4c9   : > { %8301 = vmatpush1.bf16.msra.mxu1 %v8300_v20  ;;  %v3697_v20 = vld [vmem:[%s13555_s7 + $0x60] sm:$0xff] }
 0x4ca   : > { %8302 = vmatprep.subr.bf16.mxu1 %v9124_v61 }
 0x4cd   : > { %8304 = vmatpush1.bf16.msra.mxu1 %v8303_v9 }
 0x4ce   : > { %8305 = vmatprep.subr.bf16.mxu1 %v9124_v61 }
 0x4d1   : > { %8307 = vmatpush1.bf16.msra.mxu1 %v8306_v62  ;;  %v7199_v62 = vld [vmem:[%s13555_s7 + $0x148] sm:$0xff] }
 0x4d2   : > { %8308 = vmatprep.subr.bf16.mxu1 %v9124_v61 }
 0x4d5   : > { %8310 = vmatpush1.bf16.msra.mxu1 %v8309_v7  ;;  %v8337_v7 = vpack.c.bf16 %v7199_v62, %v7195_v59  ;;  %v7205_v59 = vld [vmem:[%s13555_s7 + $0x178] sm:$0xff] }
 0x4d6   : > { %8311 = vmatprep.subr.bf16.mxu1 %v9124_v61  ;;  %v7209_v62 = vld [vmem:[%s13555_s7 + $0x198] sm:$0xff] }
 0x4d9   : > { %8313 = vmatpush1.bf16.msra.mxu1 %v8312_v31  ;;  %v3706_v31 = vld [vmem:[%s13555_s7 + $0xa8] sm:$0xff] }
 0x4da   : > { %8314 = vmatprep.subr.bf16.mxu1 %v9124_v61  ;;  %v8365_v12 = vpack.c.bf16 %v3706_v31, %v3702_v25  ;;  %v7204_v25 = vld [vmem:[%s13555_s7 + $0x170] sm:$0xff] }
 0x4db   : > { %v7208_v31 = vld [vmem:[%s13555_s7 + $0x190] sm:$0xff] }
 0x4dd   : > { %8316 = vmatpush1.bf16.msra.mxu1 %v8315_v22  ;;  %v3701_v22 = vld [vmem:[%s13555_s7 + $0x80] sm:$0xff] }
 0x4de   : > { %8317 = vmatprep.subr.bf16.mxu1 %v9124_v61  ;;  %v8367_v39 = vpack.c.bf16 %v3705_v35, %v3701_v22  ;;  %v3712_v22 = vld [vmem:[%s13555_s7 + $0xd8] sm:$0x1]  ;;  %v7227_v35 = vld [vmem:[%s13555_s7 + $0x1c8] sm:$0xff] }
 0x4e1   : > { %8319 = vmatpush1.bf16.msra.mxu1 %v8318_v50  ;;  %v8339_v50 = vpack.c.bf16 %v7198_v0, %v7194_v8  ;;  %v8353_v0 = vpack.c.bf16 %v7209_v62, %v7205_v59  ;;  %v7252_v59 = vld [vmem:[%s13555_s7 + $0x290] sm:$0x1] }
 0x4e2   : > { %8320 = vmatprep.subr.bf16.mxu1 %v9124_v61 }
 0x4e5   : > { %8322 = vmatpush1.bf16.msra.mxu1 %v8321_v63  ;;  %v7202_v63 = vld [vmem:[%s13555_s7 + $0x160] sm:$0xff] }
 0x4e6   : > { %8323 = vmatprep.subr.bf16.mxu1 %v9124_v61  ;;  %v8343_v57 = vpack.c.bf16 %v7206_v23, %v7202_v63  ;;  %v7239_v63 = vld [vmem:[%s13555_s7 + $0x228] sm:$0xff]  ;;  %v3711_v23 = vld [vmem:[%s13555_s7 + $0xd0] sm:$0x1] }
 0x4e9   : > { %8325 = vmatpush1.bf16.msra.mxu1 %v8324_v27  ;;  %v3710_v27 = vld [vmem:[%s13555_s7 + $0xc8] sm:$0x1] }
 0x4ea   : > { %8326 = vmatprep.subr.bf16.mxu1 %v9124_v61 }
 0x4ed   : > { %8328 = vmatpush1.bf16.msra.mxu1 %v8327_v33  ;;  %v3688_v33 = vld [vmem:[%s13555_s7 + $0x18] sm:$0xff] }
 0x4ee   : > { %8329 = vmatprep.subr.bf16.mxu1 %v9124_v61 }
 0x4f1   : > { %8332 = vmatpush1.bf16.msk.msra.mxu1 %vm8331_vm5, %v8330_v43  ;;  %v8369_v43 = vpack.c.bf16 %v3692_v30, %v3688_v33  ;;  %v7234_v33 = vld [vmem:[%s13555_s7 + $0x200] sm:$0xff] }
 0x4f2   : > { %8334 = vmatprep.subr.bf16.mxu1 %v8333_v15  ;;  %v7238_v30 = vld [vmem:[%s13555_s7 + $0x220] sm:$0xff] }
 0x593   : > { %v11640_v49 = vpop.f32.mrb[22].mxu1 }
 0x594   : > { %3515 = vrot.lane.b32.xlu0 %v11640_v49, %s13652_s30  ;;  %v11644_v5 = vpop.f32.mrb[23].mxu1 }
 0x595   : > { %3517 = vrot.lane.b32.xlu1 %v11644_v5, %s13652_s30 }
 0x597   : > { %v11651_v47 = vpop.f32.mrb[24].mxu1 }
 0x598   : > { %3559 = vperm.xlu0 %8952, %v3555_v19   ;;  %v11662_v46 = vpop.f32.mrb[25].mxu1  ;;  %v8359_v19 = vpack.c.bf16 %v3689_v10, %v3685_v1  ;;  %v3691_v1 = vld [vmem:[%s13555_s7 + $0x30] sm:$0xff] }
 0x599   : > { %v7188_v10 = vld [vmem:[%s13555_s7 + $0xf0] sm:$0xff] }
 0x59a   : > { %8360 = vmatpush1.bf16.msra.mxu0 %v8359_v19  ;;  %v7201_v19 = vld [vmem:[%s13555_s7 + $0x158] sm:$0xff] }
 0x59b   : > { %8362 = vmatprep.subr.bf16.mxu0 %v8361_v37 }
 0x606   : > { %v3516_v36 = vpop.permute.xlu0 %3515 }
 0x607   : > { %v3518_v6 = vpop.permute.xlu1 %3517 }
 0x608   : > { %v3523_v42 = vsel %vm581_vm0, %v3516_v36, %v3518_v6  ;;  %v3530_v54 = vmax.f32 %v11644_v5, %v3518_v6  ;;  %v7189_v36 = vld [vmem:[%s13555_s7 + $0xf8] sm:$0xff] }
 0x609   : > { %v3529_v28 = vmax.f32 %v11640_v49, %v3523_v42  ;;  %v7193_v6 = vld [vmem:[%s13555_s7 + $0x118] sm:$0xff] }
 0x60a   : > { %3539 = vrot.lane.b32.xlu0 %v3530_v54, %s9119_s14  ;;  %v8345_v42 = vpack.c.bf16 %v7193_v6, %v7189_v36  ;;  %v8387_v36 = vpack.c.bf16 %v7238_v30, %v7234_v33  ;;  %v7270_v30 = vld [vmem:[%s13555_s7 + $0x2f0] sm:$0xff] }
 0x60b   : > { %3537 = vrot.lane.b32.xlu1 %v3529_v28, %s9119_s14 }
 0x60e   : > { %3521 = vrot.lane.b32.xlu0 %v11662_v46, %s13652_s30 }
 0x60f   : > { %3519 = vrot.lane.b32.xlu1 %v11651_v47, %s13652_s30  ;;  %s9048_s30 = sshll.u32 %s9126_s29, 4  ;;  %s9049_s30 = int_to_ptr.vmem [resolvable:$false] %s9048_s30 }
 0x610   : > { %s9050_s21 = scalar_lea.vmem %s9049_s30, 32  ;;  %p9051_p0 = scmp.lt.s32.totalorder %s13508_s24, %s9049_s30 }
 0x611   : > { %p9052_p1 = scmp.lt.s32.totalorder %s9050_s21, %s9044_s23 }
 0x613   : > { %3564 = vperm.xlu1 %8953, %v3556_v18   ;;  %p9053_p2 = por %p9052_p1, %p9051_p0 }
 0x615   : > { %p9054_p3 = pnand %p9053_p2, %p9047_p13 }
 0x617   : > { %v3560_v56 = vpop.permute.xlu0 %3559 }
 0x67c   : > { %v3540_v44 = vpop.permute.xlu0 %3539 }
 0x67d   : > { %v3552_v51 = vmax.f32 %v3530_v54, %v3540_v44  ;;  %v3538_v24 = vpop.permute.xlu1 %3537 }
 0x67e   : > { %v3545_v16 = vsel %vm2867_vm13, %v3538_v24, %v3540_v44 }
 0x67f   : > { %v3568_v49 = vadd.f32 %v3560_v56, %v3552_v51  ;;  %v3551_v5 = vmax.f32 %v3529_v28, %v3545_v16  ;;  %v3696_v16 = vld [vmem:[%s13555_s7 + $0x58] sm:$0xff] }
 0x680   : > { %v3522_v48 = vpop.permute.xlu0 %3521  ;;  %v8373_v29 = vpack.c.bf16 %v3700_v53, %v3696_v16 }
 0x681   : > { %v3567_v2 = vadd.f32 %v3560_v56, %v3551_v5  ;;  %v3532_v58 = vmax.f32 %v11662_v46, %v3522_v48  ;;  %7184 = vmatprep.mubr.msk.f32.mxu1 %vm3597_vm6, %v3568_v49  ;;  %v3520_v9 = vpop.permute.xlu1 %3519  ;;  %v8363_v46 = vpack.c.bf16 %v3697_v20, %v3693_v34  ;;  %v8371_v49 = vpack.c.bf16 %v3691_v1, %v3687_v55  ;;  %v7197_v5 = vld [vmem:[%s13555_s7 + $0x138] sm:$0xff]  ;;  %v7250_v1 = vld [vmem:[%s13555_s7 + $0x280] sm:$0x1] }
 0x682   : > { %v3524_v26 = vsel %vm581_vm0, %v3520_v9, %v3522_v48  ;;  %vm3744_vm0 = vcmask 400384   ;;  %v3699_v48 = vld [vmem:[%s13555_s7 + $0x70] sm:$0xff]  ;;  %v3708_v34 = vld [vmem:[%s13555_s7 + $0xb8] sm:$0xff] }
 0x683   : > { %v3531_v38 = vmax.f32 %v11651_v47, %v3524_v26  ;;  %3673 = vmatmul.mubr.f32.vlgmr.msra.gmra.mrb[26].mxu1 %v3567_v2  ;;  %3543 = vrot.lane.b32.xlu1 %v3532_v58, %s9119_s14  ;;  %v7207_v47 = vld [vmem:[%s13555_s7 + $0x188] sm:$0xff]  ;;  %v8349_v2 = vpack.c.bf16 %v7201_v19, %v7197_v5  ;;  %v7200_v9 = vld [vmem:[%s13555_s7 + $0x150] sm:$0xff]  ;;  %v8375_v37 = vpack.c.bf16 %v3699_v48, %v3695_v32  ;;  %v7241_v55 = vld [vmem:[%s13555_s7 + $0x238] sm:$0xff] }
 0x684   : > { %8336 = vmatpush1.bf16.msra.mxu1 %v8335_v41  ;;  %8364 = vmatpush1.bf16.msra.mxu0 %v8363_v46  ;;  %v8341_v3 = vpack.c.bf16 %v7207_v47, %v7203_v45  ;;  %v8347_v41 = vpack.c.bf16 %v7192_v40, %v7188_v10  ;;  %v8377_v8 = vpack.c.bf16 %v3708_v34, %v3704_v13  ;;  %v3703_v26 = vld [vmem:[%s13555_s7 + $0x90] sm:$0xff]  ;;  %v7231_v45 = vld [vmem:[%s13555_s7 + $0x1e8] sm:$0xff]  ;;  %v7230_v47 = vld [vmem:[%s13555_s7 + $0x1e0] sm:$0xff] }
 0x685   : > { %3541 = vrot.lane.b32.xlu0 %v3531_v38, %s9119_s14  ;;  %8338 = vmatprep.subr.bf16.mxu1 %v8337_v7  ;;  %v3707_v46 = vld [vmem:[%s13555_s7 + $0xb0] sm:$0xff]  ;;  %v7245_v5 = vld [vmem:[%s13555_s7 + $0x258] sm:$0xff]  ;;  %v7261_v34 = vld [vmem:[%s13555_s7 + $0x2a8] sm:$0xff]  ;;  %s7036_s14 = scalar_lea.sflag [#allocation3], %s429_s16 }
 0x686   : > { %8366 = vmatprep.subr.bf16.mxu0 %v8365_v12  ;;  %v8355_v12 = vpack.c.bf16 %v7208_v31, %v7204_v25  ;;  %v7249_v19 = vld [vmem:[%s13555_s7 + $0x278] sm:$0xff]  ;;  %v7244_v32 = vld [vmem:[%s13555_s7 + $0x250] sm:$0xff]  ;;  %v7281_v25 = vld [vmem:[%s13555_s7 + $0x348] sm:$0xff] }
 0x687   : > { %v7248_v48 = vld [vmem:[%s13555_s7 + $0x270] sm:$0xff]  ;;  %v7253_v13 = vld [vmem:[%s13555_s7 + $0x298] sm:$0x1] }
 0x688   : > { %8340 = vmatpush1.bf16.msra.mxu1 %v8339_v50  ;;  %8368 = vmatpush1.bf16.msra.mxu0 %v8367_v39  ;;  %v7226_v50 = vld [vmem:[%s13555_s7 + $0x1c0] sm:$0xff]  ;;  %v7213_v39 = vld [vmem:[%s13555_s7 + $0x1b8] sm:$0x1] }
 0x689   : > { %8342 = vmatprep.subr.bf16.mxu1 %v8341_v3  ;;  %7220 = vmatprep.subr.msk.mxu0 %vm1930_vm8, %v3710_v27  ;;  %v7235_v3 = vld [vmem:[%s13555_s7 + $0x208] sm:$0xff]  ;;  %v8383_v27 = vpack.c.bf16 %v7230_v47, %v7226_v50  ;;  %v7263_v50 = vld [vmem:[%s13555_s7 + $0x2b8] sm:$0xff] }
 0x68a   : > { %v7267_v47 = vld [vmem:[%s13555_s7 + $0x2d8] sm:$0xff] }
 0x68c   : > { %8344 = vmatpush1.bf16.msra.mxu1 %v8343_v57  ;;  %7221 = vmatpush1.msk.msra.mxu0 %vm1930_vm8, %v3709_v60  ;;  %v8381_v57 = vpack.c.bf16 %v7231_v45, %v7227_v35  ;;  %v7212_v60 = vld [vmem:[%s13555_s7 + $0x1b0] sm:$0x1]  ;;  %v7285_v45 = vld [vmem:[%s13555_s7 + $0x368] sm:$0x1] }
 0x68d   : > { %7214 = vmatprep.subr.msk.mxu1 %vm1930_vm8, %v7211_v4  ;;  %8370 = vmatprep.subr.bf16.mxu0 %v8369_v43  ;;  %v8385_v4 = vpack.c.bf16 %v7239_v63, %v7235_v3  ;;  %v7247_v43 = vld [vmem:[%s13555_s7 + $0x268] sm:$0xff]  ;;  %v7266_v3 = vld [vmem:[%s13555_s7 + $0x2d0] sm:$0xff]  ;;  %v7271_v63 = vld [vmem:[%s13555_s7 + $0x2f8] sm:$0xff] }
 0x690   : > { %7215 = vmatpush1.msk.msra.mxu1 %vm1930_vm8, %v7210_v21  ;;  %v7243_v21 = vld [vmem:[%s13555_s7 + $0x248] sm:$0xff] }
 0x691   : > { %8346 = vmatprep.subr.bf16.mxu1 %v8345_v42  ;;  %v8389_v6 = vpack.c.bf16 %v7247_v43, %v7243_v21  ;;  %v7242_v42 = vld [vmem:[%s13555_s7 + $0x240] sm:$0xff]  ;;  %v7274_v21 = vld [vmem:[%s13555_s7 + $0x310] sm:$0xff]  ;;  %v7279_v43 = vld [vmem:[%s13555_s7 + $0x338] sm:$0xff] }
 0x692   : > { %v3565_v54 = vpop.permute.xlu1 %3564 }
 0x6f5   : > { %v3544_v28 = vpop.permute.xlu1 %3543 }
 0x6f6   : > { %v3554_v18 = vmax.f32 %v3532_v58, %v3544_v28  ;;  %v7196_v58 = vld [vmem:[%s13555_s7 + $0x130] sm:$0xff] }
 0x6f7   : > { %v3542_v56 = vpop.permute.xlu0 %3541  ;;  %v8351_v7 = vpack.c.bf16 %v7200_v9, %v7196_v58  ;;  %v7264_v58 = vld [vmem:[%s13555_s7 + $0x2c0] sm:$0xff]  ;;  %v7269_v9 = vld [vmem:[%s13555_s7 + $0x2e8] sm:$0xff] }
 0x6f8   : > { %v3570_v44 = vadd.f32 %v3565_v54, %v3554_v18  ;;  %v3546_v51 = vsel %vm2867_vm13, %v3542_v56, %v3544_v28  ;;  %v7251_v18 = vld [vmem:[%s13555_s7 + $0x288] sm:$0x1]  ;;  %v7229_v56 = vld [vmem:[%s13555_s7 + $0x1d8] sm:$0xff] }
 0x6f9   : > { %v3553_v24 = vmax.f32 %v3531_v38, %v3546_v51  ;;  %v8379_v38 = vpack.c.bf16 %v3707_v46, %v3703_v26  ;;  %v7228_v51 = vld [vmem:[%s13555_s7 + $0x1d0] sm:$0xff]  ;;  %v7268_v46 = vld [vmem:[%s13555_s7 + $0x2e0] sm:$0xff] }
 0x6fa   : > { %7185 = vmatprep.mubr.msk.f32.mxu1 %vm3597_vm6, %v3570_v44  ;;  %v7233_v44 = vld [vmem:[%s13555_s7 + $0x1f8] sm:$0xff] }
 0x6fb   : > { %v3569_v52 = vadd.f32 %v3565_v54, %v3553_v24  ;;  %v7246_v54 = vld [vmem:[%s13555_s7 + $0x260] sm:$0xff]  ;;  %v7232_v24 = vld [vmem:[%s13555_s7 + $0x1f0] sm:$0xff]  ;;  %v8393_v16 = vpack.c.bf16 %v7233_v44, %v7229_v56  ;;  %v7287_v56 = vld [vmem:[%s13555_s7 + $0x378] sm:$0x1] }
 0x6fc   : > { %v8391_v28 = vpack.c.bf16 %v7246_v54, %v7242_v42  ;;  %v8395_v53 = vpack.c.bf16 %v7232_v24, %v7228_v51  ;;  %v7278_v54 = vld [vmem:[%s13555_s7 + $0x330] sm:$0xff]  ;;  %v7295_v44 = vld [vmem:[%s13555_s7 + $0x388] sm:$0xff]  ;;  %v7294_v24 = vld [vmem:[%s13555_s7 + $0x380] sm:$0xff] }
 0x6fd   : > { %3678 = vmatmul.mubr.f32.gmra.mrb[28].mxu1 %v3569_v52  ;;  %v7237_v52 = vld [vmem:[%s13555_s7 + $0x218] sm:$0xff]  ;;  %v7299_v51 = vld [vmem:[%s13555_s7 + $0x3a8] sm:$0xff] }
 0x6fe   : > { %3823 = vmatprep.mubr.f32.mxu1 %v9118_v14  ;;  %v8397_v40 = vpack.c.bf16 %v7241_v55, %v7237_v52  ;;  %v7298_v52 = vld [vmem:[%s13555_s7 + $0x3a0] sm:$0xff]  ;;  %v7303_v55 = vld [vmem:[%s13555_s7 + $0x3c8] sm:$0xff] }
 0x756   : > { %v3674_v17 = vpop.f32.mrb[26].mxu1 }
 0x757   : > { %v11893_v15 = vmax.f32 %v3674_v17, 0.0  ;;  %v3676_v11 = vpop.f32.mrb[27].mxu1  ;;  %v7236_v17 = vld [vmem:[%s13555_s7 + $0x210] sm:$0xff] }
 0x759   : > { %7222 = vmatmul.mubr.msk.f32.vlgmr.msra.gmra.mrb[4].mxu0 %vm3744_vm0, %v11893_v15  ;;  %v3743_v20 = vrot.slane %v11893_v15, 1  ;;  %v4086_v10 = vrot.slane %v11893_v15, 2 }
 0x75a   : > { %8372 = vmatpush1.bf16.msra.mxu0 %v8371_v49  ;;  %4050 = vmatprep.mubr.f32.mxu0 %v9118_v14  ;;  %v7240_v49 = vld [vmem:[%s13555_s7 + $0x230] sm:$0xff] }
 0x75b   : > { %7216 = vmatmul.mubr.msk.f32.vlgmr.msra.gmra.mrb[30].mxu1 %vm3744_vm0, %v3743_v20  ;;  %8374 = vmatprep.subr.bf16.mxu0 %v8373_v29  ;;  %v8399_v11 = vpack.c.bf16 %v7240_v49, %v7236_v17  ;;  %v8401_v29 = vpack.c.bf16 %v7249_v19, %v7245_v5  ;;  %v7302_v17 = vld [vmem:[%s13555_s7 + $0x3c0] sm:$0xff]  ;;  %v7311_v5 = vld [vmem:[%s13555_s7 + $0x408] sm:$0xff] }
 0x75c   : > { %8348 = vmatpush1.bf16.msra.mxu1 %v8347_v41  ;;  %3894 = vmatprep.mubr.f32.mxu1 %v9118_v14  ;;  %v8403_v41 = vpack.c.bf16 %v7248_v48, %v7244_v32  ;;  %v7306_v49 = vld [vmem:[%s13555_s7 + $0x3e0] sm:$0xff]  ;;  %v7315_v19 = vld [vmem:[%s13555_s7 + $0x428] sm:$0xff] }
 0x75d   : > { %8350 = vmatprep.subr.bf16.mxu1 %v8349_v2  ;;  %v7260_v2 = vld [vmem:[%s13555_s7 + $0x2a0] sm:$0xff] }
 0x75e   : > { %8376 = vmatpush1.bf16.msra.mxu0 %v8375_v37  ;;  %v7273_v37 = vld [vmem:[%s13555_s7 + $0x308] sm:$0xff]  ;;  %v7310_v32 = vld [vmem:[%s13555_s7 + $0x400] sm:$0xff] }
 0x75f   : > { %8378 = vmatprep.subr.bf16.mxu0 %v8377_v8  ;;  %v8407_v8 = vpack.c.bf16 %v7264_v58, %v7260_v2  ;;  %v8409_v26 = vpack.c.bf16 %v7273_v37, %v7269_v9  ;;  %v7314_v48 = vld [vmem:[%s13555_s7 + $0x420] sm:$0xff]  ;;  %v7296_v2 = vld [vmem:[%s13555_s7 + $0x390] sm:$0xff]  ;;  %v7305_v9 = vld [vmem:[%s13555_s7 + $0x3d8] sm:$0xff] }
 0x760   : > { %8352 = vmatpush1.bf16.msra.mxu1 %v8351_v7  ;;  %v7272_v7 = vld [vmem:[%s13555_s7 + $0x300] sm:$0xff]  ;;  %v7300_v58 = vld [vmem:[%s13555_s7 + $0x3b0] sm:$0xff]  ;;  %v7309_v37 = vld [vmem:[%s13555_s7 + $0x3f8] sm:$0xff] }
 0x761   : > { %8354 = vmatprep.subr.bf16.mxu1 %v8353_v0  ;;  %v7277_v0 = vld [vmem:[%s13555_s7 + $0x328] sm:$0xff]  ;;  %v8411_v31 = vpack.c.bf16 %v7272_v7, %v7268_v46  ;;  %v8445_v46 = vpack.c.bf16 %v7309_v37, %v7305_v9  ;;  %v7304_v7 = vld [vmem:[%s13555_s7 + $0x3d0] sm:$0xff]  ;;  %v7362_v37 = vld [vmem:[%s13555_s7 + $0x540] sm:$0xff] }
 0x762   : > { %8380 = vmatpush1.bf16.msra.mxu0 %v8379_v38  ;;  %v8413_v38 = vpack.c.bf16 %v7281_v25, %v7277_v0  ;;  %v7308_v0 = vld [vmem:[%s13555_s7 + $0x3f0] sm:$0xff]  ;;  %v7313_v25 = vld [vmem:[%s13555_s7 + $0x418] sm:$0xff] }
 0x763   : > { %7223 = vmatprep.subr.msk.mxu0 %vm1930_vm8, %v3712_v22  ;;  %v7280_v22 = vld [vmem:[%s13555_s7 + $0x340] sm:$0xff] }
 0x764   : > { %8356 = vmatpush1.bf16.msra.mxu1 %v8355_v12  ;;  %v7276_v12 = vld [vmem:[%s13555_s7 + $0x320] sm:$0xff] }
 0x765   : > { %7217 = vmatprep.subr.msk.mxu1 %vm1930_vm8, %v7213_v39  ;;  %v8415_v35 = vpack.c.bf16 %v7280_v22, %v7276_v12  ;;  %v7262_v39 = vld [vmem:[%s13555_s7 + $0x2b0] sm:$0xff] }
 0x766   : > { %7224 = vmatpush1.msk.msra.mxu0 %vm1930_vm8, %v3711_v23  ;;  %v7275_v23 = vld [vmem:[%s13555_s7 + $0x318] sm:$0xff]  ;;  %v7312_v22 = vld [vmem:[%s13555_s7 + $0x410] sm:$0xff] }
 0x767   : > { %7225 = vmatmul.mubr.msk.f32.vlgmr.msra.gmra.mrb[6].mxu0 %vm3744_vm0, %v11893_v15  ;;  %8382 = vmatprep.subr.bf16.mxu0 %v8381_v57  ;;  %v7284_v57 = vld [vmem:[%s13555_s7 + $0x360] sm:$0x1]  ;;  %v8421_v33 = vpack.c.bf16 %v7275_v23, %v7271_v63  ;;  %v7337_v23 = vld [vmem:[%s13555_s7 + $0x4a8] sm:$0xff] }
 0x768   : > { %7218 = vmatpush1.msk.msra.mxu1 %vm1930_vm8, %v7212_v60  ;;  %8384 = vmatpush1.bf16.msra.mxu0 %v8383_v27  ;;  %v8417_v27 = vpack.c.bf16 %v7267_v47, %v7263_v50  ;;  %v8419_v60 = vpack.c.bf16 %v7266_v3, %v7262_v39  ;;  %v7321_v50 = vld [vmem:[%s13555_s7 + $0x458] sm:$0x1]  ;;  %v7329_v47 = vld [vmem:[%s13555_s7 + $0x468] sm:$0xff]  ;;  %v7328_v3 = vld [vmem:[%s13555_s7 + $0x460] sm:$0xff] }
 0x769   : > { %7219 = vmatmul.mubr.msk.f32.vlgmr.msra.gmra.mrb[32].mxu1 %vm3744_vm0, %v3743_v20  ;;  %8386 = vmatprep.subr.bf16.mxu0 %v8385_v4  ;;  %v7265_v20 = vld [vmem:[%s13555_s7 + $0x2c8] sm:$0xff]  ;;  %v4276_v4 = vrot.slane %v11893_v15, 3  ;;  %v7332_v63 = vld [vmem:[%s13555_s7 + $0x480] sm:$0xff] }
 0x76a   : > { %4165 = vmatprep.mubr.f32.mxu0 %v9118_v14  ;;  %v8405_v62 = vpack.c.bf16 %v7265_v20, %v7261_v34  ;;  %v7297_v34 = vld [vmem:[%s13555_s7 + $0x398] sm:$0xff]  ;;  %v7333_v39 = vld [vmem:[%s13555_s7 + $0x488] sm:$0xff] }
 0x76b   : > { %v7301_v20 = vld [vmem:[%s13555_s7 + $0x3b8] sm:$0xff] }
 0x76c   : > { %8388 = vmatpush1.bf16.msra.mxu0 %v8387_v36  ;;  %v7283_v36 = vld [vmem:[%s13555_s7 + $0x358] sm:$0xff] }
 0x76d   : > { %8390 = vmatprep.subr.bf16.mxu0 %v8389_v6  ;;  %v8423_v6 = vpack.c.bf16 %v7274_v21, %v7270_v30  ;;  %v8425_v42 = vpack.c.bf16 %v7283_v36, %v7279_v43  ;;  %v7336_v30 = vld [vmem:[%s13555_s7 + $0x4a0] sm:$0xff]  ;;  %v7345_v43 = vld [vmem:[%s13555_s7 + $0x4e8] sm:$0xff] }
 0x76e   : > { %v7340_v21 = vld [vmem:[%s13555_s7 + $0x4c0] sm:$0xff]  ;;  %v7349_v36 = vld [vmem:[%s13555_s7 + $0x508] sm:$0xff] }
 0x770   : > { %8392 = vmatpush1.bf16.msra.mxu0 %v8391_v28  ;;  %v7282_v28 = vld [vmem:[%s13555_s7 + $0x350] sm:$0xff] }
 0x771   : > { %7254 = vmatprep.subr.msk.mxu0 %vm1930_vm8, %v7251_v18  ;;  %v8427_v18 = vpack.c.bf16 %v7282_v28, %v7278_v54  ;;  %v7344_v54 = vld [vmem:[%s13555_s7 + $0x4e0] sm:$0xff] }
 0x772   : > { %v7348_v28 = vld [vmem:[%s13555_s7 + $0x500] sm:$0xff] }
 0x774   : > { %7255 = vmatpush1.msk.msra.mxu0 %vm1930_vm8, %v7250_v1  ;;  %v7307_v1 = vld [vmem:[%s13555_s7 + $0x3e8] sm:$0xff] }
 0x775   : > { %7256 = vmatmul.mubr.msk.f32.vlgmr.msra.gmra.mrb[4].mxu0 %vm3744_vm0, %v4086_v10  ;;  %8394 = vmatprep.subr.bf16.mxu0 %v8393_v16  ;;  %v7286_v16 = vld [vmem:[%s13555_s7 + $0x370] sm:$0x1] }
 0x776   : > { %8396 = vmatpush1.bf16.msra.mxu0 %v8395_v53  ;;  %4236 = vmatprep.mubr.f32.mxu0 %v9118_v14  ;;  %v8429_v53 = vpack.c.bf16 %v7299_v51, %v7295_v44  ;;  %v7331_v44 = vld [vmem:[%s13555_s7 + $0x478] sm:$0xff] }
 0x777   : > { %8398 = vmatprep.subr.bf16.mxu0 %v8397_v40  ;;  %v8433_v40 = vpack.c.bf16 %v7307_v1, %v7303_v55  ;;  %v7335_v51 = vld [vmem:[%s13555_s7 + $0x498] sm:$0xff] }
 0x778   : > { %v7339_v55 = vld [vmem:[%s13555_s7 + $0x4b8] sm:$0xff] }
 0x779   : > { %v7343_v1 = vld [vmem:[%s13555_s7 + $0x4d8] sm:$0xff] }
 0x77a   : > { %8400 = vmatpush1.bf16.msra.mxu0 %v8399_v11  ;;  %v8435_v11 = vpack.c.bf16 %v7306_v49, %v7302_v17  ;;  %v8469_v17 = vpack.c.bf16 %v7343_v1, %v7339_v55  ;;  %v7338_v49 = vld [vmem:[%s13555_s7 + $0x4b0] sm:$0xff]  ;;  %v7401_v55 = vld [vmem:[%s13555_s7 + $0x648] sm:$0xff]  ;;  %v7396_v1 = vld [vmem:[%s13555_s7 + $0x620] sm:$0xff] }
 0x77b   : > { %8402 = vmatprep.subr.bf16.mxu0 %v8401_v29  ;;  %v8437_v29 = vpack.c.bf16 %v7315_v19, %v7311_v5  ;;  %v7342_v5 = vld [vmem:[%s13555_s7 + $0x4d0] sm:$0xff]  ;;  %v7347_v19 = vld [vmem:[%s13555_s7 + $0x4f8] sm:$0xff] }
 0x77e   : > { %8404 = vmatpush1.bf16.msra.mxu0 %v8403_v41  ;;  %v8439_v41 = vpack.c.bf16 %v7314_v48, %v7310_v32  ;;  %v7346_v48 = vld [vmem:[%s13555_s7 + $0x4f0] sm:$0xff] }
 0x77f   : > { %7257 = vmatprep.subr.msk.mxu0 %vm1930_vm8, %v7253_v13  ;;  %v7319_v13 = vld [vmem:[%s13555_s7 + $0x448] sm:$0x1] }
 0x782   : > { %7258 = vmatpush1.msk.msra.mxu0 %vm1930_vm8, %v7252_v59  ;;  %v7318_v59 = vld [vmem:[%s13555_s7 + $0x440] sm:$0x1] }
 0x783   : > { %7259 = vmatmul.mubr.msk.f32.vlgmr.msra.gmra.mrb[6].mxu0 %vm3744_vm0, %v4086_v10  ;;  %8406 = vmatprep.subr.bf16.mxu0 %v8405_v62  ;;  %v8431_v10 = vpack.c.bf16 %v7298_v52, %v7294_v24  ;;  %v8441_v62 = vpack.c.bf16 %v7301_v20, %v7297_v34  ;;  %v7330_v24 = vld [vmem:[%s13555_s7 + $0x470] sm:$0xff]  ;;  %v7355_v20 = vld [vmem:[%s13555_s7 + $0x538] sm:$0x1] }
 0x784   : > { %8408 = vmatpush1.bf16.msra.mxu0 %v8407_v8  ;;  %4355 = vmatprep.mubr.f32.mxu0 %v9118_v14  ;;  %v8443_v8 = vpack.c.bf16 %v7300_v58, %v7296_v2  ;;  %v7334_v52 = vld [vmem:[%s13555_s7 + $0x490] sm:$0xff]  ;;  %v7363_v2 = vld [vmem:[%s13555_s7 + $0x548] sm:$0xff] }
 0x785   : > { %8410 = vmatprep.subr.bf16.mxu0 %v8409_v26  ;;  %v4466_v26 = vrot.slane %v11893_v15, 4  ;;  %v7367_v58 = vld [vmem:[%s13555_s7 + $0x568] sm:$0xff] }
 0x788   : > { %8412 = vmatpush1.bf16.msra.mxu0 %v8411_v31  ;;  %v7317_v31 = vld [vmem:[%s13555_s7 + $0x438] sm:$0xff] }
 0x789   : > { %8414 = vmatprep.subr.bf16.mxu0 %v8413_v38  ;;  %v8447_v38 = vpack.c.bf16 %v7308_v0, %v7304_v7  ;;  %v8449_v12 = vpack.c.bf16 %v7317_v31, %v7313_v25  ;;  %v7370_v25 = vld [vmem:[%s13555_s7 + $0x580] sm:$0xff] }
 0x78a   : > { %v7374_v31 = vld [vmem:[%s13555_s7 + $0x5a0] sm:$0xff] }
 0x78c   : > { %8416 = vmatpush1.bf16.msra.mxu0 %v8415_v35  ;;  %v7316_v35 = vld [vmem:[%s13555_s7 + $0x430] sm:$0xff] }
 0x78d   : > { %7288 = vmatprep.subr.msk.mxu0 %vm1930_vm8, %v7285_v45  ;;  %v8451_v45 = vpack.c.bf16 %v7316_v35, %v7312_v22  ;;  %v8483_v22 = vpack.c.bf16 %v7374_v31, %v7370_v25  ;;  %v5036_v25 = vrot.slane %v11893_v15, 7 }
 0x790   : > { %7289 = vmatpush1.msk.msra.mxu0 %vm1930_vm8, %v7284_v57  ;;  %v7341_v57 = vld [vmem:[%s13555_s7 + $0x4c8] sm:$0xff] }
 0x791   : > { %7290 = vmatmul.mubr.msk.f32.vlgmr.msra.gmra.mrb[4].mxu0 %vm3744_vm0, %v4276_v4  ;;  %8418 = vmatprep.subr.bf16.mxu0 %v8417_v27  ;;  %v7320_v27 = vld [vmem:[%s13555_s7 + $0x450] sm:$0x1] }
 0x792   : > { %8420 = vmatpush1.bf16.msra.mxu0 %v8419_v60  ;;  %4426 = vmatprep.mubr.f32.mxu0 %v9118_v14  ;;  %v8453_v60 = vpack.c.bf16 %v7333_v39, %v7329_v47  ;;  %v7387_v39 = vld [vmem:[%s13555_s7 + $0x608] sm:$0x1] }
 0x793   : > { %8422 = vmatprep.subr.bf16.mxu0 %v8421_v33  ;;  %v8457_v33 = vpack.c.bf16 %v7341_v57, %v7337_v23  ;;  %v7364_v23 = vld [vmem:[%s13555_s7 + $0x550] sm:$0xff] }
 0x794   : > { %v7368_v57 = vld [vmem:[%s13555_s7 + $0x570] sm:$0xff] }
 0x796   : > { %8424 = vmatpush1.bf16.msra.mxu0 %v8423_v6  ;;  %v8459_v6 = vpack.c.bf16 %v7340_v21, %v7336_v30  ;;  %v8491_v30 = vpack.c.bf16 %v7368_v57, %v7364_v23  ;;  %v4846_v21 = vrot.slane %v11893_v15, 6  ;;  %v7435_v23 = vld [vmem:[%s13555_s7 + $0x728] sm:$0xff]  ;;  %v7430_v57 = vld [vmem:[%s13555_s7 + $0x700] sm:$0xff] }
 0x797   : > { %8426 = vmatprep.subr.bf16.mxu0 %v8425_v42  ;;  %v8461_v42 = vpack.c.bf16 %v7349_v36, %v7345_v43  ;;  %v7372_v36 = vld [vmem:[%s13555_s7 + $0x590] sm:$0xff] }
 0x79a   : > { %8428 = vmatpush1.bf16.msra.mxu0 %v8427_v18  ;;  %v8463_v18 = vpack.c.bf16 %v7348_v28, %v7344_v54  ;;  %v7385_v54 = vld [vmem:[%s13555_s7 + $0x5f8] sm:$0xff] }
 0x79b   : > { %7291 = vmatprep.subr.msk.mxu0 %vm1930_vm8, %v7287_v56  ;;  %v7353_v56 = vld [vmem:[%s13555_s7 + $0x528] sm:$0x1] }
 0x79e   : > { %7292 = vmatpush1.msk.msra.mxu0 %vm1930_vm8, %v7286_v16  ;;  %v7352_v16 = vld [vmem:[%s13555_s7 + $0x520] sm:$0x1] }
 0x79f   : > { %7293 = vmatmul.mubr.msk.f32.vlgmr.msra.gmra.mrb[6].mxu0 %vm3744_vm0, %v4276_v4  ;;  %8430 = vmatprep.subr.bf16.mxu0 %v8429_v53  ;;  %v8455_v4 = vpack.c.bf16 %v7332_v63, %v7328_v3  ;;  %v8465_v53 = vpack.c.bf16 %v7335_v51, %v7331_v44  ;;  %v7365_v3 = vld [vmem:[%s13555_s7 + $0x558] sm:$0xff]  ;;  %v7384_v44 = vld [vmem:[%s13555_s7 + $0x5f0] sm:$0xff] }
 0x7a0   : > { %8432 = vmatpush1.bf16.msra.mxu0 %v8431_v10  ;;  %4545 = vmatprep.mubr.f32.mxu0 %v9118_v14  ;;  %v8467_v10 = vpack.c.bf16 %v7334_v52, %v7330_v24  ;;  %v7369_v63 = vld [vmem:[%s13555_s7 + $0x578] sm:$0xff]  ;;  %v7397_v52 = vld [vmem:[%s13555_s7 + $0x628] sm:$0xff] }
 0x7a1   : > { %8434 = vmatprep.subr.bf16.mxu0 %v8433_v40  ;;  %v4656_v40 = vrot.slane %v11893_v15, 5  ;;  %v7389_v24 = vld [vmem:[%s13555_s7 + $0x618] sm:$0x1] }
 0x7a4   : > { %8436 = vmatpush1.bf16.msra.mxu0 %v8435_v11  ;;  %v7351_v11 = vld [vmem:[%s13555_s7 + $0x518] sm:$0xff] }
 0x7a5   : > { %8438 = vmatprep.subr.bf16.mxu0 %v8437_v29  ;;  %v8471_v29 = vpack.c.bf16 %v7342_v5, %v7338_v49  ;;  %v8473_v32 = vpack.c.bf16 %v7351_v11, %v7347_v19  ;;  %v7404_v19 = vld [vmem:[%s13555_s7 + $0x660] sm:$0xff] }
 0x7a6   : > { %v7408_v11 = vld [vmem:[%s13555_s7 + $0x680] sm:$0xff] }
 0x7a8   : > { %8440 = vmatpush1.bf16.msra.mxu0 %v8439_v41  ;;  %v7350_v41 = vld [vmem:[%s13555_s7 + $0x510] sm:$0xff] }
 0x7a9   : > { %7322 = vmatprep.subr.msk.mxu0 %vm1930_vm8, %v7319_v13  ;;  %v8475_v13 = vpack.c.bf16 %v7350_v41, %v7346_v48  ;;  %v8507_v48 = vpack.c.bf16 %v7408_v11, %v7404_v19  ;;  %v7440_v11 = vld [vmem:[%s13555_s7 + $0x750] sm:$0xff] }
 0x7ac   : > { %7323 = vmatpush1.msk.msra.mxu0 %vm1930_vm8, %v7318_v59  ;;  %v7366_v59 = vld [vmem:[%s13555_s7 + $0x560] sm:$0xff] }
 0x7ad   : > { %7324 = vmatmul.mubr.msk.f32.vlgmr.msra.gmra.mrb[4].mxu0 %vm3744_vm0, %v4466_v26  ;;  %8442 = vmatprep.subr.bf16.mxu0 %v8441_v62  ;;  %v7371_v62 = vld [vmem:[%s13555_s7 + $0x588] sm:$0xff]  ;;  %v8479_v7 = vpack.c.bf16 %v7366_v59, %v7362_v37  ;;  %v7403_v37 = vld [vmem:[%s13555_s7 + $0x658] sm:$0xff]  ;;  %v7398_v59 = vld [vmem:[%s13555_s7 + $0x630] sm:$0xff] }
 0x7ae   : > { %8444 = vmatpush1.bf16.msra.mxu0 %v8443_v8  ;;  %4616 = vmatprep.mubr.f32.mxu0 %v9118_v14  ;;  %v7375_v8 = vld [vmem:[%s13555_s7 + $0x5a8] sm:$0xff] }
 0x7af   : > { %8446 = vmatprep.subr.bf16.mxu0 %v8445_v46  ;;  %v8477_v46 = vpack.c.bf16 %v7367_v58, %v7363_v2  ;;  %v8481_v0 = vpack.c.bf16 %v7375_v8, %v7371_v62  ;;  %v7421_v58 = vld [vmem:[%s13555_s7 + $0x6e8] sm:$0x1]  ;;  %v7402_v62 = vld [vmem:[%s13555_s7 + $0x650] sm:$0xff]  ;;  %v7407_v8 = vld [vmem:[%s13555_s7 + $0x678] sm:$0xff] }
 0x7b2   : > { %8448 = vmatpush1.bf16.msra.mxu0 %v8447_v38  ;;  %v7379_v38 = vld [vmem:[%s13555_s7 + $0x5c8] sm:$0xff] }
 0x7b3   : > { %8450 = vmatprep.subr.bf16.mxu0 %v8449_v12  ;;  %v7383_v12 = vld [vmem:[%s13555_s7 + $0x5e8] sm:$0xff] }
 0x7b4   : > { %v8485_v35 = vpack.c.bf16 %v7383_v12, %v7379_v38  ;;  %v7406_v38 = vld [vmem:[%s13555_s7 + $0x670] sm:$0xff] }
 0x7b5   : > { %v7410_v12 = vld [vmem:[%s13555_s7 + $0x690] sm:$0xff] }
 0x7b6   : > { %8452 = vmatpush1.bf16.msra.mxu0 %v8451_v45  ;;  %v7378_v45 = vld [vmem:[%s13555_s7 + $0x5c0] sm:$0xff]  ;;  %v8519_v15 = vpack.c.bf16 %v7410_v12, %v7406_v38  ;;  %v7481_v12 = vld [vmem:[%s13555_s7 + $0x868] sm:$0xff] }
 0x7b7   : > { %7325 = vmatprep.subr.msk.mxu0 %vm1930_vm8, %v7321_v50  ;;  %v7382_v50 = vld [vmem:[%s13555_s7 + $0x5e0] sm:$0xff] }
 0x7b8   : > { %v8487_v47 = vpack.c.bf16 %v7382_v50, %v7378_v45  ;;  %v7414_v50 = vld [vmem:[%s13555_s7 + $0x6b0] sm:$0xff]  ;;  %v7476_v38 = vld [vmem:[%s13555_s7 + $0x840] sm:$0xff] }
 0x7ba   : > { %7326 = vmatpush1.msk.msra.mxu0 %vm1930_vm8, %v7320_v27  ;;  %v7373_v27 = vld [vmem:[%s13555_s7 + $0x598] sm:$0xff] }
 0x7bb   : > { %7327 = vmatmul.mubr.msk.f32.vlgmr.msra.gmra.mrb[6].mxu0 %vm3744_vm0, %v4466_v26  ;;  %8454 = vmatprep.subr.bf16.mxu0 %v8453_v60  ;;  %v7354_v26 = vld [vmem:[%s13555_s7 + $0x530] sm:$0x1]  ;;  %v7377_v60 = vld [vmem:[%s13555_s7 + $0x5b8] sm:$0xff] }
 0x7bc   : > { %8456 = vmatpush1.bf16.msra.mxu0 %v8455_v4  ;;  %4735 = vmatprep.mubr.f32.mxu0 %v9118_v14  ;;  %v7386_v4 = vld [vmem:[%s13555_s7 + $0x600] sm:$0x1]  ;;  %v8493_v43 = vpack.c.bf16 %v7377_v60, %v7373_v27  ;;  %v7439_v60 = vld [vmem:[%s13555_s7 + $0x748] sm:$0xff] }
 0x7bd   : > { %8458 = vmatprep.subr.bf16.mxu0 %v8457_v33  ;;  %v8489_v33 = vpack.c.bf16 %v7369_v63, %v7365_v3  ;;  %v7423_v3 = vld [vmem:[%s13555_s7 + $0x6f8] sm:$0x1]  ;;  %v7431_v63 = vld [vmem:[%s13555_s7 + $0x708] sm:$0xff]  ;;  %v7434_v27 = vld [vmem:[%s13555_s7 + $0x720] sm:$0xff] }
 0x7c0   : > { %8460 = vmatpush1.bf16.msra.mxu0 %v8459_v6  ;;  %v7376_v6 = vld [vmem:[%s13555_s7 + $0x5b0] sm:$0xff] }
 0x7c1   : > { %8462 = vmatprep.subr.bf16.mxu0 %v8461_v42  ;;  %v7381_v42 = vld [vmem:[%s13555_s7 + $0x5d8] sm:$0xff]  ;;  %v8495_v28 = vpack.c.bf16 %v7376_v6, %v7372_v36  ;;  %v7438_v36 = vld [vmem:[%s13555_s7 + $0x740] sm:$0xff] }
 0x7c2   : > { %v7442_v6 = vld [vmem:[%s13555_s7 + $0x760] sm:$0xff] }
 0x7c4   : > { %8464 = vmatpush1.bf16.msra.mxu0 %v8463_v18  ;;  %v8497_v18 = vpack.c.bf16 %v7385_v54, %v7381_v42  ;;  %v7447_v42 = vld [vmem:[%s13555_s7 + $0x788] sm:$0xff] }
 0x7c5   : > { %7356 = vmatprep.subr.msk.mxu0 %vm1930_vm8, %v7353_v56  ;;  %v7380_v56 = vld [vmem:[%s13555_s7 + $0x5d0] sm:$0xff]  ;;  %v7451_v54 = vld [vmem:[%s13555_s7 + $0x7a8] sm:$0xff] }
 0x7c6   : > { %v8499_v51 = vpack.c.bf16 %v7384_v44, %v7380_v56  ;;  %v7446_v56 = vld [vmem:[%s13555_s7 + $0x780] sm:$0xff] }
 0x7c7   : > { %v7450_v44 = vld [vmem:[%s13555_s7 + $0x7a0] sm:$0xff] }
 0x7c8   : > { %7357 = vmatpush1.msk.msra.mxu0 %vm1930_vm8, %v7352_v16  ;;  %v7400_v16 = vld [vmem:[%s13555_s7 + $0x640] sm:$0xff] }
 0x7c9   : > { %7358 = vmatmul.mubr.msk.f32.vlgmr.msra.gmra.mrb[4].mxu0 %vm3744_vm0, %v4656_v40  ;;  %8466 = vmatprep.subr.bf16.mxu0 %v8465_v53  ;;  %v7405_v53 = vld [vmem:[%s13555_s7 + $0x668] sm:$0xff]  ;;  %v8503_v49 = vpack.c.bf16 %v7400_v16, %v7396_v1  ;;  %v7432_v1 = vld [vmem:[%s13555_s7 + $0x710] sm:$0xff] }
 0x7ca   : > { %8468 = vmatpush1.bf16.msra.mxu0 %v8467_v10  ;;  %4806 = vmatprep.mubr.f32.mxu0 %v9118_v14  ;;  %v7409_v10 = vld [vmem:[%s13555_s7 + $0x688] sm:$0xff]  ;;  %v7436_v16 = vld [vmem:[%s13555_s7 + $0x730] sm:$0xff] }
 0x7cb   : > { %8470 = vmatprep.subr.bf16.mxu0 %v8469_v17  ;;  %v8501_v17 = vpack.c.bf16 %v7401_v55, %v7397_v52  ;;  %v8505_v5 = vpack.c.bf16 %v7409_v10, %v7405_v53  ;;  %v7433_v52 = vld [vmem:[%s13555_s7 + $0x718] sm:$0xff] }
 0x7cc   : > { %v7437_v55 = vld [vmem:[%s13555_s7 + $0x738] sm:$0xff] }
 0x7cd   : > { %v7441_v53 = vld [vmem:[%s13555_s7 + $0x758] sm:$0xff] }
 0x7ce   : > { %8472 = vmatpush1.bf16.msra.mxu0 %v8471_v29  ;;  %v7413_v29 = vld [vmem:[%s13555_s7 + $0x6a8] sm:$0xff]  ;;  %v7445_v10 = vld [vmem:[%s13555_s7 + $0x778] sm:$0xff] }
 0x7cf   : > { %8474 = vmatprep.subr.bf16.mxu0 %v8473_v32  ;;  %v7417_v32 = vld [vmem:[%s13555_s7 + $0x6c8] sm:$0xff]  ;;  %v8541_v19 = vpack.c.bf16 %v7445_v10, %v7441_v53 }
 0x7d0   : > { %v12319_v34 = vpop.f32.mrb[28].mxu1  ;;  %v8509_v41 = vpack.c.bf16 %v7417_v32, %v7413_v29  ;;  %v7444_v29 = vld [vmem:[%s13555_s7 + $0x770] sm:$0xff]  ;;  %v7449_v32 = vld [vmem:[%s13555_s7 + $0x798] sm:$0xff]  ;;  %v7499_v53 = vld [vmem:[%s13555_s7 + $0x8c8] sm:$0xff] }
 0x7d1   : > { %v3681_v9 = vpop.f32.mrb[29].mxu1  ;;  %v7503_v10 = vld [vmem:[%s13555_s7 + $0x8e8] sm:$0xff] }
 0x7d2   : > { %8476 = vmatpush1.bf16.msra.mxu0 %v8475_v13  ;;  %v7412_v13 = vld [vmem:[%s13555_s7 + $0x6a0] sm:$0xff]  ;;  %v7399_v9 = vld [vmem:[%s13555_s7 + $0x638] sm:$0xff] }
 0x7d3   : > { %7359 = vmatprep.subr.msk.mxu0 %vm1930_vm8, %v7355_v20  ;;  %v7416_v20 = vld [vmem:[%s13555_s7 + $0x6c0] sm:$0xff] }
 0x7d4   : > { %v8511_v2 = vpack.c.bf16 %v7416_v20, %v7412_v13  ;;  %v7448_v13 = vld [vmem:[%s13555_s7 + $0x790] sm:$0xff] }
 0x7d5   : > { %v7452_v20 = vld [vmem:[%s13555_s7 + $0x7b0] sm:$0xff] }
 0x7d6   : > { %7360 = vmatpush1.msk.msra.mxu0 %vm1930_vm8, %v7354_v26  ;;  %v7411_v26 = vld [vmem:[%s13555_s7 + $0x698] sm:$0xff] }
 0x7d7   : > { %7361 = vmatmul.mubr.msk.f32.vlgmr.msra.gmra.mrb[6].mxu0 %vm3744_vm0, %v4656_v40  ;;  %8478 = vmatprep.subr.bf16.mxu0 %v8477_v46  ;;  %v7388_v40 = vld [vmem:[%s13555_s7 + $0x610] sm:$0x1]  ;;  %v7420_v46 = vld [vmem:[%s13555_s7 + $0x6e0] sm:$0x1]  ;;  %v8517_v31 = vpack.c.bf16 %v7411_v26, %v7407_v8  ;;  %v7473_v8 = vld [vmem:[%s13555_s7 + $0x828] sm:$0xff] }
 0x7d8   : > { %8480 = vmatpush1.bf16.msra.mxu0 %v8479_v7  ;;  %4925 = vmatprep.mubr.f32.mxu0 %v9118_v14  ;;  %v8513_v7 = vpack.c.bf16 %v7403_v37, %v7399_v9  ;;  %v7465_v9 = vld [vmem:[%s13555_s7 + $0x7e8] sm:$0xff] }
 0x7d9   : > { %8482 = vmatprep.subr.bf16.mxu0 %v8481_v0  ;;  %v8515_v0 = vpack.c.bf16 %v7402_v62, %v7398_v59  ;;  %v7469_v37 = vld [vmem:[%s13555_s7 + $0x808] sm:$0xff]  ;;  %v7464_v59 = vld [vmem:[%s13555_s7 + $0x7e0] sm:$0xff] }
 0x7da   : > { %v7468_v62 = vld [vmem:[%s13555_s7 + $0x800] sm:$0xff]  ;;  %v7477_v26 = vld [vmem:[%s13555_s7 + $0x848] sm:$0xff] }
 0x7dc   : > { %8484 = vmatpush1.bf16.msra.mxu0 %v8483_v22  ;;  %v7415_v22 = vld [vmem:[%s13555_s7 + $0x6b8] sm:$0xff] }
 0x7dd   : > { %8486 = vmatprep.subr.bf16.mxu0 %v8485_v35  ;;  %v7419_v35 = vld [vmem:[%s13555_s7 + $0x6d8] sm:$0xff] }
 0x7de   : > { %v8521_v45 = vpack.c.bf16 %v7419_v35, %v7415_v22  ;;  %v7485_v22 = vld [vmem:[%s13555_s7 + $0x888] sm:$0xff] }
 0x7e0   : > { %8488 = vmatpush1.bf16.msra.mxu0 %v8487_v47  ;;  %v7418_v47 = vld [vmem:[%s13555_s7 + $0x6d0] sm:$0xff] }
 0x7e1   : > { %7390 = vmatprep.subr.msk.mxu0 %vm1930_vm8, %v7387_v39  ;;  %v8523_v39 = vpack.c.bf16 %v7418_v47, %v7414_v50  ;;  %v7484_v50 = vld [vmem:[%s13555_s7 + $0x880] sm:$0xff] }
 0x7e4   : > { %7391 = vmatpush1.msk.msra.mxu0 %vm1930_vm8, %v7386_v4  ;;  %v7443_v4 = vld [vmem:[%s13555_s7 + $0x768] sm:$0xff] }
 0x7e5   : > { %7392 = vmatmul.mubr.msk.f32.vlgmr.msra.gmra.mrb[4].mxu0 %vm3744_vm0, %v4846_v21  ;;  %8490 = vmatprep.subr.bf16.mxu0 %v8489_v33  ;;  %v7422_v33 = vld [vmem:[%s13555_s7 + $0x6f0] sm:$0x1] }
 0x7e6   : > { %8492 = vmatpush1.bf16.msra.mxu0 %v8491_v30  ;;  %4996 = vmatprep.mubr.f32.mxu0 %v9118_v14  ;;  %v8525_v30 = vpack.c.bf16 %v7435_v23, %v7431_v63  ;;  %v7489_v63 = vld [vmem:[%s13555_s7 + $0x8a8] sm:$0x1]  ;;  %v7467_v23 = vld [vmem:[%s13555_s7 + $0x7f8] sm:$0xff] }
 0x7e7   : > { %8494 = vmatprep.subr.bf16.mxu0 %v8493_v43  ;;  %v8529_v43 = vpack.c.bf16 %v7443_v4, %v7439_v60  ;;  %v7470_v60 = vld [vmem:[%s13555_s7 + $0x810] sm:$0xff]  ;;  %v7475_v4 = vld [vmem:[%s13555_s7 + $0x838] sm:$0xff] }
 0x7ea   : > { %8496 = vmatpush1.bf16.msra.mxu0 %v8495_v28  ;;  %v8531_v28 = vpack.c.bf16 %v7442_v6, %v7438_v36 }
 0x7eb   : > { %8498 = vmatprep.subr.bf16.mxu0 %v8497_v18  ;;  %v8533_v18 = vpack.c.bf16 %v7451_v54, %v7447_v42  ;;  %v7474_v42 = vld [vmem:[%s13555_s7 + $0x830] sm:$0xff] }
 0x7ec   : > { %v7478_v54 = vld [vmem:[%s13555_s7 + $0x850] sm:$0xff] }
 0x7ee   : > { %8500 = vmatpush1.bf16.msra.mxu0 %v8499_v51  ;;  %v8535_v51 = vpack.c.bf16 %v7450_v44, %v7446_v56  ;;  %v8567_v56 = vpack.c.bf16 %v7478_v54, %v7474_v42  ;;  %v7524_v42 = vld [vmem:[%s13555_s7 + $0x990] sm:$0x1] }
 0x7ef   : > { %7393 = vmatprep.subr.msk.mxu0 %vm1930_vm8, %v7389_v24  ;;  %v7455_v24 = vld [vmem:[%s13555_s7 + $0x7c8] sm:$0x1] }
 0x7f2   : > { %7394 = vmatpush1.msk.msra.mxu0 %vm1930_vm8, %v7388_v40  ;;  %v7454_v40 = vld [vmem:[%s13555_s7 + $0x7c0] sm:$0x1] }
 0x7f3   : > { %7395 = vmatmul.mubr.msk.f32.vlgmr.msra.gmra.mrb[6].mxu0 %vm3744_vm0, %v4846_v21  ;;  %8502 = vmatprep.subr.bf16.mxu0 %v8501_v17  ;;  %v8527_v21 = vpack.c.bf16 %v7434_v27, %v7430_v57  ;;  %v8537_v17 = vpack.c.bf16 %v7437_v55, %v7433_v52  ;;  %v7471_v57 = vld [vmem:[%s13555_s7 + $0x818] sm:$0xff]  ;;  %v7466_v27 = vld [vmem:[%s13555_s7 + $0x7f0] sm:$0xff] }
 0x7f4   : > { %8504 = vmatpush1.bf16.msra.mxu0 %v8503_v49  ;;  %5115 = vmatprep.mubr.f32.mxu0 %v9118_v14  ;;  %v8539_v49 = vpack.c.bf16 %v7436_v16, %v7432_v1  ;;  %v7491_v16 = vld [vmem:[%s13555_s7 + $0x8b8] sm:$0x1] }
 0x7f5   : > { %8506 = vmatprep.subr.bf16.mxu0 %v8505_v5  ;;  %v12579_v5 = vmax.f32 %v12319_v34, 0.0  ;;  %v7453_v34 = vld [vmem:[%s13555_s7 + $0x7b8] sm:$0xff] }
 0x7f7   : > { %v5416_v36 = vrot.slane %v12579_v5, 1 }
 0x7f8   : > { %8508 = vmatpush1.bf16.msra.mxu0 %v8507_v48  ;;  %v8543_v48 = vpack.c.bf16 %v7444_v29, %v7440_v11  ;;  %v7490_v11 = vld [vmem:[%s13555_s7 + $0x8b0] sm:$0x1]  ;;  %v8573_v29 = vpack.c.bf16 %v7503_v10, %v7499_v53  ;;  %v7548_v53 = vld [vmem:[%s13555_s7 + $0xa20] sm:$0xff] }
 0x7f9   : > { %8510 = vmatprep.subr.bf16.mxu0 %v8509_v41  ;;  %v8545_v41 = vpack.c.bf16 %v7453_v34, %v7449_v32  ;;  %v7552_v10 = vld [vmem:[%s13555_s7 + $0xa40] sm:$0xff] }
 0x7fc   : > { %8512 = vmatpush1.bf16.msra.mxu0 %v8511_v2  ;;  %v8547_v2 = vpack.c.bf16 %v7452_v20, %v7448_v13  ;;  %v7515_v13 = vld [vmem:[%s13555_s7 + $0x948] sm:$0xff] }
 0x7fd   : > { %7424 = vmatprep.subr.msk.mxu0 %vm1930_vm8, %v7421_v58  ;;  %v7457_v58 = vld [vmem:[%s13555_s7 + $0x7d8] sm:$0x1]  ;;  %v7519_v20 = vld [vmem:[%s13555_s7 + $0x968] sm:$0xff] }
 0x800   : > { %7425 = vmatpush1.msk.msra.mxu0 %vm1930_vm8, %v7420_v46  ;;  %v7456_v46 = vld [vmem:[%s13555_s7 + $0x7d0] sm:$0x1] }
 0x801   : > { %7426 = vmatmul.mubr.msk.f32.vlgmr.msra.gmra.mrb[4].mxu0 %vm3744_vm0, %v5036_v25  ;;  %8514 = vmatprep.subr.bf16.mxu0 %v8513_v7  ;;  %v8549_v7 = vpack.c.bf16 %v7469_v37, %v7465_v9  ;;  %v7514_v9 = vld [vmem:[%s13555_s7 + $0x940] sm:$0xff] }
 0x802   : > { %8516 = vmatpush1.bf16.msra.mxu0 %v8515_v0  ;;  %5186 = vmatprep.mubr.f32.mxu0 %v9118_v14  ;;  %v8551_v0 = vpack.c.bf16 %v7468_v62, %v7464_v59  ;;  %v7518_v37 = vld [vmem:[%s13555_s7 + $0x960] sm:$0xff]  ;;  %v7523_v62 = vld [vmem:[%s13555_s7 + $0x988] sm:$0x1] }
 0x803   : > { %8518 = vmatprep.subr.bf16.mxu0 %v8517_v31  ;;  %v7472_v31 = vld [vmem:[%s13555_s7 + $0x820] sm:$0xff]  ;;  %v8583_v59 = vpack.c.bf16 %v7518_v37, %v7514_v9  ;;  %v7555_v9 = vld [vmem:[%s13555_s7 + $0xa58] sm:$0xff]  ;;  %v5796_v37 = vrot.slane %v12579_v5, 3 }
 0x804   : > { %v8555_v35 = vpack.c.bf16 %v7476_v38, %v7472_v31  ;;  %v7522_v31 = vld [vmem:[%s13555_s7 + $0x980] sm:$0x1] }
 0x806   : > { %8520 = vmatpush1.bf16.msra.mxu0 %v8519_v15  ;;  %v8557_v15 = vpack.c.bf16 %v7485_v22, %v7481_v12  ;;  %v5606_v22 = vrot.slane %v12579_v5, 2 }
 0x807   : > { %8522 = vmatprep.subr.bf16.mxu0 %v8521_v45  ;;  %v7480_v45 = vld [vmem:[%s13555_s7 + $0x860] sm:$0xff] }
 0x80a   : > { %8524 = vmatpush1.bf16.msra.mxu0 %v8523_v39 }
 0x80b   : > { %7427 = vmatprep.subr.msk.mxu0 %vm1930_vm8, %v7423_v3  ;;  %v8559_v3 = vpack.c.bf16 %v7484_v50, %v7480_v45  ;;  %v7512_v45 = vld [vmem:[%s13555_s7 + $0x930] sm:$0xff]  ;;  %v7517_v50 = vld [vmem:[%s13555_s7 + $0x958] sm:$0xff] }
 0x80e   : > { %7428 = vmatpush1.msk.msra.mxu0 %vm1930_vm8, %v7422_v33  ;;  %v7479_v33 = vld [vmem:[%s13555_s7 + $0x858] sm:$0xff] }
 0x80f   : > { %7429 = vmatmul.mubr.msk.f32.vlgmr.msra.gmra.mrb[6].mxu0 %vm3744_vm0, %v5036_v25  ;;  %8526 = vmatprep.subr.bf16.mxu0 %v8525_v30  ;;  %v8553_v25 = vpack.c.bf16 %v7477_v26, %v7473_v8  ;;  %v7488_v30 = vld [vmem:[%s13555_s7 + $0x8a0] sm:$0x1]  ;;  %v8565_v6 = vpack.c.bf16 %v7479_v33, %v7475_v4  ;;  %v7501_v8 = vld [vmem:[%s13555_s7 + $0x8d8] sm:$0xff]  ;;  %v7533_v33 = vld [vmem:[%s13555_s7 + $0x9a8] sm:$0xff] }
 0x810   : > { %8528 = vmatpush1.bf16.msra.mxu0 %v8527_v21  ;;  %5305 = vmatprep.mubr.f32.mxu0 %v9118_v14  ;;  %v8561_v21 = vpack.c.bf16 %v7471_v57, %v7467_v23  ;;  %v7505_v26 = vld [vmem:[%s13555_s7 + $0x8f8] sm:$0xff]  ;;  %v7516_v57 = vld [vmem:[%s13555_s7 + $0x950] sm:$0xff] }
 0x811   : > { %8530 = vmatprep.subr.bf16.mxu0 %v8529_v43  ;;  %v8563_v43 = vpack.c.bf16 %v7470_v60, %v7466_v27  ;;  %v8585_v38 = vpack.c.bf16 %v7505_v26, %v7501_v8  ;;  %v7520_v27 = vld [vmem:[%s13555_s7 + $0x970] sm:$0xff]  ;;  %v7525_v4 = vld [vmem:[%s13555_s7 + $0x998] sm:$0x1]  ;;  %v6764_v8 = vld [vmem:[%s13557_s9 + $0x88] sm:$0xff] }
 0x812   : > { %v8595_v60 = vpack.c.bf16 %v7520_v27, %v7516_v57  ;;  %v6747_v26 = vld [vmem:[%s13557_s9] sm:$0xff] }
 0x813   : > { %v6751_v27 = vld [vmem:[%s13557_s9 + $0x20] sm:$0xff] }
 0x814   : > { %8532 = vmatpush1.bf16.msra.mxu0 %v8531_v28  ;;  %v7483_v28 = vld [vmem:[%s13555_s7 + $0x878] sm:$0xff] }
 0x815   : > { %8534 = vmatprep.subr.bf16.mxu0 %v8533_v18  ;;  %v7487_v18 = vld [vmem:[%s13555_s7 + $0x898] sm:$0xff] }
 0x816   : > { %v8569_v44 = vpack.c.bf16 %v7487_v18, %v7483_v28 }
 0x818   : > { %8536 = vmatpush1.bf16.msra.mxu0 %v8535_v51  ;;  %v7482_v51 = vld [vmem:[%s13555_s7 + $0x870] sm:$0xff] }
 0x819   : > { %7458 = vmatprep.subr.msk.mxu0 %vm1930_vm8, %v7455_v24  ;;  %v7486_v24 = vld [vmem:[%s13555_s7 + $0x890] sm:$0xff] }
 0x81a   : > { %v8571_v1 = vpack.c.bf16 %v7486_v24, %v7482_v51  ;;  %v7549_v51 = vld [vmem:[%s13555_s7 + $0xa28] sm:$0xff] }
 0x81b   : > { %v7553_v24 = vld [vmem:[%s13555_s7 + $0xa48] sm:$0xff] }
 0x81c   : > { %7459 = vmatpush1.msk.msra.mxu0 %vm1930_vm8, %v7454_v40  ;;  %v7498_v40 = vld [vmem:[%s13555_s7 + $0x8c0] sm:$0xff] }
 0x81d   : > { %7460 = vmatmul.mubr.msk.f32.vlgmr.msra.gmra.mrb[4].mxu0 %vm3744_vm0, %v12579_v5  ;;  %8538 = vmatprep.subr.bf16.mxu0 %v8537_v17  ;;  %v7502_v17 = vld [vmem:[%s13555_s7 + $0x8e0] sm:$0xff] }
 0x81e   : > { %8540 = vmatpush1.bf16.msra.mxu0 %v8539_v49  ;;  %5376 = vmatprep.mubr.f32.mxu0 %v9118_v14  ;;  %v7507_v49 = vld [vmem:[%s13555_s7 + $0x908] sm:$0xff]  ;;  %v8575_v32 = vpack.c.bf16 %v7502_v17, %v7498_v40  ;;  %v8607_v40 = vpack.c.bf16 %v7552_v10, %v7548_v53 }
 0x81f   : > { %8542 = vmatprep.subr.bf16.mxu0 %v8541_v19  ;;  %v7511_v19 = vld [vmem:[%s13555_s7 + $0x928] sm:$0xff] }
 0x820   : > { %v8577_v34 = vpack.c.bf16 %v7511_v19, %v7507_v49  ;;  %v7557_v17 = vld [vmem:[%s13555_s7 + $0xa68] sm:$0x1]  ;;  %v7535_v49 = vld [vmem:[%s13555_s7 + $0x9b8] sm:$0xff] }
 0x821   : > { %v7539_v19 = vld [vmem:[%s13555_s7 + $0x9d8] sm:$0xff]  ;;  %v6772_v53 = vld [vmem:[%s13557_s9 + $0xc8] sm:$0xff] }
 0x822   : > { %8544 = vmatpush1.bf16.msra.mxu0 %v8543_v48  ;;  %v7506_v48 = vld [vmem:[%s13555_s7 + $0x900] sm:$0xff] }
 0x823   : > { %8546 = vmatprep.subr.bf16.mxu0 %v8545_v41  ;;  %v7510_v41 = vld [vmem:[%s13555_s7 + $0x920] sm:$0xff] }
 0x826   : > { %8548 = vmatpush1.bf16.msra.mxu0 %v8547_v2  ;;  %v8579_v2 = vpack.c.bf16 %v7510_v41, %v7506_v48  ;;  %v7556_v48 = vld [vmem:[%s13555_s7 + $0xa60] sm:$0x1]  ;;  %v8609_v41 = vpack.c.bf16 %v7539_v19, %v7535_v49  ;;  %v7583_v19 = vld [vmem:[%s13555_s7 + $0xb08] sm:$0xff] }
 0x827   : > { %7461 = vmatprep.subr.msk.mxu0 %vm1930_vm8, %v7457_v58  ;;  %v8581_v58 = vpack.c.bf16 %v7519_v20, %v7515_v13  ;;  %v7542_v13 = vld [vmem:[%s13555_s7 + $0x9f0] sm:$0xff]  ;;  %v7578_v49 = vld [vmem:[%s13555_s7 + $0xae0] sm:$0xff] }
 0x82a   : > { %7462 = vmatpush1.msk.msra.mxu0 %vm1930_vm8, %v7456_v46  ;;  %v7500_v46 = vld [vmem:[%s13555_s7 + $0x8d0] sm:$0xff] }
 0x82b   : > { %7463 = vmatmul.mubr.msk.f32.vlgmr.msra.gmra.mrb[6].mxu0 %vm3744_vm0, %v12579_v5  ;;  %8550 = vmatprep.subr.bf16.mxu0 %v8549_v7  ;;  %v7504_v7 = vld [vmem:[%s13555_s7 + $0x8f0] sm:$0xff] }
 0x82c   : > { %8552 = vmatpush1.bf16.msra.mxu0 %v8551_v0  ;;  %5495 = vmatprep.mubr.f32.mxu0 %v9118_v14  ;;  %v7509_v0 = vld [vmem:[%s13555_s7 + $0x918] sm:$0xff]  ;;  %v8587_v12 = vpack.c.bf16 %v7504_v7, %v7500_v46  ;;  %v6748_v7 = vld [vmem:[%s13557_s9 + $0x8] sm:$0xff] }
 0x82d   : > { %8554 = vmatprep.subr.bf16.mxu0 %v8553_v25  ;;  %v7513_v25 = vld [vmem:[%s13555_s7 + $0x938] sm:$0xff] }
 0x82e   : > { %v12650_v47 = vpop.f32.mrb[30].mxu1 }
 0x82f   : > { %v12652_v39 = vpop.f32.mrb[31].mxu1 }
 0x830   : > { %8556 = vmatpush1.bf16.msra.mxu0 %v8555_v35  ;;  %v8589_v35 = vpack.c.bf16 %v7513_v25, %v7509_v0  ;;  %v6765_v0 = vld [vmem:[%s13557_s9 + $0x90] sm:$0xff]  ;;  %v6766_v25 = vld [vmem:[%s13557_s9 + $0x98] sm:$0xff] }
 0x831   : > { %8558 = vmatprep.subr.bf16.mxu0 %v8557_v15  ;;  %v7508_v15 = vld [vmem:[%s13555_s7 + $0x910] sm:$0xff] }
 0x834   : > { %8560 = vmatpush1.bf16.msra.mxu0 %v8559_v3  ;;  %v7521_v3 = vld [vmem:[%s13555_s7 + $0x978] sm:$0xff] }
 0x835   : > { %7492 = vmatprep.subr.msk.mxu0 %vm1930_vm8, %v7489_v63  ;;  %v8591_v63 = vpack.c.bf16 %v7512_v45, %v7508_v15  ;;  %v8593_v23 = vpack.c.bf16 %v7521_v3, %v7517_v50  ;;  %v6767_v15 = vld [vmem:[%s13557_s9 + $0xa0] sm:$0xff]  ;;  %v6768_v45 = vld [vmem:[%s13557_s9 + $0xa8] sm:$0xff]  ;;  %v7550_v3 = vld [vmem:[%s13555_s7 + $0xa30] sm:$0xff] }
 0x836   : > { %v8725_v57 = vpack.c.bf16 %v6768_v45, %v6767_v15 }
 0x838   : > { %7493 = vmatpush1.msk.msra.mxu0 %vm1930_vm8, %v7488_v30  ;;  %v7537_v30 = vld [vmem:[%s13555_s7 + $0x9c8] sm:$0xff] }
 0x839   : > { %7494 = vmatmul.mubr.msk.f32.vlgmr.msra.gmra.mrb[4].mxu0 %vm3744_vm0, %v5416_v36  ;;  %8562 = vmatprep.subr.bf16.mxu0 %v8561_v21  ;;  %v7532_v21 = vld [vmem:[%s13555_s7 + $0x9a0] sm:$0xff]  ;;  %v8597_v54 = vpack.c.bf16 %v7537_v30, %v7533_v33  ;;  %v6769_v33 = vld [vmem:[%s13557_s9 + $0xb0] sm:$0xff]  ;;  %v6770_v30 = vld [vmem:[%s13557_s9 + $0xb8] sm:$0xff] }
 0x83a   : > { %8564 = vmatpush1.bf16.msra.mxu0 %v8563_v43  ;;  %5566 = vmatprep.mubr.f32.mxu0 %v9118_v14  ;;  %v7536_v43 = vld [vmem:[%s13555_s7 + $0x9c0] sm:$0xff] }
 0x83b   : > { %8566 = vmatprep.subr.bf16.mxu0 %v8565_v6  ;;  %v7545_v6 = vld [vmem:[%s13555_s7 + $0xa08] sm:$0xff]  ;;  %v8599_v28 = vpack.c.bf16 %v7536_v43, %v7532_v21  ;;  %v7559_v21 = vld [vmem:[%s13555_s7 + $0xa78] sm:$0x1] }
 0x83c   : > { %v12701_v52 = vpop.f32.mrb[32].mxu1  ;;  %v7567_v43 = vld [vmem:[%s13555_s7 + $0xa88] sm:$0xff] }
 0x83d   : > { %v12703_v55 = vpop.f32.mrb[33].mxu1 }
 0x83e   : > { %8568 = vmatpush1.bf16.msra.mxu0 %v8567_v56  ;;  %v7540_v56 = vld [vmem:[%s13555_s7 + $0x9e0] sm:$0xff] }
 0x83f   : > { %8570 = vmatprep.subr.bf16.mxu0 %v8569_v44  ;;  %v7544_v44 = vld [vmem:[%s13555_s7 + $0xa00] sm:$0xff] }
 0x842   : > { %8572 = vmatpush1.bf16.msra.mxu0 %v8571_v1  ;;  %v8603_v1 = vpack.c.bf16 %v7544_v44, %v7540_v56  ;;  %v7579_v56 = vld [vmem:[%s13555_s7 + $0xae8] sm:$0xff]  ;;  %v6753_v44 = vld [vmem:[%s13557_s9 + $0x30] sm:$0xff] }
 0x843   : > { %7495 = vmatprep.subr.msk.mxu0 %vm1930_vm8, %v7491_v16  ;;  %v8605_v16 = vpack.c.bf16 %v7553_v24, %v7549_v51  ;;  %v6754_v51 = vld [vmem:[%s13557_s9 + $0x38] sm:$0xff]  ;;  %v7558_v24 = vld [vmem:[%s13555_s7 + $0xa70] sm:$0x1] }
 0x846   : > { %7496 = vmatpush1.msk.msra.mxu0 %vm1930_vm8, %v7490_v11  ;;  %v7534_v11 = vld [vmem:[%s13555_s7 + $0x9b0] sm:$0xff] }
 0x847   : > { %7497 = vmatmul.mubr.msk.f32.vlgmr.msra.gmra.mrb[6].mxu0 %vm3744_vm0, %v5416_v36  ;;  %8574 = vmatprep.subr.bf16.mxu0 %v8573_v29  ;;  %v7541_v36 = vld [vmem:[%s13555_s7 + $0x9e8] sm:$0xff]  ;;  %v7538_v29 = vld [vmem:[%s13555_s7 + $0x9d0] sm:$0xff] }
 0x848   : > { %8576 = vmatpush1.bf16.msra.mxu0 %v8575_v32  ;;  %5685 = vmatprep.mubr.f32.mxu0 %v9118_v14  ;;  %v8601_v18 = vpack.c.bf16 %v7545_v6, %v7541_v36  ;;  %v7543_v32 = vld [vmem:[%s13555_s7 + $0x9f8] sm:$0xff]  ;;  %v8611_v20 = vpack.c.bf16 %v7538_v29, %v7534_v11  ;;  %v7571_v36 = vld [vmem:[%s13555_s7 + $0xaa8] sm:$0xff]  ;;  %v8731_v11 = vpack.c.bf16 %v6754_v51, %v6753_v44 }
 0x849   : > { %8578 = vmatprep.subr.bf16.mxu0 %v8577_v34  ;;  %v7547_v34 = vld [vmem:[%s13555_s7 + $0xa18] sm:$0xff]  ;;  %v7587_v29 = vld [vmem:[%s13555_s7 + $0xb28] sm:$0xff] }
 0x84c   : > { %8580 = vmatpush1.bf16.msra.mxu0 %v8579_v2  ;;  %v7546_v2 = vld [vmem:[%s13555_s7 + $0xa10] sm:$0xff] }
 0x84d   : > { %8582 = vmatprep.subr.bf16.mxu0 %v8581_v58  ;;  %v7551_v58 = vld [vmem:[%s13555_s7 + $0xa38] sm:$0xff] }
 0x84e   : > { %v8617_v50 = vpack.c.bf16 %v7555_v9, %v7551_v58  ;;  %v7582_v58 = vld [vmem:[%s13555_s7 + $0xb00] sm:$0xff] }
 0x84f   : > { %v7586_v9 = vld [vmem:[%s13555_s7 + $0xb20] sm:$0xff] }
 0x850   : > { %8584 = vmatpush1.bf16.msra.mxu0 %v8583_v59  ;;  %v8613_v59 = vpack.c.bf16 %v7547_v34, %v7543_v32  ;;  %v6755_v34 = vld [vmem:[%s13557_s9 + $0x40] sm:$0xff] }
 0x851   : > { %7526 = vmatprep.subr.msk.mxu0 %vm1930_vm8, %v7523_v62  ;;  %v6763_v62 = vld [vmem:[%s13557_s9 + $0x80] sm:$0xff] }
 0x852   : > { %v8717_v46 = vpack.c.bf16 %v6764_v8, %v6763_v62  ;;  %v6757_v62 = vld [vmem:[%s13557_s9 + $0x50] sm:$0xff]  ;;  %v6758_v8 = vld [vmem:[%s13557_s9 + $0x58] sm:$0xff] }
 0x854   : > { %7527 = vmatpush1.msk.msra.mxu0 %vm1930_vm8, %v7522_v31  ;;  %v8719_v31 = vpack.c.bf16 %v6748_v7, %v6747_v26  ;;  %8718 = vmatprep.subr.bf16.mxu1 %v8717_v46  ;;  %v8631_v26 = vpack.c.bf16 %v7586_v9, %v7582_v58  ;;  %v8739_v46 = vpack.c.bf16 %v6758_v8, %v6757_v62  ;;  %v7591_v7 = vld [vmem:[%s13555_s7 + $0xb48] sm:$0x1]  ;;  %v7610_v62 = vld [vmem:[%s13555_s7 + $0xbb0] sm:$0xff] }
 0x855   : > { %7528 = vmatmul.mubr.msk.f32.vlgmr.msra.gmra.mrb[4].mxu0 %vm3744_vm0, %v5606_v22  ;;  %8586 = vmatprep.subr.bf16.mxu0 %v8585_v38  ;;  %v8721_v38 = vpack.c.bf16 %v6766_v25, %v6765_v0  ;;  %v7569_v0 = vld [vmem:[%s13555_s7 + $0xa98] sm:$0xff]  ;;  %v7614_v8 = vld [vmem:[%s13555_s7 + $0xbd0] sm:$0xff] }
 0x856   : > { %8588 = vmatpush1.bf16.msra.mxu0 %v8587_v12  ;;  %5756 = vmatprep.mubr.f32.mxu0 %v9118_v14  ;;  %v6749_v12 = vld [vmem:[%s13557_s9 + $0x10] sm:$0xff]  ;;  %v7573_v25 = vld [vmem:[%s13555_s7 + $0xab8] sm:$0xff] }
 0x857   : > { %8590 = vmatprep.subr.bf16.mxu0 %v8589_v35  ;;  %v8615_v35 = vpack.c.bf16 %v7546_v2, %v7542_v13  ;;  %8720 = vmatpush3.bf16.msra.mxu1 %v8719_v31  ;;  %v6774_v13 = vld [vmem:[%s13557_s9 + $0xd8] sm:$0xff]  ;;  %v8629_v2 = vpack.c.bf16 %v7587_v29, %v7583_v19  ;;  %v7568_v31 = vld [vmem:[%s13555_s7 + $0xa90] sm:$0xff]  ;;  %v8633_v15 = vpack.c.bf16 %v7573_v25, %v7569_v0  ;;  %v7620_v19 = vld [vmem:[%s13555_s7 + $0xc00] sm:$0xff] }
 0x858   : > { %8722 = vmatprep.subr.bf16.mxu1 %v8721_v38  ;;  %v7572_v38 = vld [vmem:[%s13555_s7 + $0xab0] sm:$0xff]  ;;  %v7625_v29 = vld [vmem:[%s13555_s7 + $0xc28] sm:$0x1] }
 0x859   : > { %v8635_v45 = vpack.c.bf16 %v7572_v38, %v7568_v31  ;;  %v7618_v25 = vld [vmem:[%s13555_s7 + $0xbf0] sm:$0xff] }
 0x85a   : > { %8592 = vmatpush1.bf16.msra.mxu0 %v8591_v63  ;;  %v7554_v63 = vld [vmem:[%s13555_s7 + $0xa50] sm:$0xff] }
 0x85b   : > { %8594 = vmatprep.subr.bf16.mxu0 %v8593_v23  ;;  %v7622_v31 = vld [vmem:[%s13555_s7 + $0xc10] sm:$0xff] }
 0x85c   : > { %v8667_v38 = vpack.c.bf16 %v7622_v31, %v7618_v25  ;;  %v7685_v25 = vld [vmem:[%s13555_s7 + $0xda8] sm:$0xff] }
 0x85d   : > { %v7689_v31 = vld [vmem:[%s13555_s7 + $0xdc8] sm:$0xff] }
 0x85e   : > { %8596 = vmatpush1.bf16.msra.mxu0 %v8595_v60  ;;  %v6752_v60 = vld [vmem:[%s13557_s9 + $0x28] sm:$0xff] }
 0x85f   : > { %7529 = vmatprep.subr.msk.mxu0 %vm1930_vm8, %v7525_v4  ;;  %v8619_v4 = vpack.c.bf16 %v7554_v63, %v7550_v3  ;;  %v8727_v6 = vpack.c.bf16 %v6752_v60, %v6751_v27  ;;  %v7576_v63 = vld [vmem:[%s13555_s7 + $0xad0] sm:$0xff]  ;;  %v7589_v27 = vld [vmem:[%s13555_s7 + $0xb38] sm:$0xff] }
 0x862   : > { %7530 = vmatpush1.msk.msra.mxu0 %vm1930_vm8, %v7524_v42  ;;  %v7566_v42 = vld [vmem:[%s13555_s7 + $0xa80] sm:$0xff] }
 0x863   : > { %7531 = vmatmul.mubr.msk.f32.vlgmr.msra.gmra.mrb[6].mxu0 %vm3744_vm0, %v5606_v22  ;;  %8598 = vmatprep.subr.bf16.mxu0 %v8597_v54  ;;  %v6750_v22 = vld [vmem:[%s13557_s9 + $0x18] sm:$0xff]  ;;  %v7570_v54 = vld [vmem:[%s13555_s7 + $0xaa0] sm:$0xff] }
 0x864   : > { %8600 = vmatpush1.bf16.msra.mxu0 %v8599_v28  ;;  %5875 = vmatprep.mubr.f32.mxu0 %v9118_v14  ;;  %v8723_v23 = vpack.c.bf16 %v6750_v22, %v6749_v12  ;;  %v7575_v28 = vld [vmem:[%s13555_s7 + $0xac8] sm:$0xff]  ;;  %v8623_v10 = vpack.c.bf16 %v7570_v54, %v7566_v42  ;;  %v7577_v12 = vld [vmem:[%s13555_s7 + $0xad8] sm:$0xff]  ;;  %v7600_v42 = vld [vmem:[%s13555_s7 + $0xb60] sm:$0xff] }
 0x865   : > { %8602 = vmatprep.subr.bf16.mxu0 %v8601_v18  ;;  %v8729_v18 = vpack.c.bf16 %v6770_v30, %v6769_v33  ;;  %v7581_v22 = vld [vmem:[%s13555_s7 + $0xaf8] sm:$0xff]  ;;  %v7584_v33 = vld [vmem:[%s13555_s7 + $0xb10] sm:$0xff]  ;;  %v7604_v54 = vld [vmem:[%s13555_s7 + $0xb80] sm:$0xff] }
 0x866   : > { %8724 = vmatpush3.bf16.msra.mxu1 %v8723_v23  ;;  %v8637_v3 = vpack.c.bf16 %v7581_v22, %v7577_v12  ;;  %v7580_v23 = vld [vmem:[%s13555_s7 + $0xaf0] sm:$0xff]  ;;  %v8647_v51 = vpack.c.bf16 %v7604_v54, %v7600_v42  ;;  %v7627_v12 = vld [vmem:[%s13555_s7 + $0xc38] sm:$0x1]  ;;  %v7635_v22 = vld [vmem:[%s13555_s7 + $0xc48] sm:$0xff] }
 0x867   : > { %8726 = vmatprep.subr.bf16.mxu1 %v8725_v57  ;;  %v7585_v57 = vld [vmem:[%s13555_s7 + $0xb18] sm:$0xff]  ;;  %v8639_v60 = vpack.c.bf16 %v7580_v23, %v7576_v63  ;;  %v7588_v30 = vld [vmem:[%s13555_s7 + $0xb30] sm:$0xff]  ;;  %v7659_v54 = vld [vmem:[%s13555_s7 + $0xd08] sm:$0x1] }
 0x868   : > { %8604 = vmatpush1.bf16.msra.mxu0 %v8603_v1  ;;  %v8621_v1 = vpack.c.bf16 %v7571_v36, %v7567_v43  ;;  %v7593_v43 = vld [vmem:[%s13555_s7 + $0xb58] sm:$0x1]  ;;  %v7601_v36 = vld [vmem:[%s13555_s7 + $0xb68] sm:$0xff]  ;;  %v7626_v63 = vld [vmem:[%s13555_s7 + $0xc30] sm:$0x1] }
 0x869   : > { %8606 = vmatprep.subr.bf16.mxu0 %v8605_v16  ;;  %v6771_v16 = vld [vmem:[%s13557_s9 + $0xc0] sm:$0xff] }
 0x86a   : > { %8728 = vmatpush3.bf16.msra.mxu1 %v8727_v6  ;;  %v8733_v32 = vpack.c.bf16 %v6772_v53, %v6771_v16  ;;  %v7605_v6 = vld [vmem:[%s13555_s7 + $0xb88] sm:$0xff]  ;;  %v7612_v16 = vld [vmem:[%s13555_s7 + $0xbc0] sm:$0xff] }
 0x86b   : > { %8730 = vmatprep.subr.bf16.mxu1 %v8729_v18  ;;  %v7613_v18 = vld [vmem:[%s13555_s7 + $0xbc8] sm:$0xff]  ;;  %v8645_v44 = vpack.c.bf16 %v7605_v6, %v7601_v36  ;;  %v7650_v36 = vld [vmem:[%s13555_s7 + $0xcc0] sm:$0xff] }
 0x86c   : > { %8608 = vmatpush1.bf16.msra.mxu0 %v8607_v40  ;;  %v8625_v40 = vpack.c.bf16 %v7579_v56, %v7575_v28  ;;  %v7609_v28 = vld [vmem:[%s13555_s7 + $0xba8] sm:$0xff]  ;;  %v7592_v56 = vld [vmem:[%s13555_s7 + $0xb50] sm:$0x1]  ;;  %v7654_v6 = vld [vmem:[%s13555_s7 + $0xce0] sm:$0xff] }
 0x86d   : > { %7560 = vmatprep.subr.msk.mxu0 %vm1930_vm8, %v7557_v17  ;;  %v7574_v17 = vld [vmem:[%s13555_s7 + $0xac0] sm:$0xff]  ;;  %v7617_v53 = vld [vmem:[%s13555_s7 + $0xbe8] sm:$0xff]  ;;  %v8679_v42 = vpack.c.bf16 %v7654_v6, %v7650_v36  ;;  %v7682_v36 = vld [vmem:[%s13555_s7 + $0xd90] sm:$0xff] }
 0x86e   : > { %8732 = vmatpush3.bf16.msra.mxu1 %v8731_v11  ;;  %v7687_v6 = vld [vmem:[%s13555_s7 + $0xdb8] sm:$0xff] }
 0x86f   : > { %8734 = vmatprep.subr.bf16.mxu1 %v8733_v32  ;;  %v7603_v32 = vld [vmem:[%s13555_s7 + $0xb78] sm:$0xff] }
 0x870   : > { %7561 = vmatpush1.msk.msra.mxu0 %vm1930_vm8, %v7556_v48  ;;  %v6756_v48 = vld [vmem:[%s13557_s9 + $0x48] sm:$0xff] }
 0x871   : > { %7562 = vmatmul.mubr.msk.f32.vlgmr.msra.gmra.mrb[4].mxu0 %vm3744_vm0, %v5796_v37  ;;  %8610 = vmatprep.subr.bf16.mxu0 %v8609_v41  ;;  %v6773_v41 = vld [vmem:[%s13557_s9 + $0xd0] sm:$0xff] }
 0x872   : > { %8612 = vmatpush1.bf16.msra.mxu0 %v8611_v20  ;;  %5946 = vmatprep.mubr.f32.mxu0 %v9118_v14  ;;  %v8627_v20 = vpack.c.bf16 %v7578_v49, %v7574_v17  ;;  %v7616_v49 = vld [vmem:[%s13555_s7 + $0xbe0] sm:$0xff] }
 0x873   : > { %8614 = vmatprep.subr.bf16.mxu0 %v8613_v59  ;;  %v8737_v59 = vpack.c.bf16 %v6774_v13, %v6773_v41  ;;  %v8655_v11 = vpack.c.bf16 %v7620_v19, %v7616_v49  ;;  %v7606_v41 = vld [vmem:[%s13555_s7 + $0xb90] sm:$0xff]  ;;  %v7611_v13 = vld [vmem:[%s13555_s7 + $0xbb8] sm:$0xff] }
 0x874   : > { %v7648_v49 = vld [vmem:[%s13555_s7 + $0xcb0] sm:$0xff]  ;;  %v7653_v19 = vld [vmem:[%s13555_s7 + $0xcd8] sm:$0xff] }
 0x876   : > { %8616 = vmatpush1.bf16.msra.mxu0 %v8615_v35  ;;  %v7590_v35 = vld [vmem:[%s13555_s7 + $0xb40] sm:$0x1] }
 0x877   : > { %8618 = vmatprep.subr.bf16.mxu0 %v8617_v50  ;;  %v5986_v50 = vrot.slane %v12579_v5, 4 }
 0x87a   : > { %8620 = vmatpush1.bf16.msra.mxu0 %v8619_v4  ;;  %v8641_v4 = vpack.c.bf16 %v7589_v27, %v7585_v57 }
 0x87b   : > { %7563 = vmatprep.subr.msk.mxu0 %vm1930_vm8, %v7559_v21  ;;  %v8643_v21 = vpack.c.bf16 %v7588_v30, %v7584_v33  ;;  %v7651_v33 = vld [vmem:[%s13555_s7 + $0xcc8] sm:$0xff] }
 0x87c   : > { %v7655_v30 = vld [vmem:[%s13555_s7 + $0xce8] sm:$0xff] }
 0x87e   : > { %7564 = vmatpush1.msk.msra.mxu0 %vm1930_vm8, %v7558_v24  ;;  %v8649_v24 = vpack.c.bf16 %v7613_v18, %v7609_v28  ;;  %v7637_v28 = vld [vmem:[%s13555_s7 + $0xc58] sm:$0xff] }
 0x87f   : > { %7565 = vmatmul.mubr.msk.f32.vlgmr.msra.gmra.mrb[6].mxu0 %vm3744_vm0, %v5796_v37  ;;  %8622 = vmatprep.subr.bf16.mxu0 %v8621_v1  ;;  %v8735_v37 = vpack.c.bf16 %v6756_v48, %v6755_v34  ;;  %v7608_v1 = vld [vmem:[%s13555_s7 + $0xba0] sm:$0xff]  ;;  %v7607_v34 = vld [vmem:[%s13555_s7 + $0xb98] sm:$0xff]  ;;  %v7602_v48 = vld [vmem:[%s13555_s7 + $0xb70] sm:$0xff] }
 0x880   : > { %8624 = vmatpush1.bf16.msra.mxu0 %v8623_v10  ;;  %6065 = vmatprep.mubr.f32.mxu0 %v9118_v14  ;;  %v7621_v10 = vld [vmem:[%s13555_s7 + $0xc08] sm:$0xff]  ;;  %v8657_v58 = vpack.c.bf16 %v7607_v34, %v7603_v32  ;;  %v8659_v9 = vpack.c.bf16 %v7606_v41, %v7602_v48  ;;  %v7641_v18 = vld [vmem:[%s13555_s7 + $0xc78] sm:$0xff]  ;;  %v7652_v34 = vld [vmem:[%s13555_s7 + $0xcd0] sm:$0xff] }
 0x881   : > { %8626 = vmatprep.subr.bf16.mxu0 %v8625_v40  ;;  %8736 = vmatpush3.bf16.msra.mxu1 %v8735_v37  ;;  %v8651_v40 = vpack.c.bf16 %v7612_v16, %v7608_v1  ;;  %v8653_v17 = vpack.c.bf16 %v7621_v10, %v7617_v53  ;;  %v6176_v37 = vrot.slane %v12579_v5, 5  ;;  %v7658_v1 = vld [vmem:[%s13555_s7 + $0xd00] sm:$0x1]  ;;  %v8681_v16 = vpack.c.bf16 %v7641_v18, %v7637_v28  ;;  %v7656_v48 = vld [vmem:[%s13555_s7 + $0xcf0] sm:$0xff] }
 0x882   : > { %8738 = vmatprep.subr.bf16.mxu1 %v8737_v59  ;;  %v6366_v10 = vrot.slane %v12579_v5, 6  ;;  %v8691_v41 = vpack.c.bf16 %v7656_v48, %v7652_v34  ;;  %v7686_v28 = vld [vmem:[%s13555_s7 + $0xdb0] sm:$0xff]  ;;  %v6717_v34 = vld [vmem:[%s13556_s8] sm:$0xf] }
 0x883   : > { %v7690_v18 = vld [vmem:[%s13555_s7 + $0xdd0] sm:$0xff]  ;;  %v13678_v48 = vld [vmem:[#allocation8_spill] sm:$0xff] }
 0x884   : > { %8628 = vmatpush1.bf16.msra.mxu0 %v8627_v20  ;;  %v7615_v20 = vld [vmem:[%s13555_s7 + $0xbd8] sm:$0xff] }
 0x885   : > { %8630 = vmatprep.subr.bf16.mxu0 %v8629_v2  ;;  %8740 = vmatpush3.bf16.msra.mxu1 %v8739_v46  ;;  %v7624_v2 = vld [vmem:[%s13555_s7 + $0xc20] sm:$0x1]  ;;  %v8661_v59 = vpack.c.bf16 %v7615_v20, %v7611_v13  ;;  %v7623_v46 = vld [vmem:[%s13555_s7 + $0xc18] sm:$0xff]  ;;  %v7669_v20 = vld [vmem:[%s13555_s7 + $0xd28] sm:$0xff] }
 0x886   : > { %v7661_v13 = vld [vmem:[%s13555_s7 + $0xd18] sm:$0x1] }
 0x888   : > { %8632 = vmatpush1.bf16.msra.mxu0 %v8631_v26  ;;  %v7619_v26 = vld [vmem:[%s13555_s7 + $0xbf8] sm:$0xff] }
 0x889   : > { %7594 = vmatprep.subr.msk.mxu0 %vm1930_vm8, %v7591_v7  ;;  %v8663_v7 = vpack.c.bf16 %v7614_v8, %v7610_v62  ;;  %v8665_v0 = vpack.c.bf16 %v7623_v46, %v7619_v26  ;;  %v7660_v62 = vld [vmem:[%s13555_s7 + $0xd10] sm:$0x1] }
 0x88c   : > { %7595 = vmatpush1.msk.msra.mxu0 %vm1930_vm8, %v7590_v35  ;;  %v7639_v35 = vld [vmem:[%s13555_s7 + $0xc68] sm:$0xff] }
 0x88d   : > { %7596 = vmatmul.mubr.msk.f32.vlgmr.msra.gmra.mrb[4].mxu0 %vm3744_vm0, %v5986_v50  ;;  %8634 = vmatprep.subr.bf16.mxu0 %v8633_v15  ;;  %v7634_v15 = vld [vmem:[%s13555_s7 + $0xc40] sm:$0xff]  ;;  %v8669_v23 = vpack.c.bf16 %v7639_v35, %v7635_v22 }
 0x88e   : > { %8636 = vmatpush1.bf16.msra.mxu0 %v8635_v45  ;;  %6136 = vmatprep.mubr.f32.mxu0 %v9118_v14  ;;  %v7638_v45 = vld [vmem:[%s13555_s7 + $0xc60] sm:$0xff] }
 0x88f   : > { %8638 = vmatprep.subr.bf16.mxu0 %v8637_v3  ;;  %v7647_v3 = vld [vmem:[%s13555_s7 + $0xca8] sm:$0xff]  ;;  %v8671_v57 = vpack.c.bf16 %v7638_v45, %v7634_v15  ;;  %v7684_v22 = vld [vmem:[%s13555_s7 + $0xda0] sm:$0xff] }
 0x890   : > { %v7688_v35 = vld [vmem:[%s13555_s7 + $0xdc0] sm:$0xff]  ;;  %v7693_v45 = vld [vmem:[%s13555_s7 + $0xde8] sm:$0x1] }
 0x891   : > { %v8703_v15 = vpack.c.bf16 %v7688_v35, %v7684_v22  ;;  %v13681_v35 = vsub.s32 3, %v13678_v48 }
 0x892   : > { %8640 = vmatpush1.bf16.msra.mxu0 %v8639_v60  ;;  %v7642_v60 = vld [vmem:[%s13555_s7 + $0xc80] sm:$0xff] }
 0x893   : > { %8642 = vmatprep.subr.bf16.mxu0 %v8641_v4  ;;  %v7646_v4 = vld [vmem:[%s13555_s7 + $0xca0] sm:$0xff] }
 0x896   : > { %8644 = vmatpush1.bf16.msra.mxu0 %v8643_v21  ;;  %v8675_v21 = vpack.c.bf16 %v7646_v4, %v7642_v60  ;;  %v7692_v60 = vld [vmem:[%s13555_s7 + $0xde0] sm:$0x1] }
 0x897   : > { %7597 = vmatprep.subr.msk.mxu0 %vm1930_vm8, %v7593_v43  ;;  %v8677_v43 = vpack.c.bf16 %v7655_v30, %v7651_v33  ;;  %v6556_v30 = vrot.slane %v12579_v5, 7 }
 0x89a   : > { %7598 = vmatpush1.msk.msra.mxu0 %vm1930_vm8, %v7592_v56  ;;  %v7636_v56 = vld [vmem:[%s13555_s7 + $0xc50] sm:$0xff] }
 0x89b   : > { %7599 = vmatmul.mubr.msk.f32.vlgmr.msra.gmra.mrb[6].mxu0 %vm3744_vm0, %v5986_v50  ;;  %8646 = vmatprep.subr.bf16.mxu0 %v8645_v44  ;;  %v7643_v50 = vld [vmem:[%s13555_s7 + $0xc88] sm:$0xff]  ;;  %v7640_v44 = vld [vmem:[%s13555_s7 + $0xc70] sm:$0xff] }
 0x89c   : > { %8648 = vmatpush1.bf16.msra.mxu0 %v8647_v51  ;;  %6255 = vmatprep.mubr.f32.mxu0 %v9118_v14  ;;  %v8673_v27 = vpack.c.bf16 %v7647_v3, %v7643_v50  ;;  %v7645_v51 = vld [vmem:[%s13555_s7 + $0xc98] sm:$0xff]  ;;  %v8683_v53 = vpack.c.bf16 %v7640_v44, %v7636_v56  ;;  %v8715_v56 = vpack.c.bf16 %v7690_v18, %v7686_v28  ;;  %v13682_v28 = vsub.s32 2, %v13678_v48 }
 0x89d   : > { %8650 = vmatprep.subr.bf16.mxu0 %v8649_v24  ;;  %v7649_v24 = vld [vmem:[%s13555_s7 + $0xcb8] sm:$0xff] }
 0x89e   : > { %v7671_v50 = vld [vmem:[%s13555_s7 + $0xd38] sm:$0xff]  ;;  %v6730_v18 = vrot.slane %v6717_v34, %v13682_v28 }
 0x89f   : > { %v7675_v3 = vld [vmem:[%s13555_s7 + $0xd58] sm:$0xff] }
 0x8a0   : > { %8652 = vmatpush1.bf16.msra.mxu0 %v8651_v40  ;;  %v8685_v40 = vpack.c.bf16 %v7649_v24, %v7645_v51  ;;  %v8705_v4 = vpack.c.bf16 %v7675_v3, %v7671_v50  ;;  %v7695_v44 = vld [vmem:[%s13555_s7 + $0xdf8] sm:$0x1]  ;;  %v7694_v51 = vld [vmem:[%s13555_s7 + $0xdf0] sm:$0x1]  ;;  %v6775_v24 = vld [vmem:[%s13557_s9 + $0xe0] sm:$0xff] }
 0x8a1   : > { %8654 = vmatprep.subr.bf16.mxu0 %v8653_v17  ;;  %v7644_v17 = vld [vmem:[%s13555_s7 + $0xc90] sm:$0xff] }
 0x8a4   : > { %8656 = vmatpush1.bf16.msra.mxu0 %v8655_v11  ;;  %v7657_v11 = vld [vmem:[%s13555_s7 + $0xcf8] sm:$0xff] }
 0x8a5   : > { %7628 = vmatprep.subr.msk.mxu0 %vm1930_vm8, %v7625_v29  ;;  %v8687_v29 = vpack.c.bf16 %v7648_v49, %v7644_v17  ;;  %v8689_v32 = vpack.c.bf16 %v7657_v11, %v7653_v19  ;;  %v6777_v17 = vld [vmem:[%s13557_s9 + $0xf0] sm:$0xff]  ;;  %v6778_v49 = vld [vmem:[%s13557_s9 + $0xf8] sm:$0xff] }
 0x8a6   : > { %v6761_v19 = vld [vmem:[%s13557_s9 + $0x70] sm:$0xff]  ;;  %v8745_v11 = vpack.c.bf16 %v6778_v49, %v6777_v17  ;;  %v6946_v49 = vld [vmem:[%s13559_s11 + $0x20] sm:$0xff] }
 0x8a8   : > { %7629 = vmatpush1.msk.msra.mxu0 %vm1930_vm8, %v7624_v2  ;;  %v7673_v2 = vld [vmem:[%s13555_s7 + $0xd48] sm:$0xff] }
 0x8a9   : > { %7630 = vmatmul.mubr.msk.f32.vlgmr.msra.gmra.mrb[4].mxu0 %vm3744_vm0, %v6176_v37  ;;  %8658 = vmatprep.subr.bf16.mxu0 %v8657_v58  ;;  %v7668_v58 = vld [vmem:[%s13555_s7 + $0xd20] sm:$0xff]  ;;  %v8693_v8 = vpack.c.bf16 %v7673_v2, %v7669_v20  ;;  %v13680_v2 = vsub.s32 1, %v13678_v48 }
 0x8aa   : > { %8660 = vmatpush1.bf16.msra.mxu0 %v8659_v9  ;;  %6326 = vmatprep.mubr.f32.mxu0 %v9118_v14  ;;  %v7672_v9 = vld [vmem:[%s13555_s7 + $0xd40] sm:$0xff] }
 0x8ab   : > { %8662 = vmatprep.subr.bf16.mxu0 %v8661_v59  ;;  %v7681_v59 = vld [vmem:[%s13555_s7 + $0xd88] sm:$0xff]  ;;  %v8695_v26 = vpack.c.bf16 %v7672_v9, %v7668_v58  ;;  %v6726_v58 = vrot.slane %v6717_v34, %v13680_v2  ;;  %v6953_v2 = vld [vmem:[%s13559_s11 + $0x58] sm:$0xff] }
 0x8ae   : > { %8664 = vmatpush1.bf16.msra.mxu0 %v8663_v7  ;;  %v7676_v7 = vld [vmem:[%s13555_s7 + $0xd60] sm:$0xff] }
 0x8af   : > { %8666 = vmatprep.subr.bf16.mxu0 %v8665_v0  ;;  %v7680_v0 = vld [vmem:[%s13555_s7 + $0xd80] sm:$0xff] }
 0x8b2   : > { %8668 = vmatpush1.bf16.msra.mxu0 %v8667_v38  ;;  %v8699_v38 = vpack.c.bf16 %v7680_v0, %v7676_v7 }
 0x8b3   : > { %7631 = vmatprep.subr.msk.mxu0 %vm1930_vm8, %v7627_v12  ;;  %v8701_v12 = vpack.c.bf16 %v7689_v31, %v7685_v25 }
 0x8b6   : > { %7632 = vmatpush1.msk.msra.mxu0 %vm1930_vm8, %v7626_v63  ;;  %v7670_v63 = vld [vmem:[%s13555_s7 + $0xd30] sm:$0xff] }
 0x8b7   : > { %7633 = vmatmul.mubr.msk.f32.vlgmr.msra.gmra.mrb[6].mxu0 %vm3744_vm0, %v6176_v37  ;;  %8670 = vmatprep.subr.bf16.mxu0 %v8669_v23  ;;  %v7677_v37 = vld [vmem:[%s13555_s7 + $0xd68] sm:$0xff]  ;;  %v7674_v23 = vld [vmem:[%s13555_s7 + $0xd50] sm:$0xff] }
 0x8b8   : > { %8672 = vmatpush1.bf16.msra.mxu0 %v8671_v57  ;;  %6445 = vmatprep.mubr.f32.mxu0 %v9118_v14  ;;  %v8697_v46 = vpack.c.bf16 %v7681_v59, %v7677_v37  ;;  %v7679_v57 = vld [vmem:[%s13555_s7 + $0xd78] sm:$0xff]  ;;  %v8707_v33 = vpack.c.bf16 %v7674_v23, %v7670_v63  ;;  %v6785_v63 = vld [vmem:[%s13557_s9 + $0x130] sm:$0xff] }
 0x8b9   : > { %8674 = vmatprep.subr.bf16.mxu0 %v8673_v27  ;;  %v7683_v27 = vld [vmem:[%s13555_s7 + $0xd98] sm:$0xff] }
 0x8ba   : > { %v6786_v23 = vld [vmem:[%s13557_s9 + $0x138] sm:$0xff] }
 0x8bc   : > { %8676 = vmatpush1.bf16.msra.mxu0 %v8675_v21  ;;  %v8709_v21 = vpack.c.bf16 %v7683_v27, %v7679_v57 }
 0x8bd   : > { %8678 = vmatprep.subr.bf16.mxu0 %v8677_v43  ;;  %v7678_v43 = vld [vmem:[%s13555_s7 + $0xd70] sm:$0xff] }
 0x8be   : > { %v8711_v5 = vpack.c.bf16 %v7682_v36, %v7678_v43  ;;  %v6791_v36 = vld [vmem:[%s13557_s9 + $0x160] sm:$0xff] }
 0x8c0   : > { %8680 = vmatpush1.bf16.msra.mxu0 %v8679_v42  ;;  %v7691_v42 = vld [vmem:[%s13555_s7 + $0xdd8] sm:$0xff] }
 0x8c1   : > { %7662 = vmatprep.subr.msk.mxu0 %vm1930_vm8, %v7659_v54  ;;  %v8713_v54 = vpack.c.bf16 %v7691_v42, %v7687_v6  ;;  %v6792_v6 = vld [vmem:[%s13557_s9 + $0x168] sm:$0xff] }
 0x8c2   : > { %v8768_v42 = vpack.c.bf16 %v6792_v6, %v6791_v36 }
 0x8c4   : > { %7663 = vmatpush1.msk.msra.mxu0 %vm1930_vm8, %v7658_v1  ;;  %v6776_v1 = vld [vmem:[%s13557_s9 + $0xe8] sm:$0xff] }
 0x8c5   : > { %7664 = vmatmul.mubr.msk.f32.vlgmr.msra.gmra.mrb[4].mxu0 %vm3744_vm0, %v6366_v10  ;;  %8682 = vmatprep.subr.bf16.mxu0 %v8681_v16  ;;  %v8741_v16 = vpack.c.bf16 %v6776_v1, %v6775_v24  ;;  %v6942_v1 = vld [vmem:[%s13559_s11] sm:$0xff] }
 0x8c6   : > { %8684 = vmatpush1.bf16.msra.mxu0 %v8683_v53  ;;  %6516 = vmatprep.mubr.f32.mxu0 %v9118_v14  ;;  %v6759_v53 = vld [vmem:[%s13557_s9 + $0x60] sm:$0xff] }
 0x8c7   : > { %8686 = vmatprep.subr.bf16.mxu0 %v8685_v40  ;;  %8742 = vmatprep.subr.bf16.mxu1 %v8741_v16  ;;  %v6943_v16 = vld [vmem:[%s13559_s11 + $0x8] sm:$0xff] }
 0x8ca   : > { %8688 = vmatpush1.bf16.msra.mxu0 %v8687_v29  ;;  %v6762_v29 = vld [vmem:[%s13557_s9 + $0x78] sm:$0xff] }
 0x8cb   : > { %8690 = vmatprep.subr.bf16.mxu0 %v8689_v32  ;;  %v8747_v32 = vpack.c.bf16 %v6762_v29, %v6761_v19  ;;  %v6947_v19 = vld [vmem:[%s13559_s11 + $0x28] sm:$0xff]  ;;  %v6948_v29 = vld [vmem:[%s13559_s11 + $0x30] sm:$0xff] }
 0x8ce   : > { %8692 = vmatpush1.bf16.msra.mxu0 %v8691_v41  ;;  %v13679_v41 = vsub.s32 0, %v13678_v48  ;;  %v6950_v48 = vld [vmem:[%s13559_s11 + $0x40] sm:$0xff] }
 0x8cf   : > { %7665 = vmatprep.subr.msk.mxu0 %vm1930_vm8, %v7661_v13 }
 0x8d0   : > { %v6722_v13 = vrot.slane %v6717_v34, %v13679_v41  ;;  %v6951_v41 = vld [vmem:[%s13559_s11 + $0x48] sm:$0xff] }
 0x8d2   : > { %7666 = vmatpush1.msk.msra.mxu0 %vm1930_vm8, %v7660_v62 }
 0x8d3   : > { %7667 = vmatmul.mubr.msk.f32.vlgmr.msra.gmra.mrb[6].mxu0 %vm3744_vm0, %v6366_v10  ;;  %8694 = vmatprep.subr.bf16.mxu0 %v8693_v8  ;;  %v6760_v10 = vld [vmem:[%s13557_s9 + $0x68] sm:$0xff]  ;;  %v6779_v8 = vld [vmem:[%s13557_s9 + $0x100] sm:$0xff] }
 0x8d4   : > { %8696 = vmatpush1.bf16.msra.mxu0 %v8695_v26  ;;  %6635 = vmatprep.mubr.f32.mxu0 %v9118_v14  ;;  %v8743_v40 = vpack.c.bf16 %v6760_v10, %v6759_v53  ;;  %v6780_v26 = vld [vmem:[%s13557_s9 + $0x108] sm:$0xff]  ;;  %v6944_v53 = vld [vmem:[%s13559_s11 + $0x10] sm:$0xff]  ;;  %v8774_v10 = vpack.c.bf16 %v6943_v16, %v6942_v1 }
 0x8d5   : > { %8698 = vmatprep.subr.bf16.mxu0 %v8697_v46  ;;  %v8750_v0 = vpack.c.bf16 %v6780_v26, %v6779_v8 }
 0x8d6   : > { %8744 = vmatpush3.bf16.msra.mxu1 %v8743_v40  ;;  %v6945_v40 = vld [vmem:[%s13559_s11 + $0x18] sm:$0xff] }
 0x8d7   : > { %8746 = vmatprep.subr.bf16.mxu1 %v8745_v11  ;;  %v8777_v17 = vpack.c.bf16 %v6945_v40, %v6944_v53  ;;  %v8780_v11 = vpack.c.bf16 %v6947_v19, %v6946_v49 }
 0x8d8   : > { %8700 = vmatpush1.bf16.msra.mxu0 %v8699_v38  ;;  %v6783_v38 = vld [vmem:[%s13557_s9 + $0x120] sm:$0xff] }
 0x8d9   : > { %8702 = vmatprep.subr.bf16.mxu0 %v8701_v12  ;;  %v6784_v12 = vld [vmem:[%s13557_s9 + $0x128] sm:$0xff] }
 0x8da   : > { %8748 = vmatpush3.bf16.msra.mxu1 %v8747_v32  ;;  %v6949_v32 = vld [vmem:[%s13559_s11 + $0x38] sm:$0xff] }
 0x8db   : > { %8749 = vmatprep.subr.bf16.mxu1 %v9124_v61 }
 0x8dc   : > { %8704 = vmatpush1.bf16.msra.mxu0 %v8703_v15  ;;  %v6734_v15 = vrot.slane %v6717_v34, %v13681_v35  ;;  %v8783_v34 = vpack.c.bf16 %v6949_v32, %v6948_v29 }
 0x8dd   : > { %7696 = vmatprep.subr.msk.mxu0 %vm1930_vm8, %v7693_v45  ;;  %v8756_v45 = vpack.c.bf16 %v6784_v12, %v6783_v38 }
 0x8e0   : > { %7697 = vmatpush1.msk.msra.mxu0 %vm1930_vm8, %v7692_v60  ;;  %v8759_v60 = vpack.c.bf16 %v6786_v23, %v6785_v63 }
 0x8e1   : > { %7698 = vmatmul.mubr.msk.f32.vlgmr.msra.gmra.mrb[4].mxu0 %vm3744_vm0, %v6556_v30  ;;  %8706 = vmatprep.subr.bf16.mxu0 %v8705_v4  ;;  %v6788_v4 = vld [vmem:[%s13557_s9 + $0x148] sm:$0xff] }
 0x8e2   : > { %8708 = vmatpush1.bf16.msra.mxu0 %v8707_v33  ;;  %6706 = vmatprep.mubr.f32.mxu0 %v9118_v14 }
 0x8e3   : > { %8710 = vmatprep.subr.bf16.mxu0 %v8709_v21  ;;  %v6790_v21 = vld [vmem:[%s13557_s9 + $0x158] sm:$0xff] }
 0x8e6   : > { %8712 = vmatpush1.bf16.msra.mxu0 %v8711_v5  ;;  %v6793_v5 = vld [vmem:[%s13557_s9 + $0x170] sm:$0xff] }
 0x8e7   : > { %8714 = vmatprep.subr.bf16.mxu0 %v8713_v54  ;;  %v6794_v54 = vld [vmem:[%s13557_s9 + $0x178] sm:$0xff] }
 0x8ea   : > { %8716 = vmatpush1.bf16.msra.mxu0 %v8715_v56  ;;  %v8771_v56 = vpack.c.bf16 %v6794_v54, %v6793_v5 }
 0x8eb   : > { %7699 = vmatprep.subr.msk.mxu0 %vm1930_vm8, %v7695_v44 }
 0x8ee   : > { %7700 = vmatpush1.msk.msra.mxu0 %vm1930_vm8, %v7694_v51  ;;  %v6795_v51 = vld [vmem:[%s13557_s9 + $0x180] sm:$0xff]  ;;  %vm9125_vm8 = vmmov 0  }
 0x8ef   : > { %7701 = vmatmul.mubr.msk.f32.vlgmr.msra.gmra.mrb[6].mxu0 %vm3744_vm0, %v6556_v30 }
 0x9b4   : > { %v6637_v20 = vpop.f32.mrb[4].mxu0 }
 0x9b5   : > { %v8799_v9 = vadd.f32 %v6637_v20, %v12650_v47  ;;  %v6639_v37 = vpop.f32.mrb[5].mxu0  ;;  %v6781_v47 = vld [vmem:[%s13557_s9 + $0x110] sm:$0xff] }
 0x9b6   : > { %v8800_v59 = vadd.f32 %v6639_v37, %v12652_v39  ;;  %v6782_v39 = vld [vmem:[%s13557_s9 + $0x118] sm:$0xff]  ;;  %v6952_v20 = vld [vmem:[%s13559_s11 + $0x50] sm:$0xff] }
 0x9b7   : > { %v6739_v62 = vadd.f32 %v8799_v9, %v6722_v13  ;;  %v8753_v31 = vpack.c.bf16 %v6782_v39, %v6781_v47  ;;  %v8786_v13 = vpack.c.bf16 %v6951_v41, %v6950_v48 }
 0x9b8   : > { %v6740_v46 = vadd.f32 %v8800_v59, %v6726_v58  ;;  %v8789_v58 = vpack.c.bf16 %v6953_v2, %v6952_v20 }
 0x9b9   : > { %v6743_v25 = vmax.f32 %v6739_v62, 0.0  ;;  %v6796_v62 = vld [vmem:[%s13558_s10] sm:$0x1] }
 0x9ba   : > { %v6744_v7 = vmax.f32 %v6740_v46, 0.0 }
 0x9bc   : > { %6865 = vmatprep.mubr.f32.mxu1 %v6744_v7 }
 0x9bd   : > { %6866 = vmatmul.mubr.f32.vlgmr.msra.gmra.mrb[34].mxu1 %v6743_v25 }
 0x9be   : > { %8751 = vmatpush1.bf16.msra.mxu1 %v8750_v0 }
 0x9bf   : > { %8752 = vmatprep.subr.bf16.mxu1 %v9124_v61 }
 0x9c2   : > { %8754 = vmatpush1.bf16.msra.mxu1 %v8753_v31  ;;  %v6708_v22 = vpop.f32.mrb[6].mxu0 }
 0x9c3   : > { %v8801_v50 = vadd.f32 %v6708_v22, %v12701_v52  ;;  %v6710_v3 = vpop.f32.mrb[7].mxu0  ;;  %8755 = vmatprep.subr.bf16.mxu1 %v9124_v61  ;;  %v6787_v52 = vld [vmem:[%s13557_s9 + $0x140] sm:$0xff] }
 0x9c4   : > { %v8802_v57 = vadd.f32 %v6710_v3, %v12703_v55  ;;  %v8762_v30 = vpack.c.bf16 %v6788_v4, %v6787_v52  ;;  %v6789_v55 = vld [vmem:[%s13557_s9 + $0x150] sm:$0xff] }
 0x9c5   : > { %v8765_v43 = vpack.c.bf16 %v6790_v21, %v6789_v55  ;;  %v6741_v44 = vadd.f32 %v8801_v50, %v6730_v18 }
 0x9c6   : > { %v6742_v27 = vadd.f32 %v8802_v57, %v6734_v15  ;;  %8757 = vmatpush1.bf16.msra.mxu1 %v8756_v45 }
 0x9c7   : > { %8758 = vmatprep.subr.bf16.mxu1 %v9124_v61  ;;  %v6745_v24 = vmax.f32 %v6741_v44, 0.0 }
 0x9c8   : > { %v6746_v33 = vmax.f32 %v6742_v27, 0.0 }
 0x9ca   : > { %8760 = vmatpush1.bf16.msra.mxu1 %v8759_v60  ;;  %7702 = vmatprep.mubr.msk.f32.mxu1 %vm6797_vm7, %v6746_v33 }
 0x9cb   : > { %8761 = vmatprep.subr.bf16.mxu1 %v9124_v61 }
 0x9ce   : > { %8763 = vmatpush1.bf16.msra.mxu1 %v8762_v30 }
 0x9cf   : > { %8764 = vmatprep.subr.bf16.mxu1 %v9124_v61 }
 0x9d2   : > { %8766 = vmatpush1.bf16.msra.mxu1 %v8765_v43 }
 0x9d3   : > { %8767 = vmatprep.subr.bf16.mxu1 %v9124_v61 }
 0x9d6   : > { %8769 = vmatpush1.bf16.msra.mxu1 %v8768_v42 }
 0x9d7   : > { %8770 = vmatprep.subr.bf16.mxu1 %v9124_v61 }
 0x9da   : > { %8772 = vmatpush1.bf16.msra.mxu1 %v8771_v56 }
 0x9db   : > { %6903 = vmatprep.subr.mxu1 %v9118_v14 }
 0x9de   : > { %6904 = vmatpush1.msra.mxu1 %v6795_v51 }
 0x9df   : > { %6936 = vmatmul.mubr.f32.vlgmr.msra.gmra.mrb[36].mxu1 %v6745_v24  ;;  %8773 = vmatprep.subr.bf16.mxu1 %v9124_v61 }
 0x9e0   : > { %8775 = vmatpush3.bf16.msra.mxu1 %v8774_v10  ;;  %7920 = vmatprep.mubr.msk.f32.mxu1 %vm9125_vm8, %v9118_v14 }
 0x9e1   : > { %8776 = vmatprep.subr.bf16.mxu1 %v9124_v61 }
 0x9e4   : > { %8778 = vmatpush3.bf16.msra.mxu1 %v8777_v17 }
 0x9e5   : > { %8779 = vmatprep.subr.bf16.mxu1 %v9124_v61 }
 0x9e8   : > { %8781 = vmatpush3.bf16.msra.mxu1 %v8780_v11 }
 0x9e9   : > { %8782 = vmatprep.subr.bf16.mxu1 %v9124_v61 }
 0x9ec   : > { %8784 = vmatpush3.bf16.msra.mxu1 %v8783_v34 }
 0x9ed   : > { %8785 = vmatprep.subr.bf16.mxu1 %v9124_v61 }
 0x9f0   : > { %8787 = vmatpush3.bf16.msra.mxu1 %v8786_v13 }
 0x9f1   : > { %8788 = vmatprep.subr.bf16.mxu1 %v9124_v61  ;;  %v6954_v61 = vld [vmem:[%s13559_s11 + $0x60] sm:$0x3] }
 0x9f4   : > { %8790 = vmatpush3.bf16.msra.mxu1 %v8789_v58 }
 0x9f5   : > { %7918 = vmatprep.subr.mxu1 %v9118_v14  ;;  %v6955_v14 = vld [vmem:[%s13560_s12] sm:$0x1] }
 0x9f8   : > { %7919 = vmatpush3.msk.msra.mxu1 %vm6959_vm9, %v6954_v61 }
 0xa90   : > { %v7862_v9 = vpop.f32.mrb[34].mxu1 }
 0xa91   : > { %v7863_v37 = vpop.f32.mrb[35].mxu1 }
 0xa92   : > { %v7864_v59 = vadd.f32 %v7863_v37, %v7862_v9 }
 0xa94   : > { %v6868_v8 = vadd.f32 %v7864_v59, %v6796_v62 }
 0xab2   : > { %v6937_v26 = vpop.f32.mrb[36].mxu1 }
 0xab3   : > { %v6938_v46 = vadd.f32 %v6937_v26, %v6868_v8  ;;  %v6939_v7 = vpop.f32.mrb[37].mxu1 }
 0xab5   : > { %v6941_v0 = vmax.f32 %v6938_v46, 0.0 }
 0xab7   : > { %7921 = vmatmul.mubr.msk.f32.vlgmr.msra.gmra.mrb[38].mxu1 %vm801_vm2, %v6941_v0 }
 0xb8a   : > { %v7029_v25 = vpop.f32.mrb[38].mxu1 }
 0xb8b   : > { %v7030_v47 = vadd.f32 %v7029_v25, %v6955_v14  ;;  %v7922_v39 = vpop.f32.mrb[39].mxu1 }
 0xb8d   : > { %7034 = vst.msk [vmem:[%s430_s17] sm:$0x1] %vm7033_vm10, %v7030_v47 }
 0xb8e   : > { %9057 = shalt.err (!%p9054_p3)
}
 0xb8f   : > { %s9058_s16 = scalar_lea.hbm %s13506_s0, 16  ;;  %s9062_s17 = scalar_lea.hbm %s13561_s13, 32 }
 0xb90   : > { %p9059_p4 = scmp.ne.s32.totalorder %s13506_s0, %s9058_s16  ;;  %p9063_p9 = scmp.lt.u32.totalorder %s13506_s0, %s13561_s13 }
 0xb91   : > { %p9064_p10 = scmp.lt.u32.totalorder %s9062_s17, %s9058_s16  ;;  %p9066_p12 = scmp.lt.u32.totalorder %s9058_s16, %s13506_s0 }
 0xb92   : > { %p9060_p7 = pnand %p9059_p4, %p9235_p5 }
 0xb93   : > { %p9065_p11 = por %p9064_p10, %p9063_p9 }
 0xb94   : > { %p9061_p8 = pneg %p9060_p7 }
 0xb95   : > { %p9067_p13 = por %p9066_p12, %p9065_p11 }
 0xb97   : > { %p9068_p0 = pnand %p9067_p13, %p9061_p8 }
 0xb99   : > { %9071 = shalt.err (!%p9068_p0)
}
 0xb9a   : > { %8895 = dma.vmem_to_hbm [thread:$0]  (%p9235_p5), %s13508_s24, 16, %s13506_s0, %s7036_s14  }
 0xb9b PF: > { %p8901_p1 = scmp.ge.s32.totalorder %s9106_s28, 2  ;;  %s7060_s23 = sand.u32 1, %s9094_s25  }
 0xb9c   : > { %s7061_s29 = scalar_lea.sflag [#allocation3], %s7060_s23 }
 0xb9d   : > { %p8898_p2 = pnand %p8901_p1, %p9239_p6 }
 0xb9f   : > { %9089 = dma.done.wait (!%p8898_p2), %s7061_s29, 16  }
 0xba0   : > { %9091 = vsyncadd (!%p8898_p2), %s7061_s29, 4294967280  ;;  %s13683_s28 = sld [smem:[#allocation6_spill]]  ;;  %s13684_s30 = sld [smem:[#allocation5_spill]] }
 0xba1   : > { %s13685_s27 = sld [smem:[#allocation7_spill]]  ;;  %s13686_s25 = smov %s9098_s26 }
 0xba6   : > { %p23_p3 = scmp.ge.s32.totalorder %s13683_s28, 4   ;;  %s13687_s26 = smov %s13684_s30 }
 0xba8   :  { %25 = sbr.rel (!%p23_p3) target bundleno = 5 (0x5), region = 138 }
 0xbaf   :  { %7065 = vsyncpa [#allocation3], 1 }
 0xbb0   :  { %7067 = vsyncpa [#allocation3 + $0x1], 1 }

</bundles_post_ra>
